<compile_context>
chip_gen: v7x
topology: tpu7x:2x2x1
jax: 0.10.0
libtpu: 0.0.40
codegen_flags: <defaults>
</compile_context>

<pallas_src>
import functools

import jax
import jax.numpy as jnp
from jax.experimental import pallas as pl
from jax.experimental.pallas import tpu as pltpu

_EPS = 1e-5


def _default_vmem_limit():
    # 128-MiB VMEM parts (v5e/v6e) -> ~100 MiB budget; 64-MiB parts (v7x) -> ~48 MiB.
    try:
        cap = int(pltpu.get_tpu_info().vmem_capacity_bytes)
    except Exception:
        cap = 64 * 1024 * 1024
    return max(32 * 1024 * 1024, min(cap - 16 * 1024 * 1024, 100 * 1024 * 1024))


_VMEM_LIMIT = _default_vmem_limit()


# ------------------------------ small helpers ------------------------------

def _round_up(x, m):
    return (x + m - 1) // m * m


def _row_tile(m, target):
    """Row tile (multiple of 8) and padded row count, minimizing padding waste."""
    m8 = _round_up(max(m, 1), 8)
    ntiles = max(1, -(-m8 // target))
    tm = _round_up(-(-m8 // ntiles), 8)
    return tm, ntiles * tm


def _pad_rows(x2, m_pad):
    m = x2.shape[0]
    if m == m_pad:
        return x2
    return jnp.pad(x2, ((0, m_pad - m), (0, 0)))


def _ln_f32(x, g, b, eps):
    """nn.LayerNorm over the last dim; statistics in f32."""
    xf = x.astype(jnp.float32)
    mean = jnp.mean(xf, axis=-1, keepdims=True)
    var = jnp.mean(jnp.square(xf - mean), axis=-1, keepdims=True)
    xn = (xf - mean) * jax.lax.rsqrt(var + eps)
    return xn * g.astype(jnp.float32) + b.astype(jnp.float32)


def _erf_f32(z):
    # Abramowitz & Stegun 7.1.26 rational approximation, |error| <= 1.5e-7.
    a1, a2, a3, a4, a5 = (0.254829592, -0.284496736, 1.421413741,
                          -1.453152027, 1.061405429)
    p = 0.3275911
    sgn = jnp.where(z >= 0.0, 1.0, -1.0)
    az = jnp.abs(z)
    t = 1.0 / (1.0 + p * az)
    poly = ((((a5 * t + a4) * t + a3) * t + a2) * t + a1) * t
    return sgn * (1.0 - poly * jnp.exp(-az * az))


def _gelu_exact(x):
    """erf-GELU (matches nn.GELU default)."""
    return 0.5 * x * (1.0 + _erf_f32(x * 0.7071067811865476))


def _largest_head_group(heads, dh_pad, max_width=1024):
    """Largest divisor of `heads` whose grouped lane width stays <= max_width."""
    for cand in range(heads, 0, -1):
        if heads % cand == 0 and cand * dh_pad <= max_width:
            return cand
    return 1


# ----------------------------- Pallas kernels ------------------------------

def _ln_add_kernel(x_ref, g_ref, b_ref, add_ref, o_ref, *, eps):
    y = _ln_f32(x_ref[...], g_ref[...], b_ref[...], eps) + add_ref[...].astype(jnp.float32)
    o_ref[...] = y.astype(o_ref.dtype)


def layernorm_add(x, g, b, add_row, eps=_EPS):
    """LayerNorm over the last dim followed by adding a broadcast (D,) row."""
    shape = x.shape
    d = shape[-1]
    x2 = x.reshape(-1, d)
    m = x2.shape[0]
    tm, m_pad = _row_tile(m, target=1024)
    x2 = _pad_rows(x2, m_pad)
    out = pl.pallas_call(
        functools.partial(_ln_add_kernel, eps=eps),
        out_shape=jax.ShapeDtypeStruct((m_pad, d), x.dtype),
        grid=(m_pad // tm,),
        in_specs=[pl.BlockSpec((tm, d), lambda i: (i, 0)),
                  pl.BlockSpec((1, d), lambda i: (0, 0)),
                  pl.BlockSpec((1, d), lambda i: (0, 0)),
                  pl.BlockSpec((1, d), lambda i: (0, 0))],
        out_specs=pl.BlockSpec((tm, d), lambda i: (i, 0)),
        compiler_params=pltpu.CompilerParams(
            dimension_semantics=("parallel",),
            vmem_limit_bytes=_VMEM_LIMIT),
    )(x2, g.reshape(1, d), b.reshape(1, d), add_row.reshape(1, d))
    return out[:m].reshape(shape)


def _ln_proj_kernel(x_ref, g_ref, b_ref, w_ref, bias_ref, o_ref, *, eps):
    y = _ln_f32(x_ref[...], g_ref[...], b_ref[...], eps).astype(jnp.bfloat16)
    acc = jnp.dot(y, w_ref[...], preferred_element_type=jnp.float32)
    o_ref[...] = (acc + bias_ref[...].astype(jnp.float32)).astype(o_ref.dtype)


def layernorm_proj(x, g, b, w, bias, eps=_EPS):
    """Fused: LayerNorm -> Linear(w, bias).  Weight fed to the MXU in bf16."""
    shape = x.shape
    d = shape[-1]
    n = w.shape[1]
    x2 = x.reshape(-1, d)
    m = x2.shape[0]
    tm, m_pad = _row_tile(m, target=1024)
    x2 = _pad_rows(x2, m_pad)
    out = pl.pallas_call(
        functools.partial(_ln_proj_kernel, eps=eps),
        out_shape=jax.ShapeDtypeStruct((m_pad, n), x.dtype),
        grid=(m_pad // tm,),
        in_specs=[pl.BlockSpec((tm, d), lambda i: (i, 0)),
                  pl.BlockSpec((1, d), lambda i: (0, 0)),
                  pl.BlockSpec((1, d), lambda i: (0, 0)),
                  pl.BlockSpec((d, n), lambda i: (0, 0)),       # bf16, resident
                  pl.BlockSpec((1, n), lambda i: (0, 0))],
        out_specs=pl.BlockSpec((tm, n), lambda i: (i, 0)),
        compiler_params=pltpu.CompilerParams(
            dimension_semantics=("parallel",),
            vmem_limit_bytes=_VMEM_LIMIT),
        cost_estimate=pl.CostEstimate(
            flops=int(2 * m_pad * d * n),
            transcendentals=0,
            bytes_accessed=int(4 * (m_pad * d + m_pad * n) + 2 * d * n)),
    )(x2, g.reshape(1, d), b.reshape(1, d), w.astype(jnp.bfloat16), bias.reshape(1, n))
    return out[:m].reshape(shape[:-1] + (n,))


def _ffn_kernel(x_ref, g_ref, b_ref, w1_ref, w2_ref, o_ref, *, eps):
    xn = _ln_f32(x_ref[...], g_ref[...], b_ref[...], eps).astype(jnp.bfloat16)
    h = jnp.dot(xn, w1_ref[...], preferred_element_type=jnp.float32)
    h = _gelu_exact(h).astype(jnp.bfloat16)
    y = jnp.dot(h, w2_ref[...], preferred_element_type=jnp.float32)
    o_ref[...] = (x_ref[...].astype(jnp.float32) + y).astype(o_ref.dtype)


def feed_forward_residual(x, p, eps=_EPS):
    """x + FFN(x), FFN = LN -> W1 -> GELU -> W2.  bf16 weights fully resident in VMEM."""
    shape = x.shape
    d = shape[-1]
    f = p["ff_w1"].shape[1]
    x2 = x.reshape(-1, d)
    m = x2.shape[0]
    tm, m_pad = _row_tile(m, target=512)
    x2 = _pad_rows(x2, m_pad)
    w1 = p["ff_w1"].astype(jnp.bfloat16)
    w2 = p["ff_w2"].astype(jnp.bfloat16)
    out = pl.pallas_call(
        functools.partial(_ffn_kernel, eps=eps),
        out_shape=jax.ShapeDtypeStruct((m_pad, d), x.dtype),
        grid=(m_pad // tm,),
        in_specs=[pl.BlockSpec((tm, d), lambda i: (i, 0)),
                  pl.BlockSpec((1, d), lambda i: (0, 0)),
                  pl.BlockSpec((1, d), lambda i: (0, 0)),
                  pl.BlockSpec((d, f), lambda i: (0, 0)),        # bf16, one DMA per call
                  pl.BlockSpec((f, d), lambda i: (0, 0))],       # bf16, one DMA per call
        out_specs=pl.BlockSpec((tm, d), lambda i: (i, 0)),
        compiler_params=pltpu.CompilerParams(
            dimension_semantics=("parallel",),
            vmem_limit_bytes=_VMEM_LIMIT),
        cost_estimate=pl.CostEstimate(
            flops=int(4 * m_pad * d * f),
            transcendentals=int(m_pad * f),
            bytes_accessed=int(4 * 2 * m_pad * d + 2 * 2 * d * f)),
    )(x2, p["ff_ln_g"].reshape(1, d), p["ff_ln_b"].reshape(1, d), w1, w2)
    return out[:m].reshape(shape)


def _perceiver_attn_kernel(x_ref, lat_ref, nmg_ref, nmb_ref, nlg_ref, nlb_ref,
                           wq_ref, wk_ref, wv_ref, wo_ref, o_ref,
                           xn_ref, latn_ref, acc_ref, *, scale, eps, hb, dh, nl_valid):
    g = pl.program_id(1)

    @pl.when(g == 0)
    def _():
        # LayerNorms computed once per batch element (bf16 scratch), reused by every group.
        xn_ref[...] = _ln_f32(x_ref[0], nmg_ref[...], nmb_ref[...], eps).astype(xn_ref.dtype)
        latn_ref[...] = _ln_f32(lat_ref[0], nlg_ref[...], nlb_ref[...], eps).astype(latn_ref.dtype)
        acc_ref[...] = lat_ref[0].astype(jnp.float32)            # fused residual

    xn = xn_ref[...]            # (N,  D) bf16 LN'd media
    latn = latn_ref[...]        # (Nl, D) bf16 LN'd latents
    wq = wq_ref[g]              # (D, hb*dh) bf16   (resident weights, dynamic group select)
    wk = wk_ref[g]
    wv = wv_ref[g]
    wo = wo_ref[g]              # (hb*dh, D) bf16

    # Grouped projections: lane width = hb*dh (multiple of 128) -> one wide MXU matmul each.
    q_g = (jnp.dot(latn, wq, preferred_element_type=jnp.float32) * scale).astype(jnp.bfloat16)
    kx_g = jnp.dot(xn, wk, preferred_element_type=jnp.float32).astype(jnp.bfloat16)
    kl_g = jnp.dot(latn, wk, preferred_element_type=jnp.float32).astype(jnp.bfloat16)
    vx_g = jnp.dot(xn, wv, preferred_element_type=jnp.float32).astype(jnp.bfloat16)
    vl_g = jnp.dot(latn, wv, preferred_element_type=jnp.float32).astype(jnp.bfloat16)

    nl_pad = latn.shape[0]
    key_mask = None
    if nl_valid < nl_pad:       # static decision: mask padded latent KEY columns only
        col = jax.lax.broadcasted_iota(jnp.int32, (1, nl_pad), 1)
        key_mask = jnp.where(col < nl_valid, 0.0, -1e30).astype(jnp.float32)

    dims = (((1,), (1,)), ((), ()))     # contract the per-head dh axis, no batch dims
    o_heads = []
    for h in range(hb):                 # static unroll; slices are 128-lane aligned (dh % 128 == 0)
        sl = slice(h * dh, (h + 1) * dh)
        q = q_g[:, sl]
        # Attention over logical concat [media ; latents] without materializing it.
        sim_x = jax.lax.dot_general(q, kx_g[:, sl], dims, preferred_element_type=jnp.float32)
        sim_l = jax.lax.dot_general(q, kl_g[:, sl], dims, preferred_element_type=jnp.float32)
        if key_mask is not None:
            sim_l = sim_l + key_mask
        mx = jnp.maximum(jnp.max(sim_x, axis=-1, keepdims=True),
                         jnp.max(sim_l, axis=-1, keepdims=True))
        px = jnp.exp(sim_x - mx)
        pq = jnp.exp(sim_l - mx)
        den = jnp.sum(px, axis=-1, keepdims=True) + jnp.sum(pq, axis=-1, keepdims=True)
        o_h = (jnp.dot(px.astype(jnp.bfloat16), vx_g[:, sl], preferred_element_type=jnp.float32)
               + jnp.dot(pq.astype(jnp.bfloat16), vl_g[:, sl], preferred_element_type=jnp.float32))
        o_h = o_h * pl.reciprocal(den, approx=True)
        o_heads.append(o_h.astype(jnp.bfloat16))

    o_cat = o_heads[0] if hb == 1 else jnp.concatenate(o_heads, axis=-1)   # (Nl, hb*dh)
    acc_ref[...] += jnp.dot(o_cat, wo, preferred_element_type=jnp.float32)

    @pl.when(g == pl.num_programs(1) - 1)
    def _():
        o_ref[0] = acc_ref[...].astype(o_ref.dtype)


def perceiver_attention_residual(x, latents, p, *, heads, dim_head, nl_valid, eps=_EPS):
    """latents + PerceiverAttention(x, latents) as ONE fused pallas_call.

    `latents` may be (1, nl_pad, d) (shared across batch, layer 0) or (b, nl_pad, d).
    """
    b, n, d = x.shape
    nl_pad = latents.shape[1]
    inner = heads * dim_head
    dh_pad = _round_up(dim_head, 128)            # zero-pad dim_head -> lane-aligned head slices
    hb = _largest_head_group(heads, dh_pad)      # heads per grid step
    g_groups = heads // hb
    ghd = hb * dh_pad
    scale = dim_head ** -0.5

    def split_qkv(w):                            # (d, inner) -> (G, d, hb*dh_pad) bf16
        w = w.reshape(d, heads, dim_head)
        if dh_pad != dim_head:
            w = jnp.pad(w, ((0, 0), (0, 0), (0, dh_pad - dim_head)))
        return w.reshape(d, g_groups, ghd).transpose(1, 0, 2).astype(jnp.bfloat16)

    wq = split_qkv(p["to_q_w"])
    wk = split_qkv(p["to_kv_w"][:, :inner])
    wv = split_qkv(p["to_kv_w"][:, inner:])
    wo = p["to_out_w"].reshape(heads, dim_head, d)
    if dh_pad != dim_head:
        wo = jnp.pad(wo, ((0, 0), (0, dh_pad - dim_head), (0, 0)))
    wo = wo.reshape(g_groups, ghd, d).astype(jnp.bfloat16)

    lat_map = (lambda i, g: (0, 0, 0)) if latents.shape[0] == 1 else (lambda i, g: (i, 0, 0))

    nk = n + nl_pad
    flops = 2 * b * (4 * nk * d * heads * dh_pad + 2 * heads * nl_pad * nk * dh_pad
                     + nl_pad * heads * dh_pad * d)
    bytes_accessed = int(4 * (b * n * d + (b + 1) * nl_pad * d) + 2 * 4 * heads * dh_pad * d)

    return pl.pallas_call(
        functools.partial(_perceiver_attn_kernel, scale=scale, eps=eps,
                          hb=hb, dh=dh_pad, nl_valid=nl_valid),
        out_shape=jax.ShapeDtypeStruct((b, nl_pad, d), x.dtype),
        grid=(b, g_groups),
        in_specs=[pl.BlockSpec((1, n, d), lambda i, g: (i, 0, 0)),
                  pl.BlockSpec((1, nl_pad, d), lat_map),
                  pl.BlockSpec((1, d), lambda i, g: (0, 0)),
                  pl.BlockSpec((1, d), lambda i, g: (0, 0)),
                  pl.BlockSpec((1, d), lambda i, g: (0, 0)),
                  pl.BlockSpec((1, d), lambda i, g: (0, 0)),
                  # Weights: full constant blocks -> fetched once per pallas_call, not per (b, g).
                  pl.BlockSpec((g_groups, d, ghd), lambda i, g: (0, 0, 0)),
                  pl.BlockSpec((g_groups, d, ghd), lambda i, g: (0, 0, 0)),
                  pl.BlockSpec((g_groups, d, ghd), lambda i, g: (0, 0, 0)),
                  pl.BlockSpec((g_groups, ghd, d), lambda i, g: (0, 0, 0))],
        out_specs=pl.BlockSpec((1, nl_pad, d), lambda i, g: (i, 0, 0)),
        scratch_shapes=[pltpu.VMEM((n, d), jnp.bfloat16),
                        pltpu.VMEM((nl_pad, d), jnp.bfloat16),
                        pltpu.VMEM((nl_pad, d), jnp.float32)],
        compiler_params=pltpu.CompilerParams(
            dimension_semantics=("parallel", "arbitrary"),
            vmem_limit_bytes=_VMEM_LIMIT),
        cost_estimate=pl.CostEstimate(
            flops=int(flops),
            transcendentals=int(b * heads * nl_pad * nk),
            bytes_accessed=bytes_accessed),
    )(x, latents,
      p["norm_media_g"].reshape(1, d), p["norm_media_b"].reshape(1, d),
      p["norm_latents_g"].reshape(1, d), p["norm_latents_b"].reshape(1, d),
      wq, wk, wv, wo)


# ------------------------------ model glue ---------------------------------

def cross_attention_forward(x, params, *, heads, dim_head):
    b = x.shape[0]
    # self.ln fused with the resampler's media positional-embedding add (T == 1).
    x = layernorm_add(x, params["ln_g"], params["ln_b"], params["media_pos_emb"][0, 0])

    nl = params["latents"].shape[0]
    nl_pad = _round_up(nl, 8)                    # (8,128)-aligned latent rows everywhere
    lat0 = params["latents"].astype(x.dtype)
    if nl_pad != nl:
        lat0 = jnp.pad(lat0, ((0, nl_pad - nl), (0, 0)))
    latents = lat0[None]                         # (1, nl_pad, d): no HBM broadcast for layer 0

    for layer in params["layers"]:
        latents = perceiver_attention_residual(x, latents, layer,
                                               heads=heads, dim_head=dim_head, nl_valid=nl)
        latents = feed_forward_residual(latents, layer)

    # Final LayerNorm fused with self.proj, then strip latent padding.
    out = layernorm_proj(latents, params["norm_g"], params["norm_b"],
                         params["proj_w"], params["proj_b"])
    out = out[:, :nl]
    return out[:, None]                          # (B, 1, num_latents, hidden)


# ------------------------------ init / main --------------------------------

def init_params(key, *, dim, hidden, num_latents, depth, heads, dim_head, ff_mult=4):
    inner = heads * dim_head
    ff_inner = dim * ff_mult
    keys = iter(jax.random.split(key, 8 + depth * 8))

    def nrm(shape, scale=0.02):
        return (scale * jax.random.normal(next(keys), shape)).astype(jnp.float32)

    params = {
        "ln_g": jnp.ones((dim,), jnp.float32),
        "ln_b": jnp.zeros((dim,), jnp.float32),
        "latents": nrm((num_latents, dim), 1.0),
        "media_pos_emb": nrm((1, 1, dim), 1.0),
        "norm_g": jnp.ones((dim,), jnp.float32),
        "norm_b": jnp.zeros((dim,), jnp.float32),
        "proj_w": nrm((dim, hidden)),
        "proj_b": nrm((hidden,)),
        "layers": [],
    }
    for _ in range(depth):
        params["layers"].append({
            "norm_media_g": jnp.ones((dim,), jnp.float32),
            "norm_media_b": jnp.zeros((dim,), jnp.float32),
            "norm_latents_g": jnp.ones((dim,), jnp.float32),
            "norm_latents_b": jnp.zeros((dim,), jnp.float32),
            "to_q_w": nrm((dim, inner)),
            "to_kv_w": nrm((dim, 2 * inner)),
            "to_out_w": nrm((inner, dim)),
            "ff_ln_g": jnp.ones((dim,), jnp.float32),
            "ff_ln_b": jnp.zeros((dim,), jnp.float32),
            "ff_w1": nrm((dim, ff_inner)),
            "ff_w2": nrm((ff_inner, dim)),
        })
    return params


if __name__ == "__main__":
    # Small stand-in for CrossAttention(patch_embed_dim=768, hidden=768,
    # num_latents=256+77, depth=2, heads=16, dim_head=96).
    # NUM_LATENTS=9 intentionally non-multiple-of-8 (like 333) to exercise padding + key mask.
    B, N = 2, 16
    DIM = 32            # patch_embed_dim
    HIDDEN = 32         # hidden_size
    NUM_LATENTS = 9     # stands in for 256 + 77
    DEPTH = 2
    HEADS = 4
    DIM_HEAD = 8        # inner_dim = HEADS * DIM_HEAD = 32

    key = jax.random.PRNGKey(0)
    k_params, k_x = jax.random.split(key)
    params = init_params(k_params, dim=DIM, hidden=HIDDEN, num_latents=NUM_LATENTS,
                         depth=DEPTH, heads=HEADS, dim_head=DIM_HEAD)
    x = jax.random.normal(k_x, (B, N, DIM), dtype=jnp.float32)

    fwd = jax.jit(functools.partial(cross_attention_forward,
                                    heads=HEADS, dim_head=DIM_HEAD))
    out = fwd(x, params)
    jax.block_until_ready(out)
    assert out.shape == (B, 1, NUM_LATENTS, HIDDEN), out.shape
    assert bool(jnp.all(jnp.isfinite(out)))
    print("KERNEL_OK")
</pallas_src>

<mosaic_0001>
module attributes {stable_mosaic.version = 11 : i64} {
  func.func @_ln_add_kernel(%arg0: i32, %arg1: memref<32x32xf32, #tpu.memory_space<vmem>>, %arg2: memref<1x32xf32, #tpu.memory_space<vmem>>, %arg3: memref<1x32xf32, #tpu.memory_space<vmem>>, %arg4: memref<1x32xf32, #tpu.memory_space<vmem>>, %arg5: memref<32x32xf32, #tpu.memory_space<vmem>>) attributes {dimension_semantics = [#tpu.dimension_semantics<parallel>], iteration_bounds = array<i64: 1>, scalar_prefetch = 0 : i64, scratch_operands = 0 : i64, tpu.core_type = #tpu.core_type<tc>, window_params = [{transform_indices = @transform_0, window_bounds = array<i64: 32, 32>}, {pipeline_mode = #tpu.pipeline_mode<synchronous>, transform_indices = @transform_1, window_bounds = array<i64: 1, 32>}, {pipeline_mode = #tpu.pipeline_mode<synchronous>, transform_indices = @transform_2, window_bounds = array<i64: 1, 32>}, {pipeline_mode = #tpu.pipeline_mode<synchronous>, transform_indices = @transform_3, window_bounds = array<i64: 1, 32>}, {transform_indices = @transform_4, window_bounds = array<i64: 32, 32>}]} {
    %c0 = arith.constant 0 : index
    %c0_0 = arith.constant 0 : index
    %0 = vector.load %arg1[%c0, %c0_0] : memref<32x32xf32, #tpu.memory_space<vmem>>, vector<32x32xf32>
    %c0_1 = arith.constant 0 : index
    %c0_2 = arith.constant 0 : index
    %1 = vector.load %arg2[%c0_1, %c0_2] : memref<1x32xf32, #tpu.memory_space<vmem>>, vector<1x32xf32>
    %c0_3 = arith.constant 0 : index
    %c0_4 = arith.constant 0 : index
    %2 = vector.load %arg3[%c0_3, %c0_4] : memref<1x32xf32, #tpu.memory_space<vmem>>, vector<1x32xf32>
    %cst = arith.constant dense<0.000000e+00> : vector<32xf32>
    %3 = vector.multi_reduction <add>, %0, %cst [1] : vector<32x32xf32> to vector<32xf32>
    %4 = vector.shape_cast %3 : vector<32xf32> to vector<32x1xf32>
    %cst_5 = arith.constant 3.200000e+01 : f32
    %5 = vector.broadcast %cst_5 : f32 to vector<32x1xf32>
    %6 = arith.divf %4, %5 : vector<32x1xf32>
    %7 = vector.broadcast %6 : vector<32x1xf32> to vector<32x32xf32>
    %8 = arith.subf %0, %7 : vector<32x32xf32>
    %9 = arith.mulf %8, %8 : vector<32x32xf32>
    %cst_6 = arith.constant dense<0.000000e+00> : vector<32xf32>
    %10 = vector.multi_reduction <add>, %9, %cst_6 [1] : vector<32x32xf32> to vector<32xf32>
    %11 = vector.shape_cast %10 : vector<32xf32> to vector<32x1xf32>
    %cst_7 = arith.constant 3.200000e+01 : f32
    %12 = vector.broadcast %cst_7 : f32 to vector<32x1xf32>
    %13 = arith.divf %11, %12 : vector<32x1xf32>
    %14 = vector.broadcast %6 : vector<32x1xf32> to vector<32x32xf32>
    %15 = arith.subf %0, %14 : vector<32x32xf32>
    %cst_8 = arith.constant 9.99999974E-6 : f32
    %16 = vector.broadcast %cst_8 : f32 to vector<32x1xf32>
    %17 = arith.addf %13, %16 : vector<32x1xf32>
    %18 = math.rsqrt %17 : vector<32x1xf32>
    %19 = vector.broadcast %18 : vector<32x1xf32> to vector<32x32xf32>
    %20 = arith.mulf %15, %19 : vector<32x32xf32>
    %21 = vector.broadcast %1 : vector<1x32xf32> to vector<32x32xf32>
    %22 = arith.mulf %20, %21 : vector<32x32xf32>
    %23 = vector.broadcast %2 : vector<1x32xf32> to vector<32x32xf32>
    %24 = arith.addf %22, %23 : vector<32x32xf32>
    %c0_9 = arith.constant 0 : index
    %c0_10 = arith.constant 0 : index
    %25 = vector.load %arg4[%c0_9, %c0_10] : memref<1x32xf32, #tpu.memory_space<vmem>>, vector<1x32xf32>
    %26 = vector.broadcast %25 : vector<1x32xf32> to vector<32x32xf32>
    %27 = arith.addf %24, %26 : vector<32x32xf32>
    %c0_11 = arith.constant 0 : index
    %c0_12 = arith.constant 0 : index
    %28 = vector.load %arg5[%c0_11, %c0_12] : memref<32x32xf32, #tpu.memory_space<vmem>>, vector<32x32xf32>
    tpu.vector_store %arg5[%c0_11, %c0_12], %27 {strides = array<i32>} : memref<32x32xf32, #tpu.memory_space<vmem>>, vector<32x32xf32>,
    return
  }
  func.func @transform_0(%arg0: i32) -> (i32, i32) {
    %c0_i32 = arith.constant 0 : i32
    %c0_i32_0 = arith.constant 0 : i32
    return %arg0, %c0_i32 : i32, i32
  }
  func.func @transform_1(%arg0: i32) -> (i32, i32) {
    %c0_i32 = arith.constant 0 : i32
    %c0_i32_0 = arith.constant 0 : i32
    %c0_i32_1 = arith.constant 0 : i32
    return %c0_i32, %c0_i32_0 : i32, i32
  }
  func.func @transform_2(%arg0: i32) -> (i32, i32) {
    %c0_i32 = arith.constant 0 : i32
    %c0_i32_0 = arith.constant 0 : i32
    %c0_i32_1 = arith.constant 0 : i32
    return %c0_i32, %c0_i32_0 : i32, i32
  }
  func.func @transform_3(%arg0: i32) -> (i32, i32) {
    %c0_i32 = arith.constant 0 : i32
    %c0_i32_0 = arith.constant 0 : i32
    %c0_i32_1 = arith.constant 0 : i32
    return %c0_i32, %c0_i32_0 : i32, i32
  }
  func.func @transform_4(%arg0: i32) -> (i32, i32) {
    %c0_i32 = arith.constant 0 : i32
    %c0_i32_0 = arith.constant 0 : i32
    return %arg0, %c0_i32 : i32, i32
  }
}

module attributes {stable_mosaic.version = 11 : i64} {
  func.func @_perceiver_attn_kernel(%arg0: i32, %arg1: i32, %arg2: memref<1x16x32xf32, #tpu.memory_space<vmem>>, %arg3: memref<1x16x32xf32, #tpu.memory_space<vmem>>, %arg4: memref<1x32xf32, #tpu.memory_space<vmem>>, %arg5: memref<1x32xf32, #tpu.memory_space<vmem>>, %arg6: memref<1x32xf32, #tpu.memory_space<vmem>>, %arg7: memref<1x32xf32, #tpu.memory_space<vmem>>, %arg8: memref<1x32x512xbf16, #tpu.memory_space<vmem>>, %arg9: memref<1x32x512xbf16, #tpu.memory_space<vmem>>, %arg10: memref<1x32x512xbf16, #tpu.memory_space<vmem>>, %arg11: memref<1x512x32xbf16, #tpu.memory_space<vmem>>, %arg12: memref<1x16x32xf32, #tpu.memory_space<vmem>>, %arg13: memref<16x32xbf16, #tpu.memory_space<vmem>>, %arg14: memref<16x32xbf16, #tpu.memory_space<vmem>>, %arg15: memref<16x32xf32, #tpu.memory_space<vmem>>) attributes {dimension_semantics = [#tpu.dimension_semantics<parallel>, #tpu.dimension_semantics<arbitrary>], iteration_bounds = array<i64: 2, 1>, scalar_prefetch = 0 : i64, scratch_operands = 3 : i64, tpu.core_type = #tpu.core_type<tc>, window_params = [{transform_indices = @transform_0, window_bounds = array<i64: 1, 16, 32>}, {pipeline_mode = #tpu.pipeline_mode<synchronous>, transform_indices = @transform_1, window_bounds = array<i64: 1, 16, 32>}, {pipeline_mode = #tpu.pipeline_mode<synchronous>, transform_indices = @transform_2, window_bounds = array<i64: 1, 32>}, {pipeline_mode = #tpu.pipeline_mode<synchronous>, transform_indices = @transform_3, window_bounds = array<i64: 1, 32>}, {pipeline_mode = #tpu.pipeline_mode<synchronous>, transform_indices = @transform_4, window_bounds = array<i64: 1, 32>}, {pipeline_mode = #tpu.pipeline_mode<synchronous>, transform_indices = @transform_5, window_bounds = array<i64: 1, 32>}, {pipeline_mode = #tpu.pipeline_mode<synchronous>, transform_indices = @transform_6, window_bounds = array<i64: 1, 32, 512>}, {pipeline_mode = #tpu.pipeline_mode<synchronous>, transform_indices = @transform_7, window_bounds = array<i64: 1, 32, 512>}, {pipeline_mode = #tpu.pipeline_mode<synchronous>, transform_indices = @transform_8, window_bounds = array<i64: 1, 32, 512>}, {pipeline_mode = #tpu.pipeline_mode<synchronous>, transform_indices = @transform_9, window_bounds = array<i64: 1, 512, 32>}, {transform_indices = @transform_10, window_bounds = array<i64: 1, 16, 32>}]} {
    %c0_i32 = arith.constant 0 : i32
    %0 = arith.cmpi eq, %arg1, %c0_i32 : i32
    %1 = arith.extui %0 : i1 to i32
    %c0_i32_0 = arith.constant 0 : i32
    %2 = arith.cmpi ne, %1, %c0_i32_0 : i32
    scf.if %2 {
      %c0_58 = arith.constant 0 : index
      %c0_59 = arith.constant 0 : index
      %c0_60 = arith.constant 0 : index
      %179 = vector.load %arg2[%c0_58, %c0_59, %c0_60] : memref<1x16x32xf32, #tpu.memory_space<vmem>>, vector<1x16x32xf32>
      %180 = vector.shape_cast %179 : vector<1x16x32xf32> to vector<16x32xf32>
      %c0_61 = arith.constant 0 : index
      %c0_62 = arith.constant 0 : index
      %181 = vector.load %arg4[%c0_61, %c0_62] : memref<1x32xf32, #tpu.memory_space<vmem>>, vector<1x32xf32>
      %c0_63 = arith.constant 0 : index
      %c0_64 = arith.constant 0 : index
      %182 = vector.load %arg5[%c0_63, %c0_64] : memref<1x32xf32, #tpu.memory_space<vmem>>, vector<1x32xf32>
      %cst_65 = arith.constant dense<0.000000e+00> : vector<16xf32>
      %183 = vector.multi_reduction <add>, %180, %cst_65 [1] : vector<16x32xf32> to vector<16xf32>
      %184 = vector.shape_cast %183 : vector<16xf32> to vector<16x1xf32>
      %cst_66 = arith.constant 3.200000e+01 : f32
      %185 = vector.broadcast %cst_66 : f32 to vector<16x1xf32>
      %186 = arith.divf %184, %185 : vector<16x1xf32>
      %187 = vector.broadcast %186 : vector<16x1xf32> to vector<16x32xf32>
      %188 = arith.subf %180, %187 : vector<16x32xf32>
      %189 = arith.mulf %188, %188 : vector<16x32xf32>
      %cst_67 = arith.constant dense<0.000000e+00> : vector<16xf32>
      %190 = vector.multi_reduction <add>, %189, %cst_67 [1] : vector<16x32xf32> to vector<16xf32>
      %191 = vector.shape_cast %190 : vector<16xf32> to vector<16x1xf32>
      %cst_68 = arith.constant 3.200000e+01 : f32
      %192 = vector.broadcast %cst_68 : f32 to vector<16x1xf32>
      %193 = arith.divf %191, %192 : vector<16x1xf32>
      %194 = vector.broadcast %186 : vector<16x1xf32> to vector<16x32xf32>
      %195 = arith.subf %180, %194 : vector<16x32xf32>
      %cst_69 = arith.constant 9.99999974E-6 : f32
      %196 = vector.broadcast %cst_69 : f32 to vector<16x1xf32>
      %197 = arith.addf %193, %196 : vector<16x1xf32>
      %198 = math.rsqrt %197 : vector<16x1xf32>
      %199 = vector.broadcast %198 : vector<16x1xf32> to vector<16x32xf32>
      %200 = arith.mulf %195, %199 : vector<16x32xf32>
      %201 = vector.broadcast %181 : vector<1x32xf32> to vector<16x32xf32>
      %202 = arith.mulf %200, %201 : vector<16x32xf32>
      %203 = vector.broadcast %182 : vector<1x32xf32> to vector<16x32xf32>
      %204 = arith.addf %202, %203 : vector<16x32xf32>
      %205 = arith.truncf %204 : vector<16x32xf32> to vector<16x32xbf16>
      %c0_70 = arith.constant 0 : index
      %c0_71 = arith.constant 0 : index
      %206 = vector.load %arg13[%c0_70, %c0_71] : memref<16x32xbf16, #tpu.memory_space<vmem>>, vector<16x32xbf16>
      tpu.vector_store %arg13[%c0_70, %c0_71], %205 {strides = array<i32>} : memref<16x32xbf16, #tpu.memory_space<vmem>>, vector<16x32xbf16>,
      %c0_72 = arith.constant 0 : index
      %c0_73 = arith.constant 0 : index
      %c0_74 = arith.constant 0 : index
      %207 = vector.load %arg3[%c0_72, %c0_73, %c0_74] : memref<1x16x32xf32, #tpu.memory_space<vmem>>, vector<1x16x32xf32>
      %208 = vector.shape_cast %207 : vector<1x16x32xf32> to vector<16x32xf32>
      %c0_75 = arith.constant 0 : index
      %c0_76 = arith.constant 0 : index
      %209 = vector.load %arg6[%c0_75, %c0_76] : memref<1x32xf32, #tpu.memory_space<vmem>>, vector<1x32xf32>
      %c0_77 = arith.constant 0 : index
      %c0_78 = arith.constant 0 : index
      %210 = vector.load %arg7[%c0_77, %c0_78] : memref<1x32xf32, #tpu.memory_space<vmem>>, vector<1x32xf32>
      %cst_79 = arith.constant dense<0.000000e+00> : vector<16xf32>
      %211 = vector.multi_reduction <add>, %208, %cst_79 [1] : vector<16x32xf32> to vector<16xf32>
      %212 = vector.shape_cast %211 : vector<16xf32> to vector<16x1xf32>
      %cst_80 = arith.constant 3.200000e+01 : f32
      %213 = vector.broadcast %cst_80 : f32 to vector<16x1xf32>
      %214 = arith.divf %212, %213 : vector<16x1xf32>
      %215 = vector.broadcast %214 : vector<16x1xf32> to vector<16x32xf32>
      %216 = arith.subf %208, %215 : vector<16x32xf32>
      %217 = arith.mulf %216, %216 : vector<16x32xf32>
      %cst_81 = arith.constant dense<0.000000e+00> : vector<16xf32>
      %218 = vector.multi_reduction <add>, %217, %cst_81 [1] : vector<16x32xf32> to vector<16xf32>
      %219 = vector.shape_cast %218 : vector<16xf32> to vector<16x1xf32>
      %cst_82 = arith.constant 3.200000e+01 : f32
      %220 = vector.broadcast %cst_82 : f32 to vector<16x1xf32>
      %221 = arith.divf %219, %220 : vector<16x1xf32>
      %222 = vector.broadcast %214 : vector<16x1xf32> to vector<16x32xf32>
      %223 = arith.subf %208, %222 : vector<16x32xf32>
      %cst_83 = arith.constant 9.99999974E-6 : f32
      %224 = vector.broadcast %cst_83 : f32 to vector<16x1xf32>
      %225 = arith.addf %221, %224 : vector<16x1xf32>
      %226 = math.rsqrt %225 : vector<16x1xf32>
      %227 = vector.broadcast %226 : vector<16x1xf32> to vector<16x32xf32>
      %228 = arith.mulf %223, %227 : vector<16x32xf32>
      %229 = vector.broadcast %209 : vector<1x32xf32> to vector<16x32xf32>
      %230 = arith.mulf %228, %229 : vector<16x32xf32>
      %231 = vector.broadcast %210 : vector<1x32xf32> to vector<16x32xf32>
      %232 = arith.addf %230, %231 : vector<16x32xf32>
      %233 = arith.truncf %232 : vector<16x32xf32> to vector<16x32xbf16>
      %c0_84 = arith.constant 0 : index
      %c0_85 = arith.constant 0 : index
      %234 = vector.load %arg14[%c0_84, %c0_85] : memref<16x32xbf16, #tpu.memory_space<vmem>>, vector<16x32xbf16>
      tpu.vector_store %arg14[%c0_84, %c0_85], %233 {strides = array<i32>} : memref<16x32xbf16, #tpu.memory_space<vmem>>, vector<16x32xbf16>,
      %c0_86 = arith.constant 0 : index
      %c0_87 = arith.constant 0 : index
      %c0_88 = arith.constant 0 : index
      %235 = vector.load %arg3[%c0_86, %c0_87, %c0_88] : memref<1x16x32xf32, #tpu.memory_space<vmem>>, vector<1x16x32xf32>
      %236 = vector.shape_cast %235 : vector<1x16x32xf32> to vector<16x32xf32>
      %c0_89 = arith.constant 0 : index
      %c0_90 = arith.constant 0 : index
      %237 = vector.load %arg15[%c0_89, %c0_90] : memref<16x32xf32, #tpu.memory_space<vmem>>, vector<16x32xf32>
      tpu.vector_store %arg15[%c0_89, %c0_90], %236 {strides = array<i32>} : memref<16x32xf32, #tpu.memory_space<vmem>>, vector<16x32xf32>,
    } else {
    }
    %c0 = arith.constant 0 : index
    %c0_1 = arith.constant 0 : index
    %3 = vector.load %arg13[%c0, %c0_1] : memref<16x32xbf16, #tpu.memory_space<vmem>>, vector<16x32xbf16>
    %c0_2 = arith.constant 0 : index
    %c0_3 = arith.constant 0 : index
    %4 = vector.load %arg14[%c0_2, %c0_3] : memref<16x32xbf16, #tpu.memory_space<vmem>>, vector<16x32xbf16>
    %5 = arith.index_cast %arg1 : i32 to index
    %c0_4 = arith.constant 0 : index
    %c0_5 = arith.constant 0 : index
    %6 = vector.load %arg8[%5, %c0_4, %c0_5] : memref<1x32x512xbf16, #tpu.memory_space<vmem>>, vector<1x32x512xbf16>
    %7 = vector.shape_cast %6 : vector<1x32x512xbf16> to vector<32x512xbf16>
    %8 = arith.index_cast %arg1 : i32 to index
    %c0_6 = arith.constant 0 : index
    %c0_7 = arith.constant 0 : index
    %9 = vector.load %arg9[%8, %c0_6, %c0_7] : memref<1x32x512xbf16, #tpu.memory_space<vmem>>, vector<1x32x512xbf16>
    %10 = vector.shape_cast %9 : vector<1x32x512xbf16> to vector<32x512xbf16>
    %11 = arith.index_cast %arg1 : i32 to index
    %c0_8 = arith.constant 0 : index
    %c0_9 = arith.constant 0 : index
    %12 = vector.load %arg10[%11, %c0_8, %c0_9] : memref<1x32x512xbf16, #tpu.memory_space<vmem>>, vector<1x32x512xbf16>
    %13 = vector.shape_cast %12 : vector<1x32x512xbf16> to vector<32x512xbf16>
    %14 = arith.index_cast %arg1 : i32 to index
    %c0_10 = arith.constant 0 : index
    %c0_11 = arith.constant 0 : index
    %15 = vector.load %arg11[%14, %c0_10, %c0_11] : memref<1x512x32xbf16, #tpu.memory_space<vmem>>, vector<1x512x32xbf16>
    %16 = vector.shape_cast %15 : vector<1x512x32xbf16> to vector<512x32xbf16>
    %cst = arith.constant dense<0.000000e+00> : vector<16x512xf32>
    %17 = tpu.matmul %4, %7, %cst {dimension_numbers = #tpu.dot_dimension_numbers<[1], [0], [0], [1], [0, 0, 1, 1], [], []>} : vector<16x32xbf16>, vector<32x512xbf16>, vector<16x512xf32> -> vector<16x512xf32>
    %cst_12 = arith.constant 0.353553385 : f32
    %18 = vector.broadcast %cst_12 : f32 to vector<16x512xf32>
    %19 = arith.mulf %17, %18 : vector<16x512xf32>
    %20 = arith.truncf %19 : vector<16x512xf32> to vector<16x512xbf16>
    %cst_13 = arith.constant dense<0.000000e+00> : vector<16x512xf32>
    %21 = tpu.matmul %3, %10, %cst_13 {dimension_numbers = #tpu.dot_dimension_numbers<[1], [0], [0], [1], [0, 0, 1, 1], [], []>} : vector<16x32xbf16>, vector<32x512xbf16>, vector<16x512xf32> -> vector<16x512xf32>
    %22 = arith.truncf %21 : vector<16x512xf32> to vector<16x512xbf16>
    %cst_14 = arith.constant dense<0.000000e+00> : vector<16x512xf32>
    %23 = tpu.matmul %4, %10, %cst_14 {dimension_numbers = #tpu.dot_dimension_numbers<[1], [0], [0], [1], [0, 0, 1, 1], [], []>} : vector<16x32xbf16>, vector<32x512xbf16>, vector<16x512xf32> -> vector<16x512xf32>
    %24 = arith.truncf %23 : vector<16x512xf32> to vector<16x512xbf16>
    %cst_15 = arith.constant dense<0.000000e+00> : vector<16x512xf32>
    %25 = tpu.matmul %3, %13, %cst_15 {dimension_numbers = #tpu.dot_dimension_numbers<[1], [0], [0], [1], [0, 0, 1, 1], [], []>} : vector<16x32xbf16>, vector<32x512xbf16>, vector<16x512xf32> -> vector<16x512xf32>
    %26 = arith.truncf %25 : vector<16x512xf32> to vector<16x512xbf16>
    %cst_16 = arith.constant dense<0.000000e+00> : vector<16x512xf32>
    %27 = tpu.matmul %4, %13, %cst_16 {dimension_numbers = #tpu.dot_dimension_numbers<[1], [0], [0], [1], [0, 0, 1, 1], [], []>} : vector<16x32xbf16>, vector<32x512xbf16>, vector<16x512xf32> -> vector<16x512xf32>
    %28 = arith.truncf %27 : vector<16x512xf32> to vector<16x512xbf16>
    %29 = tpu.iota {dimensions = array<i32: 1>} : vector<1x16xi32>
    %c9_i32 = arith.constant 9 : i32
    %30 = vector.broadcast %c9_i32 : i32 to vector<1x16xi32>
    %31 = arith.cmpi slt, %29, %30 : vector<1x16xi32>
    %cst_17 = arith.constant 0.000000e+00 : f32
    %cst_18 = arith.constant -1.000000e+30 : f32
    %32 = vector.broadcast %cst_17 : f32 to vector<1x16xf32>
    %33 = vector.broadcast %cst_18 : f32 to vector<1x16xf32>
    %34 = arith.select %31, %32, %33 : vector<1x16xi1>, vector<1x16xf32>
    %35 = vector.extract_strided_slice %20 {offsets = [0, 0], sizes = [16, 128], strides = [1, 1]} : vector<16x512xbf16> to vector<16x128xbf16>
    %36 = vector.extract_strided_slice %22 {offsets = [0, 0], sizes = [16, 128], strides = [1, 1]} : vector<16x512xbf16> to vector<16x128xbf16>
    %cst_19 = arith.constant dense<0.000000e+00> : vector<16x16xf32>
    %37 = tpu.matmul %35, %36, %cst_19 {dimension_numbers = #tpu.dot_dimension_numbers<[1], [1], [0], [0], [0, 0, 1, 0], [], []>} : vector<16x128xbf16>, vector<16x128xbf16>, vector<16x16xf32> -> vector<16x16xf32>
    %38 = vector.extract_strided_slice %24 {offsets = [0, 0], sizes = [16, 128], strides = [1, 1]} : vector<16x512xbf16> to vector<16x128xbf16>
    %cst_20 = arith.constant dense<0.000000e+00> : vector<16x16xf32>
    %39 = tpu.matmul %35, %38, %cst_20 {dimension_numbers = #tpu.dot_dimension_numbers<[1], [1], [0], [0], [0, 0, 1, 0], [], []>} : vector<16x128xbf16>, vector<16x128xbf16>, vector<16x16xf32> -> vector<16x16xf32>
    %40 = vector.broadcast %34 : vector<1x16xf32> to vector<16x16xf32>
    %41 = arith.addf %39, %40 : vector<16x16xf32>
    %cst_21 = arith.constant dense<0xFF800000> : vector<16xf32>
    %42 = vector.multi_reduction <maximumf>, %37, %cst_21 [1] : vector<16x16xf32> to vector<16xf32>
    %43 = vector.shape_cast %42 : vector<16xf32> to vector<16x1xf32>
    %cst_22 = arith.constant dense<0xFF800000> : vector<16xf32>
    %44 = vector.multi_reduction <maximumf>, %41, %cst_22 [1] : vector<16x16xf32> to vector<16xf32>
    %45 = vector.shape_cast %44 : vector<16xf32> to vector<16x1xf32>
    %46 = arith.maximumf %43, %45 : vector<16x1xf32>
    %47 = vector.broadcast %46 : vector<16x1xf32> to vector<16x16xf32>
    %48 = arith.subf %37, %47 : vector<16x16xf32>
    %49 = math.exp %48 : vector<16x16xf32>
    %50 = vector.broadcast %46 : vector<16x1xf32> to vector<16x16xf32>
    %51 = arith.subf %41, %50 : vector<16x16xf32>
    %52 = math.exp %51 : vector<16x16xf32>
    %cst_23 = arith.constant dense<0.000000e+00> : vector<16xf32>
    %53 = vector.multi_reduction <add>, %49, %cst_23 [1] : vector<16x16xf32> to vector<16xf32>
    %54 = vector.shape_cast %53 : vector<16xf32> to vector<16x1xf32>
    %cst_24 = arith.constant dense<0.000000e+00> : vector<16xf32>
    %55 = vector.multi_reduction <add>, %52, %cst_24 [1] : vector<16x16xf32> to vector<16xf32>
    %56 = vector.shape_cast %55 : vector<16xf32> to vector<16x1xf32>
    %57 = arith.addf %54, %56 : vector<16x1xf32>
    %58 = arith.truncf %49 : vector<16x16xf32> to vector<16x16xbf16>
    %59 = vector.extract_strided_slice %26 {offsets = [0, 0], sizes = [16, 128], strides = [1, 1]} : vector<16x512xbf16> to vector<16x128xbf16>
    %cst_25 = arith.constant dense<0.000000e+00> : vector<16x128xf32>
    %60 = tpu.matmul %58, %59, %cst_25 {dimension_numbers = #tpu.dot_dimension_numbers<[1], [0], [0], [1], [0, 0, 1, 1], [], []>} : vector<16x16xbf16>, vector<16x128xbf16>, vector<16x128xf32> -> vector<16x128xf32>
    %61 = arith.truncf %52 : vector<16x16xf32> to vector<16x16xbf16>
    %62 = vector.extract_strided_slice %28 {offsets = [0, 0], sizes = [16, 128], strides = [1, 1]} : vector<16x512xbf16> to vector<16x128xbf16>
    %cst_26 = arith.constant dense<0.000000e+00> : vector<16x128xf32>
    %63 = tpu.matmul %61, %62, %cst_26 {dimension_numbers = #tpu.dot_dimension_numbers<[1], [0], [0], [1], [0, 0, 1, 1], [], []>} : vector<16x16xbf16>, vector<16x128xbf16>, vector<16x128xf32> -> vector<16x128xf32>
    %64 = arith.addf %60, %63 : vector<16x128xf32>
    %65 = tpu.reciprocal %57 {approx = true} : vector<16x1xf32> -> vector<16x1xf32>
    %66 = vector.broadcast %65 : vector<16x1xf32> to vector<16x128xf32>
    %67 = arith.mulf %64, %66 : vector<16x128xf32>
    %68 = arith.truncf %67 : vector<16x128xf32> to vector<16x128xbf16>
    %69 = vector.extract_strided_slice %20 {offsets = [0, 128], sizes = [16, 128], strides = [1, 1]} : vector<16x512xbf16> to vector<16x128xbf16>
    %70 = vector.extract_strided_slice %22 {offsets = [0, 128], sizes = [16, 128], strides = [1, 1]} : vector<16x512xbf16> to vector<16x128xbf16>
    %cst_27 = arith.constant dense<0.000000e+00> : vector<16x16xf32>
    %71 = tpu.matmul %69, %70, %cst_27 {dimension_numbers = #tpu.dot_dimension_numbers<[1], [1], [0], [0], [0, 0, 1, 0], [], []>} : vector<16x128xbf16>, vector<16x128xbf16>, vector<16x16xf32> -> vector<16x16xf32>
    %72 = vector.extract_strided_slice %24 {offsets = [0, 128], sizes = [16, 128], strides = [1, 1]} : vector<16x512xbf16> to vector<16x128xbf16>
    %cst_28 = arith.constant dense<0.000000e+00> : vector<16x16xf32>
    %73 = tpu.matmul %69, %72, %cst_28 {dimension_numbers = #tpu.dot_dimension_numbers<[1], [1], [0], [0], [0, 0, 1, 0], [], []>} : vector<16x128xbf16>, vector<16x128xbf16>, vector<16x16xf32> -> vector<16x16xf32>
    %74 = vector.broadcast %34 : vector<1x16xf32> to vector<16x16xf32>
    %75 = arith.addf %73, %74 : vector<16x16xf32>
    %cst_29 = arith.constant dense<0xFF800000> : vector<16xf32>
    %76 = vector.multi_reduction <maximumf>, %71, %cst_29 [1] : vector<16x16xf32> to vector<16xf32>
    %77 = vector.shape_cast %76 : vector<16xf32> to vector<16x1xf32>
    %cst_30 = arith.constant dense<0xFF800000> : vector<16xf32>
    %78 = vector.multi_reduction <maximumf>, %75, %cst_30 [1] : vector<16x16xf32> to vector<16xf32>
    %79 = vector.shape_cast %78 : vector<16xf32> to vector<16x1xf32>
    %80 = arith.maximumf %77, %79 : vector<16x1xf32>
    %81 = vector.broadcast %80 : vector<16x1xf32> to vector<16x16xf32>
    %82 = arith.subf %71, %81 : vector<16x16xf32>
    %83 = math.exp %82 : vector<16x16xf32>
    %84 = vector.broadcast %80 : vector<16x1xf32> to vector<16x16xf32>
    %85 = arith.subf %75, %84 : vector<16x16xf32>
    %86 = math.exp %85 : vector<16x16xf32>
    %cst_31 = arith.constant dense<0.000000e+00> : vector<16xf32>
    %87 = vector.multi_reduction <add>, %83, %cst_31 [1] : vector<16x16xf32> to vector<16xf32>
    %88 = vector.shape_cast %87 : vector<16xf32> to vector<16x1xf32>
    %cst_32 = arith.constant dense<0.000000e+00> : vector<16xf32>
    %89 = vector.multi_reduction <add>, %86, %cst_32 [1] : vector<16x16xf32> to vector<16xf32>
    %90 = vector.shape_cast %89 : vector<16xf32> to vector<16x1xf32>
    %91 = arith.addf %88, %90 : vector<16x1xf32>
    %92 = arith.truncf %83 : vector<16x16xf32> to vector<16x16xbf16>
    %93 = vector.extract_strided_slice %26 {offsets = [0, 128], sizes = [16, 128], strides = [1, 1]} : vector<16x512xbf16> to vector<16x128xbf16>
    %cst_33 = arith.constant dense<0.000000e+00> : vector<16x128xf32>
    %94 = tpu.matmul %92, %93, %cst_33 {dimension_numbers = #tpu.dot_dimension_numbers<[1], [0], [0], [1], [0, 0, 1, 1], [], []>} : vector<16x16xbf16>, vector<16x128xbf16>, vector<16x128xf32> -> vector<16x128xf32>
    %95 = arith.truncf %86 : vector<16x16xf32> to vector<16x16xbf16>
    %96 = vector.extract_strided_slice %28 {offsets = [0, 128], sizes = [16, 128], strides = [1, 1]} : vector<16x512xbf16> to vector<16x128xbf16>
    %cst_34 = arith.constant dense<0.000000e+00> : vector<16x128xf32>
    %97 = tpu.matmul %95, %96, %cst_34 {dimension_numbers = #tpu.dot_dimension_numbers<[1], [0], [0], [1], [0, 0, 1, 1], [], []>} : vector<16x16xbf16>, vector<16x128xbf16>, vector<16x128xf32> -> vector<16x128xf32>
    %98 = arith.addf %94, %97 : vector<16x128xf32>
    %99 = tpu.reciprocal %91 {approx = true} : vector<16x1xf32> -> vector<16x1xf32>
    %100 = vector.broadcast %99 : vector<16x1xf32> to vector<16x128xf32>
    %101 = arith.mulf %98, %100 : vector<16x128xf32>
    %102 = arith.truncf %101 : vector<16x128xf32> to vector<16x128xbf16>
    %103 = vector.extract_strided_slice %20 {offsets = [0, 256], sizes = [16, 128], strides = [1, 1]} : vector<16x512xbf16> to vector<16x128xbf16>
    %104 = vector.extract_strided_slice %22 {offsets = [0, 256], sizes = [16, 128], strides = [1, 1]} : vector<16x512xbf16> to vector<16x128xbf16>
    %cst_35 = arith.constant dense<0.000000e+00> : vector<16x16xf32>
    %105 = tpu.matmul %103, %104, %cst_35 {dimension_numbers = #tpu.dot_dimension_numbers<[1], [1], [0], [0], [0, 0, 1, 0], [], []>} : vector<16x128xbf16>, vector<16x128xbf16>, vector<16x16xf32> -> vector<16x16xf32>
    %106 = vector.extract_strided_slice %24 {offsets = [0, 256], sizes = [16, 128], strides = [1, 1]} : vector<16x512xbf16> to vector<16x128xbf16>
    %cst_36 = arith.constant dense<0.000000e+00> : vector<16x16xf32>
    %107 = tpu.matmul %103, %106, %cst_36 {dimension_numbers = #tpu.dot_dimension_numbers<[1], [1], [0], [0], [0, 0, 1, 0], [], []>} : vector<16x128xbf16>, vector<16x128xbf16>, vector<16x16xf32> -> vector<16x16xf32>
    %108 = vector.broadcast %34 : vector<1x16xf32> to vector<16x16xf32>
    %109 = arith.addf %107, %108 : vector<16x16xf32>
    %cst_37 = arith.constant dense<0xFF800000> : vector<16xf32>
    %110 = vector.multi_reduction <maximumf>, %105, %cst_37 [1] : vector<16x16xf32> to vector<16xf32>
    %111 = vector.shape_cast %110 : vector<16xf32> to vector<16x1xf32>
    %cst_38 = arith.constant dense<0xFF800000> : vector<16xf32>
    %112 = vector.multi_reduction <maximumf>, %109, %cst_38 [1] : vector<16x16xf32> to vector<16xf32>
    %113 = vector.shape_cast %112 : vector<16xf32> to vector<16x1xf32>
    %114 = arith.maximumf %111, %113 : vector<16x1xf32>
    %115 = vector.broadcast %114 : vector<16x1xf32> to vector<16x16xf32>
    %116 = arith.subf %105, %115 : vector<16x16xf32>
    %117 = math.exp %116 : vector<16x16xf32>
    %118 = vector.broadcast %114 : vector<16x1xf32> to vector<16x16xf32>
    %119 = arith.subf %109, %118 : vector<16x16xf32>
    %120 = math.exp %119 : vector<16x16xf32>
    %cst_39 = arith.constant dense<0.000000e+00> : vector<16xf32>
    %121 = vector.multi_reduction <add>, %117, %cst_39 [1] : vector<16x16xf32> to vector<16xf32>
    %122 = vector.shape_cast %121 : vector<16xf32> to vector<16x1xf32>
    %cst_40 = arith.constant dense<0.000000e+00> : vector<16xf32>
    %123 = vector.multi_reduction <add>, %120, %cst_40 [1] : vector<16x16xf32> to vector<16xf32>
    %124 = vector.shape_cast %123 : vector<16xf32> to vector<16x1xf32>
    %125 = arith.addf %122, %124 : vector<16x1xf32>
    %126 = arith.truncf %117 : vector<16x16xf32> to vector<16x16xbf16>
    %127 = vector.extract_strided_slice %26 {offsets = [0, 256], sizes = [16, 128], strides = [1, 1]} : vector<16x512xbf16> to vector<16x128xbf16>
    %cst_41 = arith.constant dense<0.000000e+00> : vector<16x128xf32>
    %128 = tpu.matmul %126, %127, %cst_41 {dimension_numbers = #tpu.dot_dimension_numbers<[1], [0], [0], [1], [0, 0, 1, 1], [], []>} : vector<16x16xbf16>, vector<16x128xbf16>, vector<16x128xf32> -> vector<16x128xf32>
    %129 = arith.truncf %120 : vector<16x16xf32> to vector<16x16xbf16>
    %130 = vector.extract_strided_slice %28 {offsets = [0, 256], sizes = [16, 128], strides = [1, 1]} : vector<16x512xbf16> to vector<16x128xbf16>
    %cst_42 = arith.constant dense<0.000000e+00> : vector<16x128xf32>
    %131 = tpu.matmul %129, %130, %cst_42 {dimension_numbers = #tpu.dot_dimension_numbers<[1], [0], [0], [1], [0, 0, 1, 1], [], []>} : vector<16x16xbf16>, vector<16x128xbf16>, vector<16x128xf32> -> vector<16x128xf32>
    %132 = arith.addf %128, %131 : vector<16x128xf32>
    %133 = tpu.reciprocal %125 {approx = true} : vector<16x1xf32> -> vector<16x1xf32>
    %134 = vector.broadcast %133 : vector<16x1xf32> to vector<16x128xf32>
    %135 = arith.mulf %132, %134 : vector<16x128xf32>
    %136 = arith.truncf %135 : vector<16x128xf32> to vector<16x128xbf16>
    %137 = vector.extract_strided_slice %20 {offsets = [0, 384], sizes = [16, 128], strides = [1, 1]} : vector<16x512xbf16> to vector<16x128xbf16>
    %138 = vector.extract_strided_slice %22 {offsets = [0, 384], sizes = [16, 128], strides = [1, 1]} : vector<16x512xbf16> to vector<16x128xbf16>
    %cst_43 = arith.constant dense<0.000000e+00> : vector<16x16xf32>
    %139 = tpu.matmul %137, %138, %cst_43 {dimension_numbers = #tpu.dot_dimension_numbers<[1], [1], [0], [0], [0, 0, 1, 0], [], []>} : vector<16x128xbf16>, vector<16x128xbf16>, vector<16x16xf32> -> vector<16x16xf32>
    %140 = vector.extract_strided_slice %24 {offsets = [0, 384], sizes = [16, 128], strides = [1, 1]} : vector<16x512xbf16> to vector<16x128xbf16>
    %cst_44 = arith.constant dense<0.000000e+00> : vector<16x16xf32>
    %141 = tpu.matmul %137, %140, %cst_44 {dimension_numbers = #tpu.dot_dimension_numbers<[1], [1], [0], [0], [0, 0, 1, 0], [], []>} : vector<16x128xbf16>, vector<16x128xbf16>, vector<16x16xf32> -> vector<16x16xf32>
    %142 = vector.broadcast %34 : vector<1x16xf32> to vector<16x16xf32>
    %143 = arith.addf %141, %142 : vector<16x16xf32>
    %cst_45 = arith.constant dense<0xFF800000> : vector<16xf32>
    %144 = vector.multi_reduction <maximumf>, %139, %cst_45 [1] : vector<16x16xf32> to vector<16xf32>
    %145 = vector.shape_cast %144 : vector<16xf32> to vector<16x1xf32>
    %cst_46 = arith.constant dense<0xFF800000> : vector<16xf32>
    %146 = vector.multi_reduction <maximumf>, %143, %cst_46 [1] : vector<16x16xf32> to vector<16xf32>
    %147 = vector.shape_cast %146 : vector<16xf32> to vector<16x1xf32>
    %148 = arith.maximumf %145, %147 : vector<16x1xf32>
    %149 = vector.broadcast %148 : vector<16x1xf32> to vector<16x16xf32>
    %150 = arith.subf %139, %149 : vector<16x16xf32>
    %151 = math.exp %150 : vector<16x16xf32>
    %152 = vector.broadcast %148 : vector<16x1xf32> to vector<16x16xf32>
    %153 = arith.subf %143, %152 : vector<16x16xf32>
    %154 = math.exp %153 : vector<16x16xf32>
    %cst_47 = arith.constant dense<0.000000e+00> : vector<16xf32>
    %155 = vector.multi_reduction <add>, %151, %cst_47 [1] : vector<16x16xf32> to vector<16xf32>
    %156 = vector.shape_cast %155 : vector<16xf32> to vector<16x1xf32>
    %cst_48 = arith.constant dense<0.000000e+00> : vector<16xf32>
    %157 = vector.multi_reduction <add>, %154, %cst_48 [1] : vector<16x16xf32> to vector<16xf32>
    %158 = vector.shape_cast %157 : vector<16xf32> to vector<16x1xf32>
    %159 = arith.addf %156, %158 : vector<16x1xf32>
    %160 = arith.truncf %151 : vector<16x16xf32> to vector<16x16xbf16>
    %161 = vector.extract_strided_slice %26 {offsets = [0, 384], sizes = [16, 128], strides = [1, 1]} : vector<16x512xbf16> to vector<16x128xbf16>
    %cst_49 = arith.constant dense<0.000000e+00> : vector<16x128xf32>
    %162 = tpu.matmul %160, %161, %cst_49 {dimension_numbers = #tpu.dot_dimension_numbers<[1], [0], [0], [1], [0, 0, 1, 1], [], []>} : vector<16x16xbf16>, vector<16x128xbf16>, vector<16x128xf32> -> vector<16x128xf32>
    %163 = arith.truncf %154 : vector<16x16xf32> to vector<16x16xbf16>
    %164 = vector.extract_strided_slice %28 {offsets = [0, 384], sizes = [16, 128], strides = [1, 1]} : vector<16x512xbf16> to vector<16x128xbf16>
    %cst_50 = arith.constant dense<0.000000e+00> : vector<16x128xf32>
    %165 = tpu.matmul %163, %164, %cst_50 {dimension_numbers = #tpu.dot_dimension_numbers<[1], [0], [0], [1], [0, 0, 1, 1], [], []>} : vector<16x16xbf16>, vector<16x128xbf16>, vector<16x128xf32> -> vector<16x128xf32>
    %166 = arith.addf %162, %165 : vector<16x128xf32>
    %167 = tpu.reciprocal %159 {approx = true} : vector<16x1xf32> -> vector<16x1xf32>
    %168 = vector.broadcast %167 : vector<16x1xf32> to vector<16x128xf32>
    %169 = arith.mulf %166, %168 : vector<16x128xf32>
    %170 = arith.truncf %169 : vector<16x128xf32> to vector<16x128xbf16>
    %171 = tpu.concatenate %68, %102, %136, %170 in 1 : vector<16x128xbf16>, vector<16x128xbf16>, vector<16x128xbf16>, vector<16x128xbf16> -> vector<16x512xbf16>
    %c0_51 = arith.constant 0 : index
    %c0_52 = arith.constant 0 : index
    %172 = vector.load %arg15[%c0_51, %c0_52] : memref<16x32xf32, #tpu.memory_space<vmem>>, vector<16x32xf32>
    %cst_53 = arith.constant dense<0.000000e+00> : vector<16x32xf32>
    %173 = tpu.matmul %171, %16, %cst_53 {dimension_numbers = #tpu.dot_dimension_numbers<[1], [0], [0], [1], [0, 0, 1, 1], [], []>} : vector<16x512xbf16>, vector<512x32xbf16>, vector<16x32xf32> -> vector<16x32xf32>
    %174 = arith.addf %172, %173 : vector<16x32xf32>
    %c0_54 = arith.constant 0 : index
    %c0_55 = arith.constant 0 : index
    %175 = vector.load %arg15[%c0_54, %c0_55] : memref<16x32xf32, #tpu.memory_space<vmem>>, vector<16x32xf32>
    tpu.vector_store %arg15[%c0_54, %c0_55], %174 {strides = array<i32>} : memref<16x32xf32, #tpu.memory_space<vmem>>, vector<16x32xf32>,
    %c0_i32_56 = arith.constant 0 : i32
    %176 = arith.cmpi eq, %arg1, %c0_i32_56 : i32
    %177 = arith.extui %176 : i1 to i32
    %c0_i32_57 = arith.constant 0 : i32
    %178 = arith.cmpi ne, %177, %c0_i32_57 : i32
    scf.if %178 {
      %c0_58 = arith.constant 0 : index
      %c0_59 = arith.constant 0 : index
      %179 = vector.load %arg15[%c0_58, %c0_59] : memref<16x32xf32, #tpu.memory_space<vmem>>, vector<16x32xf32>
      %c0_60 = arith.constant 0 : index
      %c0_61 = arith.constant 0 : index
      %c0_62 = arith.constant 0 : index
      %180 = vector.load %arg12[%c0_60, %c0_61, %c0_62] : memref<1x16x32xf32, #tpu.memory_space<vmem>>, vector<1x16x32xf32>
      %181 = vector.shape_cast %180 : vector<1x16x32xf32> to vector<16x32xf32>
      %182 = vector.shape_cast %179 : vector<16x32xf32> to vector<1x16x32xf32>
      tpu.vector_store %arg12[%c0_60, %c0_61, %c0_62], %182 {strides = array<i32>} : memref<1x16x32xf32, #tpu.memory_space<vmem>>, vector<1x16x32xf32>,
    } else {
    }
    return
  }
  func.func @transform_0(%arg0: i32, %arg1: i32) -> (i32, i32, i32) {
    %c0_i32 = arith.constant 0 : i32
    %c0_i32_0 = arith.constant 0 : i32
    %c0_i32_1 = arith.constant 0 : i32
    return %arg0, %c0_i32, %c0_i32_0 : i32, i32, i32
  }
  func.func @transform_1(%arg0: i32, %arg1: i32) -> (i32, i32, i32) {
    %c0_i32 = arith.constant 0 : i32
    %c0_i32_0 = arith.constant 0 : i32
    %c0_i32_1 = arith.constant 0 : i32
    %c0_i32_2 = arith.constant 0 : i32
    return %c0_i32, %c0_i32_0, %c0_i32_1 : i32, i32, i32
  }
  func.func @transform_2(%arg0: i32, %arg1: i32) -> (i32, i32) {
    %c0_i32 = arith.constant 0 : i32
    %c0_i32_0 = arith.constant 0 : i32
    %c0_i32_1 = arith.constant 0 : i32
    return %c0_i32, %c0_i32_0 : i32, i32
  }
  func.func @transform_3(%arg0: i32, %arg1: i32) -> (i32, i32) {
    %c0_i32 = arith.constant 0 : i32
    %c0_i32_0 = arith.constant 0 : i32
    %c0_i32_1 = arith.constant 0 : i32
    return %c0_i32, %c0_i32_0 : i32, i32
  }
  func.func @transform_4(%arg0: i32, %arg1: i32) -> (i32, i32) {
    %c0_i32 = arith.constant 0 : i32
    %c0_i32_0 = arith.constant 0 : i32
    %c0_i32_1 = arith.constant 0 : i32
    return %c0_i32, %c0_i32_0 : i32, i32
  }
  func.func @transform_5(%arg0: i32, %arg1: i32) -> (i32, i32) {
    %c0_i32 = arith.constant 0 : i32
    %c0_i32_0 = arith.constant 0 : i32
    %c0_i32_1 = arith.constant 0 : i32
    return %c0_i32, %c0_i32_0 : i32, i32
  }
  func.func @transform_6(%arg0: i32, %arg1: i32) -> (i32, i32, i32) {
    %c0_i32 = arith.constant 0 : i32
    %c0_i32_0 = arith.constant 0 : i32
    %c0_i32_1 = arith.constant 0 : i32
    %c0_i32_2 = arith.constant 0 : i32
    return %c0_i32, %c0_i32_0, %c0_i32_1 : i32, i32, i32
  }
  func.func @transform_7(%arg0: i32, %arg1: i32) -> (i32, i32, i32) {
    %c0_i32 = arith.constant 0 : i32
    %c0_i32_0 = arith.constant 0 : i32
    %c0_i32_1 = arith.constant 0 : i32
    %c0_i32_2 = arith.constant 0 : i32
    return %c0_i32, %c0_i32_0, %c0_i32_1 : i32, i32, i32
  }
  func.func @transform_8(%arg0: i32, %arg1: i32) -> (i32, i32, i32) {
    %c0_i32 = arith.constant 0 : i32
    %c0_i32_0 = arith.constant 0 : i32
    %c0_i32_1 = arith.constant 0 : i32
    %c0_i32_2 = arith.constant 0 : i32
    return %c0_i32, %c0_i32_0, %c0_i32_1 : i32, i32, i32
  }
  func.func @transform_9(%arg0: i32, %arg1: i32) -> (i32, i32, i32) {
    %c0_i32 = arith.constant 0 : i32
    %c0_i32_0 = arith.constant 0 : i32
    %c0_i32_1 = arith.constant 0 : i32
    %c0_i32_2 = arith.constant 0 : i32
    return %c0_i32, %c0_i32_0, %c0_i32_1 : i32, i32, i32
  }
  func.func @transform_10(%arg0: i32, %arg1: i32) -> (i32, i32, i32) {
    %c0_i32 = arith.constant 0 : i32
    %c0_i32_0 = arith.constant 0 : i32
    %c0_i32_1 = arith.constant 0 : i32
    return %arg0, %c0_i32, %c0_i32_0 : i32, i32, i32
  }
}

module attributes {stable_mosaic.version = 11 : i64} {
  func.func @_perceiver_attn_kernel(%arg0: i32, %arg1: i32, %arg2: memref<1x16x32xf32, #tpu.memory_space<vmem>>, %arg3: memref<1x16x32xf32, #tpu.memory_space<vmem>>, %arg4: memref<1x32xf32, #tpu.memory_space<vmem>>, %arg5: memref<1x32xf32, #tpu.memory_space<vmem>>, %arg6: memref<1x32xf32, #tpu.memory_space<vmem>>, %arg7: memref<1x32xf32, #tpu.memory_space<vmem>>, %arg8: memref<1x32x512xbf16, #tpu.memory_space<vmem>>, %arg9: memref<1x32x512xbf16, #tpu.memory_space<vmem>>, %arg10: memref<1x32x512xbf16, #tpu.memory_space<vmem>>, %arg11: memref<1x512x32xbf16, #tpu.memory_space<vmem>>, %arg12: memref<1x16x32xf32, #tpu.memory_space<vmem>>, %arg13: memref<16x32xbf16, #tpu.memory_space<vmem>>, %arg14: memref<16x32xbf16, #tpu.memory_space<vmem>>, %arg15: memref<16x32xf32, #tpu.memory_space<vmem>>) attributes {dimension_semantics = [#tpu.dimension_semantics<parallel>, #tpu.dimension_semantics<arbitrary>], iteration_bounds = array<i64: 2, 1>, scalar_prefetch = 0 : i64, scratch_operands = 3 : i64, tpu.core_type = #tpu.core_type<tc>, window_params = [{transform_indices = @transform_0, window_bounds = array<i64: 1, 16, 32>}, {transform_indices = @transform_1, window_bounds = array<i64: 1, 16, 32>}, {pipeline_mode = #tpu.pipeline_mode<synchronous>, transform_indices = @transform_2, window_bounds = array<i64: 1, 32>}, {pipeline_mode = #tpu.pipeline_mode<synchronous>, transform_indices = @transform_3, window_bounds = array<i64: 1, 32>}, {pipeline_mode = #tpu.pipeline_mode<synchronous>, transform_indices = @transform_4, window_bounds = array<i64: 1, 32>}, {pipeline_mode = #tpu.pipeline_mode<synchronous>, transform_indices = @transform_5, window_bounds = array<i64: 1, 32>}, {pipeline_mode = #tpu.pipeline_mode<synchronous>, transform_indices = @transform_6, window_bounds = array<i64: 1, 32, 512>}, {pipeline_mode = #tpu.pipeline_mode<synchronous>, transform_indices = @transform_7, window_bounds = array<i64: 1, 32, 512>}, {pipeline_mode = #tpu.pipeline_mode<synchronous>, transform_indices = @transform_8, window_bounds = array<i64: 1, 32, 512>}, {pipeline_mode = #tpu.pipeline_mode<synchronous>, transform_indices = @transform_9, window_bounds = array<i64: 1, 512, 32>}, {transform_indices = @transform_10, window_bounds = array<i64: 1, 16, 32>}]} {
    %c0_i32 = arith.constant 0 : i32
    %0 = arith.cmpi eq, %arg1, %c0_i32 : i32
    %1 = arith.extui %0 : i1 to i32
    %c0_i32_0 = arith.constant 0 : i32
    %2 = arith.cmpi ne, %1, %c0_i32_0 : i32
    scf.if %2 {
      %c0_58 = arith.constant 0 : index
      %c0_59 = arith.constant 0 : index
      %c0_60 = arith.constant 0 : index
      %179 = vector.load %arg2[%c0_58, %c0_59, %c0_60] : memref<1x16x32xf32, #tpu.memory_space<vmem>>, vector<1x16x32xf32>
      %180 = vector.shape_cast %179 : vector<1x16x32xf32> to vector<16x32xf32>
      %c0_61 = arith.constant 0 : index
      %c0_62 = arith.constant 0 : index
      %181 = vector.load %arg4[%c0_61, %c0_62] : memref<1x32xf32, #tpu.memory_space<vmem>>, vector<1x32xf32>
      %c0_63 = arith.constant 0 : index
      %c0_64 = arith.constant 0 : index
      %182 = vector.load %arg5[%c0_63, %c0_64] : memref<1x32xf32, #tpu.memory_space<vmem>>, vector<1x32xf32>
      %cst_65 = arith.constant dense<0.000000e+00> : vector<16xf32>
      %183 = vector.multi_reduction <add>, %180, %cst_65 [1] : vector<16x32xf32> to vector<16xf32>
      %184 = vector.shape_cast %183 : vector<16xf32> to vector<16x1xf32>
      %cst_66 = arith.constant 3.200000e+01 : f32
      %185 = vector.broadcast %cst_66 : f32 to vector<16x1xf32>
      %186 = arith.divf %184, %185 : vector<16x1xf32>
      %187 = vector.broadcast %186 : vector<16x1xf32> to vector<16x32xf32>
      %188 = arith.subf %180, %187 : vector<16x32xf32>
      %189 = arith.mulf %188, %188 : vector<16x32xf32>
      %cst_67 = arith.constant dense<0.000000e+00> : vector<16xf32>
      %190 = vector.multi_reduction <add>, %189, %cst_67 [1] : vector<16x32xf32> to vector<16xf32>
      %191 = vector.shape_cast %190 : vector<16xf32> to vector<16x1xf32>
      %cst_68 = arith.constant 3.200000e+01 : f32
      %192 = vector.broadcast %cst_68 : f32 to vector<16x1xf32>
      %193 = arith.divf %191, %192 : vector<16x1xf32>
      %194 = vector.broadcast %186 : vector<16x1xf32> to vector<16x32xf32>
      %195 = arith.subf %180, %194 : vector<16x32xf32>
      %cst_69 = arith.constant 9.99999974E-6 : f32
      %196 = vector.broadcast %cst_69 : f32 to vector<16x1xf32>
      %197 = arith.addf %193, %196 : vector<16x1xf32>
      %198 = math.rsqrt %197 : vector<16x1xf32>
      %199 = vector.broadcast %198 : vector<16x1xf32> to vector<16x32xf32>
      %200 = arith.mulf %195, %199 : vector<16x32xf32>
      %201 = vector.broadcast %181 : vector<1x32xf32> to vector<16x32xf32>
      %202 = arith.mulf %200, %201 : vector<16x32xf32>
      %203 = vector.broadcast %182 : vector<1x32xf32> to vector<16x32xf32>
      %204 = arith.addf %202, %203 : vector<16x32xf32>
      %205 = arith.truncf %204 : vector<16x32xf32> to vector<16x32xbf16>
      %c0_70 = arith.constant 0 : index
      %c0_71 = arith.constant 0 : index
      %206 = vector.load %arg13[%c0_70, %c0_71] : memref<16x32xbf16, #tpu.memory_space<vmem>>, vector<16x32xbf16>
      tpu.vector_store %arg13[%c0_70, %c0_71], %205 {strides = array<i32>} : memref<16x32xbf16, #tpu.memory_space<vmem>>, vector<16x32xbf16>,
      %c0_72 = arith.constant 0 : index
      %c0_73 = arith.constant 0 : index
      %c0_74 = arith.constant 0 : index
      %207 = vector.load %arg3[%c0_72, %c0_73, %c0_74] : memref<1x16x32xf32, #tpu.memory_space<vmem>>, vector<1x16x32xf32>
      %208 = vector.shape_cast %207 : vector<1x16x32xf32> to vector<16x32xf32>
      %c0_75 = arith.constant 0 : index
      %c0_76 = arith.constant 0 : index
      %209 = vector.load %arg6[%c0_75, %c0_76] : memref<1x32xf32, #tpu.memory_space<vmem>>, vector<1x32xf32>
      %c0_77 = arith.constant 0 : index
      %c0_78 = arith.constant 0 : index
      %210 = vector.load %arg7[%c0_77, %c0_78] : memref<1x32xf32, #tpu.memory_space<vmem>>, vector<1x32xf32>
      %cst_79 = arith.constant dense<0.000000e+00> : vector<16xf32>
      %211 = vector.multi_reduction <add>, %208, %cst_79 [1] : vector<16x32xf32> to vector<16xf32>
      %212 = vector.shape_cast %211 : vector<16xf32> to vector<16x1xf32>
      %cst_80 = arith.constant 3.200000e+01 : f32
      %213 = vector.broadcast %cst_80 : f32 to vector<16x1xf32>
      %214 = arith.divf %212, %213 : vector<16x1xf32>
      %215 = vector.broadcast %214 : vector<16x1xf32> to vector<16x32xf32>
      %216 = arith.subf %208, %215 : vector<16x32xf32>
      %217 = arith.mulf %216, %216 : vector<16x32xf32>
      %cst_81 = arith.constant dense<0.000000e+00> : vector<16xf32>
      %218 = vector.multi_reduction <add>, %217, %cst_81 [1] : vector<16x32xf32> to vector<16xf32>
      %219 = vector.shape_cast %218 : vector<16xf32> to vector<16x1xf32>
      %cst_82 = arith.constant 3.200000e+01 : f32
      %220 = vector.broadcast %cst_82 : f32 to vector<16x1xf32>
      %221 = arith.divf %219, %220 : vector<16x1xf32>
      %222 = vector.broadcast %214 : vector<16x1xf32> to vector<16x32xf32>
      %223 = arith.subf %208, %222 : vector<16x32xf32>
      %cst_83 = arith.constant 9.99999974E-6 : f32
      %224 = vector.broadcast %cst_83 : f32 to vector<16x1xf32>
      %225 = arith.addf %221, %224 : vector<16x1xf32>
      %226 = math.rsqrt %225 : vector<16x1xf32>
      %227 = vector.broadcast %226 : vector<16x1xf32> to vector<16x32xf32>
      %228 = arith.mulf %223, %227 : vector<16x32xf32>
      %229 = vector.broadcast %209 : vector<1x32xf32> to vector<16x32xf32>
      %230 = arith.mulf %228, %229 : vector<16x32xf32>
      %231 = vector.broadcast %210 : vector<1x32xf32> to vector<16x32xf32>
      %232 = arith.addf %230, %231 : vector<16x32xf32>
      %233 = arith.truncf %232 : vector<16x32xf32> to vector<16x32xbf16>
      %c0_84 = arith.constant 0 : index
      %c0_85 = arith.constant 0 : index
      %234 = vector.load %arg14[%c0_84, %c0_85] : memref<16x32xbf16, #tpu.memory_space<vmem>>, vector<16x32xbf16>
      tpu.vector_store %arg14[%c0_84, %c0_85], %233 {strides = array<i32>} : memref<16x32xbf16, #tpu.memory_space<vmem>>, vector<16x32xbf16>,
      %c0_86 = arith.constant 0 : index
      %c0_87 = arith.constant 0 : index
      %c0_88 = arith.constant 0 : index
      %235 = vector.load %arg3[%c0_86, %c0_87, %c0_88] : memref<1x16x32xf32, #tpu.memory_space<vmem>>, vector<1x16x32xf32>
      %236 = vector.shape_cast %235 : vector<1x16x32xf32> to vector<16x32xf32>
      %c0_89 = arith.constant 0 : index
      %c0_90 = arith.constant 0 : index
      %237 = vector.load %arg15[%c0_89, %c0_90] : memref<16x32xf32, #tpu.memory_space<vmem>>, vector<16x32xf32>
      tpu.vector_store %arg15[%c0_89, %c0_90], %236 {strides = array<i32>} : memref<16x32xf32, #tpu.memory_space<vmem>>, vector<16x32xf32>,
    } else {
    }
    %c0 = arith.constant 0 : index
    %c0_1 = arith.constant 0 : index
    %3 = vector.load %arg13[%c0, %c0_1] : memref<16x32xbf16, #tpu.memory_space<vmem>>, vector<16x32xbf16>
    %c0_2 = arith.constant 0 : index
    %c0_3 = arith.constant 0 : index
    %4 = vector.load %arg14[%c0_2, %c0_3] : memref<16x32xbf16, #tpu.memory_space<vmem>>, vector<16x32xbf16>
    %5 = arith.index_cast %arg1 : i32 to index
    %c0_4 = arith.constant 0 : index
    %c0_5 = arith.constant 0 : index
    %6 = vector.load %arg8[%5, %c0_4, %c0_5] : memref<1x32x512xbf16, #tpu.memory_space<vmem>>, vector<1x32x512xbf16>
    %7 = vector.shape_cast %6 : vector<1x32x512xbf16> to vector<32x512xbf16>
    %8 = arith.index_cast %arg1 : i32 to index
    %c0_6 = arith.constant 0 : index
    %c0_7 = arith.constant 0 : index
    %9 = vector.load %arg9[%8, %c0_6, %c0_7] : memref<1x32x512xbf16, #tpu.memory_space<vmem>>, vector<1x32x512xbf16>
    %10 = vector.shape_cast %9 : vector<1x32x512xbf16> to vector<32x512xbf16>
    %11 = arith.index_cast %arg1 : i32 to index
    %c0_8 = arith.constant 0 : index
    %c0_9 = arith.constant 0 : index
    %12 = vector.load %arg10[%11, %c0_8, %c0_9] : memref<1x32x512xbf16, #tpu.memory_space<vmem>>, vector<1x32x512xbf16>
    %13 = vector.shape_cast %12 : vector<1x32x512xbf16> to vector<32x512xbf16>
    %14 = arith.index_cast %arg1 : i32 to index
    %c0_10 = arith.constant 0 : index
    %c0_11 = arith.constant 0 : index
    %15 = vector.load %arg11[%14, %c0_10, %c0_11] : memref<1x512x32xbf16, #tpu.memory_space<vmem>>, vector<1x512x32xbf16>
    %16 = vector.shape_cast %15 : vector<1x512x32xbf16> to vector<512x32xbf16>
    %cst = arith.constant dense<0.000000e+00> : vector<16x512xf32>
    %17 = tpu.matmul %4, %7, %cst {dimension_numbers = #tpu.dot_dimension_numbers<[1], [0], [0], [1], [0, 0, 1, 1], [], []>} : vector<16x32xbf16>, vector<32x512xbf16>, vector<16x512xf32> -> vector<16x512xf32>
    %cst_12 = arith.constant 0.353553385 : f32
    %18 = vector.broadcast %cst_12 : f32 to vector<16x512xf32>
    %19 = arith.mulf %17, %18 : vector<16x512xf32>
    %20 = arith.truncf %19 : vector<16x512xf32> to vector<16x512xbf16>
    %cst_13 = arith.constant dense<0.000000e+00> : vector<16x512xf32>
    %21 = tpu.matmul %3, %10, %cst_13 {dimension_numbers = #tpu.dot_dimension_numbers<[1], [0], [0], [1], [0, 0, 1, 1], [], []>} : vector<16x32xbf16>, vector<32x512xbf16>, vector<16x512xf32> -> vector<16x512xf32>
    %22 = arith.truncf %21 : vector<16x512xf32> to vector<16x512xbf16>
    %cst_14 = arith.constant dense<0.000000e+00> : vector<16x512xf32>
    %23 = tpu.matmul %4, %10, %cst_14 {dimension_numbers = #tpu.dot_dimension_numbers<[1], [0], [0], [1], [0, 0, 1, 1], [], []>} : vector<16x32xbf16>, vector<32x512xbf16>, vector<16x512xf32> -> vector<16x512xf32>
    %24 = arith.truncf %23 : vector<16x512xf32> to vector<16x512xbf16>
    %cst_15 = arith.constant dense<0.000000e+00> : vector<16x512xf32>
    %25 = tpu.matmul %3, %13, %cst_15 {dimension_numbers = #tpu.dot_dimension_numbers<[1], [0], [0], [1], [0, 0, 1, 1], [], []>} : vector<16x32xbf16>, vector<32x512xbf16>, vector<16x512xf32> -> vector<16x512xf32>
    %26 = arith.truncf %25 : vector<16x512xf32> to vector<16x512xbf16>
    %cst_16 = arith.constant dense<0.000000e+00> : vector<16x512xf32>
    %27 = tpu.matmul %4, %13, %cst_16 {dimension_numbers = #tpu.dot_dimension_numbers<[1], [0], [0], [1], [0, 0, 1, 1], [], []>} : vector<16x32xbf16>, vector<32x512xbf16>, vector<16x512xf32> -> vector<16x512xf32>
    %28 = arith.truncf %27 : vector<16x512xf32> to vector<16x512xbf16>
    %29 = tpu.iota {dimensions = array<i32: 1>} : vector<1x16xi32>
    %c9_i32 = arith.constant 9 : i32
    %30 = vector.broadcast %c9_i32 : i32 to vector<1x16xi32>
    %31 = arith.cmpi slt, %29, %30 : vector<1x16xi32>
    %cst_17 = arith.constant 0.000000e+00 : f32
    %cst_18 = arith.constant -1.000000e+30 : f32
    %32 = vector.broadcast %cst_17 : f32 to vector<1x16xf32>
    %33 = vector.broadcast %cst_18 : f32 to vector<1x16xf32>
    %34 = arith.select %31, %32, %33 : vector<1x16xi1>, vector<1x16xf32>
    %35 = vector.extract_strided_slice %20 {offsets = [0, 0], sizes = [16, 128], strides = [1, 1]} : vector<16x512xbf16> to vector<16x128xbf16>
    %36 = vector.extract_strided_slice %22 {offsets = [0, 0], sizes = [16, 128], strides = [1, 1]} : vector<16x512xbf16> to vector<16x128xbf16>
    %cst_19 = arith.constant dense<0.000000e+00> : vector<16x16xf32>
    %37 = tpu.matmul %35, %36, %cst_19 {dimension_numbers = #tpu.dot_dimension_numbers<[1], [1], [0], [0], [0, 0, 1, 0], [], []>} : vector<16x128xbf16>, vector<16x128xbf16>, vector<16x16xf32> -> vector<16x16xf32>
    %38 = vector.extract_strided_slice %24 {offsets = [0, 0], sizes = [16, 128], strides = [1, 1]} : vector<16x512xbf16> to vector<16x128xbf16>
    %cst_20 = arith.constant dense<0.000000e+00> : vector<16x16xf32>
    %39 = tpu.matmul %35, %38, %cst_20 {dimension_numbers = #tpu.dot_dimension_numbers<[1], [1], [0], [0], [0, 0, 1, 0], [], []>} : vector<16x128xbf16>, vector<16x128xbf16>, vector<16x16xf32> -> vector<16x16xf32>
    %40 = vector.broadcast %34 : vector<1x16xf32> to vector<16x16xf32>
    %41 = arith.addf %39, %40 : vector<16x16xf32>
    %cst_21 = arith.constant dense<0xFF800000> : vector<16xf32>
    %42 = vector.multi_reduction <maximumf>, %37, %cst_21 [1] : vector<16x16xf32> to vector<16xf32>
    %43 = vector.shape_cast %42 : vector<16xf32> to vector<16x1xf32>
    %cst_22 = arith.constant dense<0xFF800000> : vector<16xf32>
    %44 = vector.multi_reduction <maximumf>, %41, %cst_22 [1] : vector<16x16xf32> to vector<16xf32>
    %45 = vector.shape_cast %44 : vector<16xf32> to vector<16x1xf32>
    %46 = arith.maximumf %43, %45 : vector<16x1xf32>
    %47 = vector.broadcast %46 : vector<16x1xf32> to vector<16x16xf32>
    %48 = arith.subf %37, %47 : vector<16x16xf32>
    %49 = math.exp %48 : vector<16x16xf32>
    %50 = vector.broadcast %46 : vector<16x1xf32> to vector<16x16xf32>
    %51 = arith.subf %41, %50 : vector<16x16xf32>
    %52 = math.exp %51 : vector<16x16xf32>
    %cst_23 = arith.constant dense<0.000000e+00> : vector<16xf32>
    %53 = vector.multi_reduction <add>, %49, %cst_23 [1] : vector<16x16xf32> to vector<16xf32>
    %54 = vector.shape_cast %53 : vector<16xf32> to vector<16x1xf32>
    %cst_24 = arith.constant dense<0.000000e+00> : vector<16xf32>
    %55 = vector.multi_reduction <add>, %52, %cst_24 [1] : vector<16x16xf32> to vector<16xf32>
    %56 = vector.shape_cast %55 : vector<16xf32> to vector<16x1xf32>
    %57 = arith.addf %54, %56 : vector<16x1xf32>
    %58 = arith.truncf %49 : vector<16x16xf32> to vector<16x16xbf16>
    %59 = vector.extract_strided_slice %26 {offsets = [0, 0], sizes = [16, 128], strides = [1, 1]} : vector<16x512xbf16> to vector<16x128xbf16>
    %cst_25 = arith.constant dense<0.000000e+00> : vector<16x128xf32>
    %60 = tpu.matmul %58, %59, %cst_25 {dimension_numbers = #tpu.dot_dimension_numbers<[1], [0], [0], [1], [0, 0, 1, 1], [], []>} : vector<16x16xbf16>, vector<16x128xbf16>, vector<16x128xf32> -> vector<16x128xf32>
    %61 = arith.truncf %52 : vector<16x16xf32> to vector<16x16xbf16>
    %62 = vector.extract_strided_slice %28 {offsets = [0, 0], sizes = [16, 128], strides = [1, 1]} : vector<16x512xbf16> to vector<16x128xbf16>
    %cst_26 = arith.constant dense<0.000000e+00> : vector<16x128xf32>
    %63 = tpu.matmul %61, %62, %cst_26 {dimension_numbers = #tpu.dot_dimension_numbers<[1], [0], [0], [1], [0, 0, 1, 1], [], []>} : vector<16x16xbf16>, vector<16x128xbf16>, vector<16x128xf32> -> vector<16x128xf32>
    %64 = arith.addf %60, %63 : vector<16x128xf32>
    %65 = tpu.reciprocal %57 {approx = true} : vector<16x1xf32> -> vector<16x1xf32>
    %66 = vector.broadcast %65 : vector<16x1xf32> to vector<16x128xf32>
    %67 = arith.mulf %64, %66 : vector<16x128xf32>
    %68 = arith.truncf %67 : vector<16x128xf32> to vector<16x128xbf16>
    %69 = vector.extract_strided_slice %20 {offsets = [0, 128], sizes = [16, 128], strides = [1, 1]} : vector<16x512xbf16> to vector<16x128xbf16>
    %70 = vector.extract_strided_slice %22 {offsets = [0, 128], sizes = [16, 128], strides = [1, 1]} : vector<16x512xbf16> to vector<16x128xbf16>
    %cst_27 = arith.constant dense<0.000000e+00> : vector<16x16xf32>
    %71 = tpu.matmul %69, %70, %cst_27 {dimension_numbers = #tpu.dot_dimension_numbers<[1], [1], [0], [0], [0, 0, 1, 0], [], []>} : vector<16x128xbf16>, vector<16x128xbf16>, vector<16x16xf32> -> vector<16x16xf32>
    %72 = vector.extract_strided_slice %24 {offsets = [0, 128], sizes = [16, 128], strides = [1, 1]} : vector<16x512xbf16> to vector<16x128xbf16>
    %cst_28 = arith.constant dense<0.000000e+00> : vector<16x16xf32>
    %73 = tpu.matmul %69, %72, %cst_28 {dimension_numbers = #tpu.dot_dimension_numbers<[1], [1], [0], [0], [0, 0, 1, 0], [], []>} : vector<16x128xbf16>, vector<16x128xbf16>, vector<16x16xf32> -> vector<16x16xf32>
    %74 = vector.broadcast %34 : vector<1x16xf32> to vector<16x16xf32>
    %75 = arith.addf %73, %74 : vector<16x16xf32>
    %cst_29 = arith.constant dense<0xFF800000> : vector<16xf32>
    %76 = vector.multi_reduction <maximumf>, %71, %cst_29 [1] : vector<16x16xf32> to vector<16xf32>
    %77 = vector.shape_cast %76 : vector<16xf32> to vector<16x1xf32>
    %cst_30 = arith.constant dense<0xFF800000> : vector<16xf32>
    %78 = vector.multi_reduction <maximumf>, %75, %cst_30 [1] : vector<16x16xf32> to vector<16xf32>
    %79 = vector.shape_cast %78 : vector<16xf32> to vector<16x1xf32>
    %80 = arith.maximumf %77, %79 : vector<16x1xf32>
    %81 = vector.broadcast %80 : vector<16x1xf32> to vector<16x16xf32>
    %82 = arith.subf %71, %81 : vector<16x16xf32>
    %83 = math.exp %82 : vector<16x16xf32>
    %84 = vector.broadcast %80 : vector<16x1xf32> to vector<16x16xf32>
    %85 = arith.subf %75, %84 : vector<16x16xf32>
    %86 = math.exp %85 : vector<16x16xf32>
    %cst_31 = arith.constant dense<0.000000e+00> : vector<16xf32>
    %87 = vector.multi_reduction <add>, %83, %cst_31 [1] : vector<16x16xf32> to vector<16xf32>
    %88 = vector.shape_cast %87 : vector<16xf32> to vector<16x1xf32>
    %cst_32 = arith.constant dense<0.000000e+00> : vector<16xf32>
    %89 = vector.multi_reduction <add>, %86, %cst_32 [1] : vector<16x16xf32> to vector<16xf32>
    %90 = vector.shape_cast %89 : vector<16xf32> to vector<16x1xf32>
    %91 = arith.addf %88, %90 : vector<16x1xf32>
    %92 = arith.truncf %83 : vector<16x16xf32> to vector<16x16xbf16>
    %93 = vector.extract_strided_slice %26 {offsets = [0, 128], sizes = [16, 128], strides = [1, 1]} : vector<16x512xbf16> to vector<16x128xbf16>
    %cst_33 = arith.constant dense<0.000000e+00> : vector<16x128xf32>
    %94 = tpu.matmul %92, %93, %cst_33 {dimension_numbers = #tpu.dot_dimension_numbers<[1], [0], [0], [1], [0, 0, 1, 1], [], []>} : vector<16x16xbf16>, vector<16x128xbf16>, vector<16x128xf32> -> vector<16x128xf32>
    %95 = arith.truncf %86 : vector<16x16xf32> to vector<16x16xbf16>
    %96 = vector.extract_strided_slice %28 {offsets = [0, 128], sizes = [16, 128], strides = [1, 1]} : vector<16x512xbf16> to vector<16x128xbf16>
    %cst_34 = arith.constant dense<0.000000e+00> : vector<16x128xf32>
    %97 = tpu.matmul %95, %96, %cst_34 {dimension_numbers = #tpu.dot_dimension_numbers<[1], [0], [0], [1], [0, 0, 1, 1], [], []>} : vector<16x16xbf16>, vector<16x128xbf16>, vector<16x128xf32> -> vector<16x128xf32>
    %98 = arith.addf %94, %97 : vector<16x128xf32>
    %99 = tpu.reciprocal %91 {approx = true} : vector<16x1xf32> -> vector<16x1xf32>
    %100 = vector.broadcast %99 : vector<16x1xf32> to vector<16x128xf32>
    %101 = arith.mulf %98, %100 : vector<16x128xf32>
    %102 = arith.truncf %101 : vector<16x128xf32> to vector<16x128xbf16>
    %103 = vector.extract_strided_slice %20 {offsets = [0, 256], sizes = [16, 128], strides = [1, 1]} : vector<16x512xbf16> to vector<16x128xbf16>
    %104 = vector.extract_strided_slice %22 {offsets = [0, 256], sizes = [16, 128], strides = [1, 1]} : vector<16x512xbf16> to vector<16x128xbf16>
    %cst_35 = arith.constant dense<0.000000e+00> : vector<16x16xf32>
    %105 = tpu.matmul %103, %104, %cst_35 {dimension_numbers = #tpu.dot_dimension_numbers<[1], [1], [0], [0], [0, 0, 1, 0], [], []>} : vector<16x128xbf16>, vector<16x128xbf16>, vector<16x16xf32> -> vector<16x16xf32>
    %106 = vector.extract_strided_slice %24 {offsets = [0, 256], sizes = [16, 128], strides = [1, 1]} : vector<16x512xbf16> to vector<16x128xbf16>
    %cst_36 = arith.constant dense<0.000000e+00> : vector<16x16xf32>
    %107 = tpu.matmul %103, %106, %cst_36 {dimension_numbers = #tpu.dot_dimension_numbers<[1], [1], [0], [0], [0, 0, 1, 0], [], []>} : vector<16x128xbf16>, vector<16x128xbf16>, vector<16x16xf32> -> vector<16x16xf32>
    %108 = vector.broadcast %34 : vector<1x16xf32> to vector<16x16xf32>
    %109 = arith.addf %107, %108 : vector<16x16xf32>
    %cst_37 = arith.constant dense<0xFF800000> : vector<16xf32>
    %110 = vector.multi_reduction <maximumf>, %105, %cst_37 [1] : vector<16x16xf32> to vector<16xf32>
    %111 = vector.shape_cast %110 : vector<16xf32> to vector<16x1xf32>
    %cst_38 = arith.constant dense<0xFF800000> : vector<16xf32>
    %112 = vector.multi_reduction <maximumf>, %109, %cst_38 [1] : vector<16x16xf32> to vector<16xf32>
    %113 = vector.shape_cast %112 : vector<16xf32> to vector<16x1xf32>
    %114 = arith.maximumf %111, %113 : vector<16x1xf32>
    %115 = vector.broadcast %114 : vector<16x1xf32> to vector<16x16xf32>
    %116 = arith.subf %105, %115 : vector<16x16xf32>
    %117 = math.exp %116 : vector<16x16xf32>
    %118 = vector.broadcast %114 : vector<16x1xf32> to vector<16x16xf32>
    %119 = arith.subf %109, %118 : vector<16x16xf32>
    %120 = math.exp %119 : vector<16x16xf32>
    %cst_39 = arith.constant dense<0.000000e+00> : vector<16xf32>
    %121 = vector.multi_reduction <add>, %117, %cst_39 [1] : vector<16x16xf32> to vector<16xf32>
    %122 = vector.shape_cast %121 : vector<16xf32> to vector<16x1xf32>
    %cst_40 = arith.constant dense<0.000000e+00> : vector<16xf32>
    %123 = vector.multi_reduction <add>, %120, %cst_40 [1] : vector<16x16xf32> to vector<16xf32>
    %124 = vector.shape_cast %123 : vector<16xf32> to vector<16x1xf32>
    %125 = arith.addf %122, %124 : vector<16x1xf32>
    %126 = arith.truncf %117 : vector<16x16xf32> to vector<16x16xbf16>
    %127 = vector.extract_strided_slice %26 {offsets = [0, 256], sizes = [16, 128], strides = [1, 1]} : vector<16x512xbf16> to vector<16x128xbf16>
    %cst_41 = arith.constant dense<0.000000e+00> : vector<16x128xf32>
    %128 = tpu.matmul %126, %127, %cst_41 {dimension_numbers = #tpu.dot_dimension_numbers<[1], [0], [0], [1], [0, 0, 1, 1], [], []>} : vector<16x16xbf16>, vector<16x128xbf16>, vector<16x128xf32> -> vector<16x128xf32>
    %129 = arith.truncf %120 : vector<16x16xf32> to vector<16x16xbf16>
    %130 = vector.extract_strided_slice %28 {offsets = [0, 256], sizes = [16, 128], strides = [1, 1]} : vector<16x512xbf16> to vector<16x128xbf16>
    %cst_42 = arith.constant dense<0.000000e+00> : vector<16x128xf32>
    %131 = tpu.matmul %129, %130, %cst_42 {dimension_numbers = #tpu.dot_dimension_numbers<[1], [0], [0], [1], [0, 0, 1, 1], [], []>} : vector<16x16xbf16>, vector<16x128xbf16>, vector<16x128xf32> -> vector<16x128xf32>
    %132 = arith.addf %128, %131 : vector<16x128xf32>
    %133 = tpu.reciprocal %125 {approx = true} : vector<16x1xf32> -> vector<16x1xf32>
    %134 = vector.broadcast %133 : vector<16x1xf32> to vector<16x128xf32>
    %135 = arith.mulf %132, %134 : vector<16x128xf32>
    %136 = arith.truncf %135 : vector<16x128xf32> to vector<16x128xbf16>
    %137 = vector.extract_strided_slice %20 {offsets = [0, 384], sizes = [16, 128], strides = [1, 1]} : vector<16x512xbf16> to vector<16x128xbf16>
    %138 = vector.extract_strided_slice %22 {offsets = [0, 384], sizes = [16, 128], strides = [1, 1]} : vector<16x512xbf16> to vector<16x128xbf16>
    %cst_43 = arith.constant dense<0.000000e+00> : vector<16x16xf32>
    %139 = tpu.matmul %137, %138, %cst_43 {dimension_numbers = #tpu.dot_dimension_numbers<[1], [1], [0], [0], [0, 0, 1, 0], [], []>} : vector<16x128xbf16>, vector<16x128xbf16>, vector<16x16xf32> -> vector<16x16xf32>
    %140 = vector.extract_strided_slice %24 {offsets = [0, 384], sizes = [16, 128], strides = [1, 1]} : vector<16x512xbf16> to vector<16x128xbf16>
    %cst_44 = arith.constant dense<0.000000e+00> : vector<16x16xf32>
    %141 = tpu.matmul %137, %140, %cst_44 {dimension_numbers = #tpu.dot_dimension_numbers<[1], [1], [0], [0], [0, 0, 1, 0], [], []>} : vector<16x128xbf16>, vector<16x128xbf16>, vector<16x16xf32> -> vector<16x16xf32>
    %142 = vector.broadcast %34 : vector<1x16xf32> to vector<16x16xf32>
    %143 = arith.addf %141, %142 : vector<16x16xf32>
    %cst_45 = arith.constant dense<0xFF800000> : vector<16xf32>
    %144 = vector.multi_reduction <maximumf>, %139, %cst_45 [1] : vector<16x16xf32> to vector<16xf32>
    %145 = vector.shape_cast %144 : vector<16xf32> to vector<16x1xf32>
    %cst_46 = arith.constant dense<0xFF800000> : vector<16xf32>
    %146 = vector.multi_reduction <maximumf>, %143, %cst_46 [1] : vector<16x16xf32> to vector<16xf32>
    %147 = vector.shape_cast %146 : vector<16xf32> to vector<16x1xf32>
    %148 = arith.maximumf %145, %147 : vector<16x1xf32>
    %149 = vector.broadcast %148 : vector<16x1xf32> to vector<16x16xf32>
    %150 = arith.subf %139, %149 : vector<16x16xf32>
    %151 = math.exp %150 : vector<16x16xf32>
    %152 = vector.broadcast %148 : vector<16x1xf32> to vector<16x16xf32>
    %153 = arith.subf %143, %152 : vector<16x16xf32>
    %154 = math.exp %153 : vector<16x16xf32>
    %cst_47 = arith.constant dense<0.000000e+00> : vector<16xf32>
    %155 = vector.multi_reduction <add>, %151, %cst_47 [1] : vector<16x16xf32> to vector<16xf32>
    %156 = vector.shape_cast %155 : vector<16xf32> to vector<16x1xf32>
    %cst_48 = arith.constant dense<0.000000e+00> : vector<16xf32>
    %157 = vector.multi_reduction <add>, %154, %cst_48 [1] : vector<16x16xf32> to vector<16xf32>
    %158 = vector.shape_cast %157 : vector<16xf32> to vector<16x1xf32>
    %159 = arith.addf %156, %158 : vector<16x1xf32>
    %160 = arith.truncf %151 : vector<16x16xf32> to vector<16x16xbf16>
    %161 = vector.extract_strided_slice %26 {offsets = [0, 384], sizes = [16, 128], strides = [1, 1]} : vector<16x512xbf16> to vector<16x128xbf16>
    %cst_49 = arith.constant dense<0.000000e+00> : vector<16x128xf32>
    %162 = tpu.matmul %160, %161, %cst_49 {dimension_numbers = #tpu.dot_dimension_numbers<[1], [0], [0], [1], [0, 0, 1, 1], [], []>} : vector<16x16xbf16>, vector<16x128xbf16>, vector<16x128xf32> -> vector<16x128xf32>
    %163 = arith.truncf %154 : vector<16x16xf32> to vector<16x16xbf16>
    %164 = vector.extract_strided_slice %28 {offsets = [0, 384], sizes = [16, 128], strides = [1, 1]} : vector<16x512xbf16> to vector<16x128xbf16>
    %cst_50 = arith.constant dense<0.000000e+00> : vector<16x128xf32>
    %165 = tpu.matmul %163, %164, %cst_50 {dimension_numbers = #tpu.dot_dimension_numbers<[1], [0], [0], [1], [0, 0, 1, 1], [], []>} : vector<16x16xbf16>, vector<16x128xbf16>, vector<16x128xf32> -> vector<16x128xf32>
    %166 = arith.addf %162, %165 : vector<16x128xf32>
    %167 = tpu.reciprocal %159 {approx = true} : vector<16x1xf32> -> vector<16x1xf32>
    %168 = vector.broadcast %167 : vector<16x1xf32> to vector<16x128xf32>
    %169 = arith.mulf %166, %168 : vector<16x128xf32>
    %170 = arith.truncf %169 : vector<16x128xf32> to vector<16x128xbf16>
    %171 = tpu.concatenate %68, %102, %136, %170 in 1 : vector<16x128xbf16>, vector<16x128xbf16>, vector<16x128xbf16>, vector<16x128xbf16> -> vector<16x512xbf16>
    %c0_51 = arith.constant 0 : index
    %c0_52 = arith.constant 0 : index
    %172 = vector.load %arg15[%c0_51, %c0_52] : memref<16x32xf32, #tpu.memory_space<vmem>>, vector<16x32xf32>
    %cst_53 = arith.constant dense<0.000000e+00> : vector<16x32xf32>
    %173 = tpu.matmul %171, %16, %cst_53 {dimension_numbers = #tpu.dot_dimension_numbers<[1], [0], [0], [1], [0, 0, 1, 1], [], []>} : vector<16x512xbf16>, vector<512x32xbf16>, vector<16x32xf32> -> vector<16x32xf32>
    %174 = arith.addf %172, %173 : vector<16x32xf32>
    %c0_54 = arith.constant 0 : index
    %c0_55 = arith.constant 0 : index
    %175 = vector.load %arg15[%c0_54, %c0_55] : memref<16x32xf32, #tpu.memory_space<vmem>>, vector<16x32xf32>
    tpu.vector_store %arg15[%c0_54, %c0_55], %174 {strides = array<i32>} : memref<16x32xf32, #tpu.memory_space<vmem>>, vector<16x32xf32>,
    %c0_i32_56 = arith.constant 0 : i32
    %176 = arith.cmpi eq, %arg1, %c0_i32_56 : i32
    %177 = arith.extui %176 : i1 to i32
    %c0_i32_57 = arith.constant 0 : i32
    %178 = arith.cmpi ne, %177, %c0_i32_57 : i32
    scf.if %178 {
      %c0_58 = arith.constant 0 : index
      %c0_59 = arith.constant 0 : index
      %179 = vector.load %arg15[%c0_58, %c0_59] : memref<16x32xf32, #tpu.memory_space<vmem>>, vector<16x32xf32>
      %c0_60 = arith.constant 0 : index
      %c0_61 = arith.constant 0 : index
      %c0_62 = arith.constant 0 : index
      %180 = vector.load %arg12[%c0_60, %c0_61, %c0_62] : memref<1x16x32xf32, #tpu.memory_space<vmem>>, vector<1x16x32xf32>
      %181 = vector.shape_cast %180 : vector<1x16x32xf32> to vector<16x32xf32>
      %182 = vector.shape_cast %179 : vector<16x32xf32> to vector<1x16x32xf32>
      tpu.vector_store %arg12[%c0_60, %c0_61, %c0_62], %182 {strides = array<i32>} : memref<1x16x32xf32, #tpu.memory_space<vmem>>, vector<1x16x32xf32>,
    } else {
    }
    return
  }
  func.func @transform_0(%arg0: i32, %arg1: i32) -> (i32, i32, i32) {
    %c0_i32 = arith.constant 0 : i32
    %c0_i32_0 = arith.constant 0 : i32
    %c0_i32_1 = arith.constant 0 : i32
    return %arg0, %c0_i32, %c0_i32_0 : i32, i32, i32
  }
  func.func @transform_1(%arg0: i32, %arg1: i32) -> (i32, i32, i32) {
    %c0_i32 = arith.constant 0 : i32
    %c0_i32_0 = arith.constant 0 : i32
    %c0_i32_1 = arith.constant 0 : i32
    return %arg0, %c0_i32, %c0_i32_0 : i32, i32, i32
  }
  func.func @transform_2(%arg0: i32, %arg1: i32) -> (i32, i32) {
    %c0_i32 = arith.constant 0 : i32
    %c0_i32_0 = arith.constant 0 : i32
    %c0_i32_1 = arith.constant 0 : i32
    return %c0_i32, %c0_i32_0 : i32, i32
  }
  func.func @transform_3(%arg0: i32, %arg1: i32) -> (i32, i32) {
    %c0_i32 = arith.constant 0 : i32
    %c0_i32_0 = arith.constant 0 : i32
    %c0_i32_1 = arith.constant 0 : i32
    return %c0_i32, %c0_i32_0 : i32, i32
  }
  func.func @transform_4(%arg0: i32, %arg1: i32) -> (i32, i32) {
    %c0_i32 = arith.constant 0 : i32
    %c0_i32_0 = arith.constant 0 : i32
    %c0_i32_1 = arith.constant 0 : i32
    return %c0_i32, %c0_i32_0 : i32, i32
  }
  func.func @transform_5(%arg0: i32, %arg1: i32) -> (i32, i32) {
    %c0_i32 = arith.constant 0 : i32
    %c0_i32_0 = arith.constant 0 : i32
    %c0_i32_1 = arith.constant 0 : i32
    return %c0_i32, %c0_i32_0 : i32, i32
  }
  func.func @transform_6(%arg0: i32, %arg1: i32) -> (i32, i32, i32) {
    %c0_i32 = arith.constant 0 : i32
    %c0_i32_0 = arith.constant 0 : i32
    %c0_i32_1 = arith.constant 0 : i32
    %c0_i32_2 = arith.constant 0 : i32
    return %c0_i32, %c0_i32_0, %c0_i32_1 : i32, i32, i32
  }
  func.func @transform_7(%arg0: i32, %arg1: i32) -> (i32, i32, i32) {
    %c0_i32 = arith.constant 0 : i32
    %c0_i32_0 = arith.constant 0 : i32
    %c0_i32_1 = arith.constant 0 : i32
    %c0_i32_2 = arith.constant 0 : i32
    return %c0_i32, %c0_i32_0, %c0_i32_1 : i32, i32, i32
  }
  func.func @transform_8(%arg0: i32, %arg1: i32) -> (i32, i32, i32) {
    %c0_i32 = arith.constant 0 : i32
    %c0_i32_0 = arith.constant 0 : i32
    %c0_i32_1 = arith.constant 0 : i32
    %c0_i32_2 = arith.constant 0 : i32
    return %c0_i32, %c0_i32_0, %c0_i32_1 : i32, i32, i32
  }
  func.func @transform_9(%arg0: i32, %arg1: i32) -> (i32, i32, i32) {
    %c0_i32 = arith.constant 0 : i32
    %c0_i32_0 = arith.constant 0 : i32
    %c0_i32_1 = arith.constant 0 : i32
    %c0_i32_2 = arith.constant 0 : i32
    return %c0_i32, %c0_i32_0, %c0_i32_1 : i32, i32, i32
  }
  func.func @transform_10(%arg0: i32, %arg1: i32) -> (i32, i32, i32) {
    %c0_i32 = arith.constant 0 : i32
    %c0_i32_0 = arith.constant 0 : i32
    %c0_i32_1 = arith.constant 0 : i32
    return %arg0, %c0_i32, %c0_i32_0 : i32, i32, i32
  }
}

module attributes {stable_mosaic.version = 11 : i64} {
  func.func @_ffn_kernel(%arg0: i32, %arg1: memref<32x32xf32, #tpu.memory_space<vmem>>, %arg2: memref<1x32xf32, #tpu.memory_space<vmem>>, %arg3: memref<1x32xf32, #tpu.memory_space<vmem>>, %arg4: memref<32x128xbf16, #tpu.memory_space<vmem>>, %arg5: memref<128x32xbf16, #tpu.memory_space<vmem>>, %arg6: memref<32x32xf32, #tpu.memory_space<vmem>>) attributes {dimension_semantics = [#tpu.dimension_semantics<parallel>], iteration_bounds = array<i64: 1>, scalar_prefetch = 0 : i64, scratch_operands = 0 : i64, tpu.core_type = #tpu.core_type<tc>, window_params = [{transform_indices = @transform_0, window_bounds = array<i64: 32, 32>}, {pipeline_mode = #tpu.pipeline_mode<synchronous>, transform_indices = @transform_1, window_bounds = array<i64: 1, 32>}, {pipeline_mode = #tpu.pipeline_mode<synchronous>, transform_indices = @transform_2, window_bounds = array<i64: 1, 32>}, {pipeline_mode = #tpu.pipeline_mode<synchronous>, transform_indices = @transform_3, window_bounds = array<i64: 32, 128>}, {pipeline_mode = #tpu.pipeline_mode<synchronous>, transform_indices = @transform_4, window_bounds = array<i64: 128, 32>}, {transform_indices = @transform_5, window_bounds = array<i64: 32, 32>}]} {
    %c0 = arith.constant 0 : index
    %c0_0 = arith.constant 0 : index
    %0 = vector.load %arg1[%c0, %c0_0] : memref<32x32xf32, #tpu.memory_space<vmem>>, vector<32x32xf32>
    %c0_1 = arith.constant 0 : index
    %c0_2 = arith.constant 0 : index
    %1 = vector.load %arg2[%c0_1, %c0_2] : memref<1x32xf32, #tpu.memory_space<vmem>>, vector<1x32xf32>
    %c0_3 = arith.constant 0 : index
    %c0_4 = arith.constant 0 : index
    %2 = vector.load %arg3[%c0_3, %c0_4] : memref<1x32xf32, #tpu.memory_space<vmem>>, vector<1x32xf32>
    %cst = arith.constant dense<0.000000e+00> : vector<32xf32>
    %3 = vector.multi_reduction <add>, %0, %cst [1] : vector<32x32xf32> to vector<32xf32>
    %4 = vector.shape_cast %3 : vector<32xf32> to vector<32x1xf32>
    %cst_5 = arith.constant 3.200000e+01 : f32
    %5 = vector.broadcast %cst_5 : f32 to vector<32x1xf32>
    %6 = arith.divf %4, %5 : vector<32x1xf32>
    %7 = vector.broadcast %6 : vector<32x1xf32> to vector<32x32xf32>
    %8 = arith.subf %0, %7 : vector<32x32xf32>
    %9 = arith.mulf %8, %8 : vector<32x32xf32>
    %cst_6 = arith.constant dense<0.000000e+00> : vector<32xf32>
    %10 = vector.multi_reduction <add>, %9, %cst_6 [1] : vector<32x32xf32> to vector<32xf32>
    %11 = vector.shape_cast %10 : vector<32xf32> to vector<32x1xf32>
    %cst_7 = arith.constant 3.200000e+01 : f32
    %12 = vector.broadcast %cst_7 : f32 to vector<32x1xf32>
    %13 = arith.divf %11, %12 : vector<32x1xf32>
    %14 = vector.broadcast %6 : vector<32x1xf32> to vector<32x32xf32>
    %15 = arith.subf %0, %14 : vector<32x32xf32>
    %cst_8 = arith.constant 9.99999974E-6 : f32
    %16 = vector.broadcast %cst_8 : f32 to vector<32x1xf32>
    %17 = arith.addf %13, %16 : vector<32x1xf32>
    %18 = math.rsqrt %17 : vector<32x1xf32>
    %19 = vector.broadcast %18 : vector<32x1xf32> to vector<32x32xf32>
    %20 = arith.mulf %15, %19 : vector<32x32xf32>
    %21 = vector.broadcast %1 : vector<1x32xf32> to vector<32x32xf32>
    %22 = arith.mulf %20, %21 : vector<32x32xf32>
    %23 = vector.broadcast %2 : vector<1x32xf32> to vector<32x32xf32>
    %24 = arith.addf %22, %23 : vector<32x32xf32>
    %25 = arith.truncf %24 : vector<32x32xf32> to vector<32x32xbf16>
    %c0_9 = arith.constant 0 : index
    %c0_10 = arith.constant 0 : index
    %26 = vector.load %arg4[%c0_9, %c0_10] : memref<32x128xbf16, #tpu.memory_space<vmem>>, vector<32x128xbf16>
    %cst_11 = arith.constant dense<0.000000e+00> : vector<32x128xf32>
    %27 = tpu.matmul %25, %26, %cst_11 {dimension_numbers = #tpu.dot_dimension_numbers<[1], [0], [0], [1], [0, 0, 1, 1], [], []>} : vector<32x32xbf16>, vector<32x128xbf16>, vector<32x128xf32> -> vector<32x128xf32>
    %cst_12 = arith.constant 5.000000e-01 : f32
    %28 = vector.broadcast %cst_12 : f32 to vector<32x128xf32>
    %29 = arith.mulf %28, %27 : vector<32x128xf32>
    %cst_13 = arith.constant 0.707106769 : f32
    %30 = vector.broadcast %cst_13 : f32 to vector<32x128xf32>
    %31 = arith.mulf %27, %30 : vector<32x128xf32>
    %cst_14 = arith.constant 0.000000e+00 : f32
    %32 = vector.broadcast %cst_14 : f32 to vector<32x128xf32>
    %33 = arith.cmpf oge, %31, %32 : vector<32x128xf32>
    %cst_15 = arith.constant 1.000000e+00 : f32
    %cst_16 = arith.constant -1.000000e+00 : f32
    %34 = vector.broadcast %cst_15 : f32 to vector<32x128xf32>
    %35 = vector.broadcast %cst_16 : f32 to vector<32x128xf32>
    %36 = arith.select %33, %34, %35 : vector<32x128xi1>, vector<32x128xf32>
    %37 = math.absf %31 : vector<32x128xf32>
    %cst_17 = arith.constant 0.327591091 : f32
    %38 = vector.broadcast %cst_17 : f32 to vector<32x128xf32>
    %39 = arith.mulf %38, %37 : vector<32x128xf32>
    %cst_18 = arith.constant 1.000000e+00 : f32
    %40 = vector.broadcast %cst_18 : f32 to vector<32x128xf32>
    %41 = arith.addf %40, %39 : vector<32x128xf32>
    %cst_19 = arith.constant 1.000000e+00 : f32
    %42 = vector.broadcast %cst_19 : f32 to vector<32x128xf32>
    %43 = arith.divf %42, %41 : vector<32x128xf32>
    %cst_20 = arith.constant 1.06140542 : f32
    %44 = vector.broadcast %cst_20 : f32 to vector<32x128xf32>
    %45 = arith.mulf %44, %43 : vector<32x128xf32>
    %cst_21 = arith.constant -1.45315206 : f32
    %46 = vector.broadcast %cst_21 : f32 to vector<32x128xf32>
    %47 = arith.addf %45, %46 : vector<32x128xf32>
    %48 = arith.mulf %47, %43 : vector<32x128xf32>
    %cst_22 = arith.constant 1.42141378 : f32
    %49 = vector.broadcast %cst_22 : f32 to vector<32x128xf32>
    %50 = arith.addf %48, %49 : vector<32x128xf32>
    %51 = arith.mulf %50, %43 : vector<32x128xf32>
    %cst_23 = arith.constant -0.284496725 : f32
    %52 = vector.broadcast %cst_23 : f32 to vector<32x128xf32>
    %53 = arith.addf %51, %52 : vector<32x128xf32>
    %54 = arith.mulf %53, %43 : vector<32x128xf32>
    %cst_24 = arith.constant 0.254829586 : f32
    %55 = vector.broadcast %cst_24 : f32 to vector<32x128xf32>
    %56 = arith.addf %54, %55 : vector<32x128xf32>
    %57 = arith.mulf %56, %43 : vector<32x128xf32>
    %cst_25 = arith.constant 0.000000e+00 : f32
    %58 = vector.broadcast %cst_25 : f32 to vector<32x128xf32>
    %59 = arith.subf %58, %37 : vector<32x128xf32>
    %60 = arith.mulf %59, %37 : vector<32x128xf32>
    %61 = math.exp %60 : vector<32x128xf32>
    %62 = arith.mulf %57, %61 : vector<32x128xf32>
    %cst_26 = arith.constant 1.000000e+00 : f32
    %63 = vector.broadcast %cst_26 : f32 to vector<32x128xf32>
    %64 = arith.subf %63, %62 : vector<32x128xf32>
    %65 = arith.mulf %36, %64 : vector<32x128xf32>
    %cst_27 = arith.constant 1.000000e+00 : f32
    %66 = vector.broadcast %cst_27 : f32 to vector<32x128xf32>
    %67 = arith.addf %66, %65 : vector<32x128xf32>
    %68 = arith.mulf %29, %67 : vector<32x128xf32>
    %69 = arith.truncf %68 : vector<32x128xf32> to vector<32x128xbf16>
    %c0_28 = arith.constant 0 : index
    %c0_29 = arith.constant 0 : index
    %70 = vector.load %arg5[%c0_28, %c0_29] : memref<128x32xbf16, #tpu.memory_space<vmem>>, vector<128x32xbf16>
    %cst_30 = arith.constant dense<0.000000e+00> : vector<32x32xf32>
    %71 = tpu.matmul %69, %70, %cst_30 {dimension_numbers = #tpu.dot_dimension_numbers<[1], [0], [0], [1], [0, 0, 1, 1], [], []>} : vector<32x128xbf16>, vector<128x32xbf16>, vector<32x32xf32> -> vector<32x32xf32>
    %c0_31 = arith.constant 0 : index
    %c0_32 = arith.constant 0 : index
    %72 = vector.load %arg1[%c0_31, %c0_32] : memref<32x32xf32, #tpu.memory_space<vmem>>, vector<32x32xf32>
    %73 = arith.addf %72, %71 : vector<32x32xf32>
    %c0_33 = arith.constant 0 : index
    %c0_34 = arith.constant 0 : index
    %74 = vector.load %arg6[%c0_33, %c0_34] : memref<32x32xf32, #tpu.memory_space<vmem>>, vector<32x32xf32>
    tpu.vector_store %arg6[%c0_33, %c0_34], %73 {strides = array<i32>} : memref<32x32xf32, #tpu.memory_space<vmem>>, vector<32x32xf32>,
    return
  }
  func.func @transform_0(%arg0: i32) -> (i32, i32) {
    %c0_i32 = arith.constant 0 : i32
    %c0_i32_0 = arith.constant 0 : i32
    return %arg0, %c0_i32 : i32, i32
  }
  func.func @transform_1(%arg0: i32) -> (i32, i32) {
    %c0_i32 = arith.constant 0 : i32
    %c0_i32_0 = arith.constant 0 : i32
    %c0_i32_1 = arith.constant 0 : i32
    return %c0_i32, %c0_i32_0 : i32, i32
  }
  func.func @transform_2(%arg0: i32) -> (i32, i32) {
    %c0_i32 = arith.constant 0 : i32
    %c0_i32_0 = arith.constant 0 : i32
    %c0_i32_1 = arith.constant 0 : i32
    return %c0_i32, %c0_i32_0 : i32, i32
  }
  func.func @transform_3(%arg0: i32) -> (i32, i32) {
    %c0_i32 = arith.constant 0 : i32
    %c0_i32_0 = arith.constant 0 : i32
    %c0_i32_1 = arith.constant 0 : i32
    return %c0_i32, %c0_i32_0 : i32, i32
  }
  func.func @transform_4(%arg0: i32) -> (i32, i32) {
    %c0_i32 = arith.constant 0 : i32
    %c0_i32_0 = arith.constant 0 : i32
    %c0_i32_1 = arith.constant 0 : i32
    return %c0_i32, %c0_i32_0 : i32, i32
  }
  func.func @transform_5(%arg0: i32) -> (i32, i32) {
    %c0_i32 = arith.constant 0 : i32
    %c0_i32_0 = arith.constant 0 : i32
    return %arg0, %c0_i32 : i32, i32
  }
}

module attributes {stable_mosaic.version = 11 : i64} {
  func.func @_ln_proj_kernel(%arg0: i32, %arg1: memref<32x32xf32, #tpu.memory_space<vmem>>, %arg2: memref<1x32xf32, #tpu.memory_space<vmem>>, %arg3: memref<1x32xf32, #tpu.memory_space<vmem>>, %arg4: memref<32x32xbf16, #tpu.memory_space<vmem>>, %arg5: memref<1x32xf32, #tpu.memory_space<vmem>>, %arg6: memref<32x32xf32, #tpu.memory_space<vmem>>) attributes {dimension_semantics = [#tpu.dimension_semantics<parallel>], iteration_bounds = array<i64: 1>, scalar_prefetch = 0 : i64, scratch_operands = 0 : i64, tpu.core_type = #tpu.core_type<tc>, window_params = [{transform_indices = @transform_0, window_bounds = array<i64: 32, 32>}, {pipeline_mode = #tpu.pipeline_mode<synchronous>, transform_indices = @transform_1, window_bounds = array<i64: 1, 32>}, {pipeline_mode = #tpu.pipeline_mode<synchronous>, transform_indices = @transform_2, window_bounds = array<i64: 1, 32>}, {pipeline_mode = #tpu.pipeline_mode<synchronous>, transform_indices = @transform_3, window_bounds = array<i64: 32, 32>}, {pipeline_mode = #tpu.pipeline_mode<synchronous>, transform_indices = @transform_4, window_bounds = array<i64: 1, 32>}, {transform_indices = @transform_5, window_bounds = array<i64: 32, 32>}]} {
    %c0 = arith.constant 0 : index
    %c0_0 = arith.constant 0 : index
    %0 = vector.load %arg1[%c0, %c0_0] : memref<32x32xf32, #tpu.memory_space<vmem>>, vector<32x32xf32>
    %c0_1 = arith.constant 0 : index
    %c0_2 = arith.constant 0 : index
    %1 = vector.load %arg2[%c0_1, %c0_2] : memref<1x32xf32, #tpu.memory_space<vmem>>, vector<1x32xf32>
    %c0_3 = arith.constant 0 : index
    %c0_4 = arith.constant 0 : index
    %2 = vector.load %arg3[%c0_3, %c0_4] : memref<1x32xf32, #tpu.memory_space<vmem>>, vector<1x32xf32>
    %cst = arith.constant dense<0.000000e+00> : vector<32xf32>
    %3 = vector.multi_reduction <add>, %0, %cst [1] : vector<32x32xf32> to vector<32xf32>
    %4 = vector.shape_cast %3 : vector<32xf32> to vector<32x1xf32>
    %cst_5 = arith.constant 3.200000e+01 : f32
    %5 = vector.broadcast %cst_5 : f32 to vector<32x1xf32>
    %6 = arith.divf %4, %5 : vector<32x1xf32>
    %7 = vector.broadcast %6 : vector<32x1xf32> to vector<32x32xf32>
    %8 = arith.subf %0, %7 : vector<32x32xf32>
    %9 = arith.mulf %8, %8 : vector<32x32xf32>
    %cst_6 = arith.constant dense<0.000000e+00> : vector<32xf32>
    %10 = vector.multi_reduction <add>, %9, %cst_6 [1] : vector<32x32xf32> to vector<32xf32>
    %11 = vector.shape_cast %10 : vector<32xf32> to vector<32x1xf32>
    %cst_7 = arith.constant 3.200000e+01 : f32
    %12 = vector.broadcast %cst_7 : f32 to vector<32x1xf32>
    %13 = arith.divf %11, %12 : vector<32x1xf32>
    %14 = vector.broadcast %6 : vector<32x1xf32> to vector<32x32xf32>
    %15 = arith.subf %0, %14 : vector<32x32xf32>
    %cst_8 = arith.constant 9.99999974E-6 : f32
    %16 = vector.broadcast %cst_8 : f32 to vector<32x1xf32>
    %17 = arith.addf %13, %16 : vector<32x1xf32>
    %18 = math.rsqrt %17 : vector<32x1xf32>
    %19 = vector.broadcast %18 : vector<32x1xf32> to vector<32x32xf32>
    %20 = arith.mulf %15, %19 : vector<32x32xf32>
    %21 = vector.broadcast %1 : vector<1x32xf32> to vector<32x32xf32>
    %22 = arith.mulf %20, %21 : vector<32x32xf32>
    %23 = vector.broadcast %2 : vector<1x32xf32> to vector<32x32xf32>
    %24 = arith.addf %22, %23 : vector<32x32xf32>
    %25 = arith.truncf %24 : vector<32x32xf32> to vector<32x32xbf16>
    %c0_9 = arith.constant 0 : index
    %c0_10 = arith.constant 0 : index
    %26 = vector.load %arg4[%c0_9, %c0_10] : memref<32x32xbf16, #tpu.memory_space<vmem>>, vector<32x32xbf16>
    %cst_11 = arith.constant dense<0.000000e+00> : vector<32x32xf32>
    %27 = tpu.matmul %25, %26, %cst_11 {dimension_numbers = #tpu.dot_dimension_numbers<[1], [0], [0], [1], [0, 0, 1, 1], [], []>} : vector<32x32xbf16>, vector<32x32xbf16>, vector<32x32xf32> -> vector<32x32xf32>
    %c0_12 = arith.constant 0 : index
    %c0_13 = arith.constant 0 : index
    %28 = vector.load %arg5[%c0_12, %c0_13] : memref<1x32xf32, #tpu.memory_space<vmem>>, vector<1x32xf32>
    %29 = vector.broadcast %28 : vector<1x32xf32> to vector<32x32xf32>
    %30 = arith.addf %27, %29 : vector<32x32xf32>
    %c0_14 = arith.constant 0 : index
    %c0_15 = arith.constant 0 : index
    %31 = vector.load %arg6[%c0_14, %c0_15] : memref<32x32xf32, #tpu.memory_space<vmem>>, vector<32x32xf32>
    tpu.vector_store %arg6[%c0_14, %c0_15], %30 {strides = array<i32>} : memref<32x32xf32, #tpu.memory_space<vmem>>, vector<32x32xf32>,
    return
  }
  func.func @transform_0(%arg0: i32) -> (i32, i32) {
    %c0_i32 = arith.constant 0 : i32
    %c0_i32_0 = arith.constant 0 : i32
    return %arg0, %c0_i32 : i32, i32
  }
  func.func @transform_1(%arg0: i32) -> (i32, i32) {
    %c0_i32 = arith.constant 0 : i32
    %c0_i32_0 = arith.constant 0 : i32
    %c0_i32_1 = arith.constant 0 : i32
    return %c0_i32, %c0_i32_0 : i32, i32
  }
  func.func @transform_2(%arg0: i32) -> (i32, i32) {
    %c0_i32 = arith.constant 0 : i32
    %c0_i32_0 = arith.constant 0 : i32
    %c0_i32_1 = arith.constant 0 : i32
    return %c0_i32, %c0_i32_0 : i32, i32
  }
  func.func @transform_3(%arg0: i32) -> (i32, i32) {
    %c0_i32 = arith.constant 0 : i32
    %c0_i32_0 = arith.constant 0 : i32
    %c0_i32_1 = arith.constant 0 : i32
    return %c0_i32, %c0_i32_0 : i32, i32
  }
  func.func @transform_4(%arg0: i32) -> (i32, i32) {
    %c0_i32 = arith.constant 0 : i32
    %c0_i32_0 = arith.constant 0 : i32
    %c0_i32_1 = arith.constant 0 : i32
    return %c0_i32, %c0_i32_0 : i32, i32
  }
  func.func @transform_5(%arg0: i32) -> (i32, i32) {
    %c0_i32 = arith.constant 0 : i32
    %c0_i32_0 = arith.constant 0 : i32
    return %arg0, %c0_i32 : i32, i32
  }
}

</mosaic_0001>

<bundles_post_ra>
// kernel: cross_attention_forward.6
= control target key start
LH: loop header
LB: loop body
LE: loop exit
PB: predicated region body
PF: predicated region fallthrough
CT: control target
= control target key end

     0   :  { %vm23_vm0 = vcmask 261120   ;;  %s197_s0 = inlined_call_operand.vmem [shape: f32[32,32], index: 0, kind: input, shape index: {}]   ;;  %s198_s1 = inlined_call_operand.vmem [shape: f32[1,32], index: 1, kind: input, shape index: {}]   ;;  %s199_s2 = inlined_call_operand.vmem [shape: f32[1,32], index: 2, kind: input, shape index: {}]   ;;  %s200_s3 = inlined_call_operand.vmem [shape: f32[1,32], index: 3, kind: input, shape index: {}]   ;;  %s201_s4 = inlined_call_operand.vmem [shape: f32[32,32], index: 4, kind: output, shape index: {}]  }
   0x1   :  { %v17_v0 = vld [vmem:[%s197_s0] sm:$0xff]  ;;  %v19_v1 = vld [vmem:[%s197_s0 + $0x10] sm:$0xff]  ;;  %v18_v2 = vld [vmem:[%s197_s0 + $0x8] sm:$0xff] }
   0x2   :  { %v24_v3 = vsel %vm23_vm0, %v17_v0, 0.0  ;;  %v30_v4 = vsel %vm23_vm0, %v19_v1, 0.0  ;;  %v20_v5 = vld [vmem:[%s197_s0 + $0x18] sm:$0xff]  ;;  %v27_v6 = vsel %vm23_vm0, %v18_v2, 0.0  ;;  %v116_v41 = vld [vmem:[%s198_s1] ss:$0 sm:$0xff] }
   0x3   :  { %25 = vadd.xlane.f32.xlu0 %v24_v3  ;;  %31 = vadd.xlane.f32.xlu1 %v30_v4  ;;  %v33_v7 = vsel %vm23_vm0, %v20_v5, 0.0  ;;  %v117_v43 = vld [vmem:[%s199_s2] ss:$0 sm:$0xff] }
   0x4   :  { %v118_v46 = vld [vmem:[%s200_s3] ss:$0 sm:$0xff] }
   0x7   :  { %28 = vadd.xlane.f32.xlu0 %v27_v6  ;;  %34 = vadd.xlane.f32.xlu1 %v33_v7 }
  0x90   :  { %v26_v8 = vpop.xlane.xlu0 %25  ;;  %v32_v9 = vpop.xlane.xlu1 %31 }
  0x91   :  { %v37_v10 = vmul.f32 0.03125, %v26_v8  ;;  %v39_v11 = vmul.f32 0.03125, %v32_v9 }
  0x93   :  { %v41_v12 = vsub.f32 %v17_v0, %v37_v10  ;;  %v43_v13 = vsub.f32 %v19_v1, %v39_v11 }
  0x94   :  { %v29_v14 = vpop.xlane.xlu0 %28  ;;  %v35_v15 = vpop.xlane.xlu1 %34 }
  0x95   :  { %v38_v16 = vmul.f32 0.03125, %v29_v14  ;;  %v40_v17 = vmul.f32 0.03125, %v35_v15  ;;  %v45_v18 = vmul.f32 %v41_v12, %v41_v12  ;;  %v47_v19 = vmul.f32 %v43_v13, %v43_v13 }
  0x97   :  { %v42_v20 = vsub.f32 %v18_v2, %v38_v16  ;;  %v44_v21 = vsub.f32 %v20_v5, %v40_v17  ;;  %v49_v22 = vsel %vm23_vm0, %v45_v18, 0.0  ;;  %v55_v23 = vsel %vm23_vm0, %v47_v19, 0.0 }
  0x98   :  { %50 = vadd.xlane.f32.xlu0 %v49_v22 }
  0x99   :  { %v46_v24 = vmul.f32 %v42_v20, %v42_v20  ;;  %v48_v25 = vmul.f32 %v44_v21, %v44_v21 }
  0x9b   :  { %v52_v26 = vsel %vm23_vm0, %v46_v24, 0.0  ;;  %v58_v27 = vsel %vm23_vm0, %v48_v25, 0.0 }
  0x9c   :  { %56 = vadd.xlane.f32.xlu0 %v55_v23  ;;  %53 = vadd.xlane.f32.xlu1 %v52_v26 }
  0xa0   :  { %59 = vadd.xlane.f32.xlu1 %v58_v27 }
 0x125   :  { %v51_v28 = vpop.xlane.xlu0 %50 }
 0x126   :  { %v61_v29 = vmul.f32 0.03125, %v51_v28 }
 0x128   :  { %v65_v30 = vadd.f32 1e-05, %v61_v29 }
 0x129   :  { %v54_v31 = vpop.xlane.xlu1 %53  ;;  %v57_v32 = vpop.xlane.xlu0 %56 }
 0x12a   :  { %119 = vrsqrt.f32 %v65_v30  ;;  %v62_v33 = vmul.f32 0.03125, %v54_v31  ;;  %v63_v34 = vmul.f32 0.03125, %v57_v32 }
 0x12c   :  { %v66_v35 = vadd.f32 1e-05, %v62_v33  ;;  %v67_v36 = vadd.f32 1e-05, %v63_v34 }
 0x12d   :  { %v60_v37 = vpop.xlane.xlu1 %59 }
 0x12e   :  { %121 = vrsqrt.f32 %v66_v35  ;;  %v64_v38 = vmul.f32 0.03125, %v60_v37 }
 0x12f   :  { %123 = vrsqrt.f32 %v67_v36 }
 0x130   :  { %v68_v39 = vadd.f32 1e-05, %v64_v38 }
 0x132   :  { %125 = vrsqrt.f32 %v68_v39 }
 0x134   :  { %v120_v40 = vpop.eup %119 }
 0x135   :  { %v73_v42 = vmul.f32 %v120_v40, %v41_v12 }
 0x137   :  { %v83_v44 = vmul.f32 %v116_v41, %v73_v42 }
 0x138   :  { %v122_v45 = vpop.eup %121 }
 0x139   :  { %v124_v47 = vpop.eup %123  ;;  %v93_v48 = vadd.f32 %v117_v43, %v83_v44  ;;  %v74_v49 = vmul.f32 %v122_v45, %v42_v20 }
 0x13a   :  { %v75_v50 = vmul.f32 %v124_v47, %v43_v13 }
 0x13b   :  { %v104_v51 = vadd.f32 %v118_v46, %v93_v48  ;;  %v84_v52 = vmul.f32 %v116_v41, %v74_v49 }
 0x13c   :  { %v126_v53 = vpop.eup %125  ;;  %v85_v54 = vmul.f32 %v116_v41, %v75_v50 }
 0x13d   :  { %108 = vst.msk [vmem:[%s201_s4] sm:$0xff] %vm23_vm0, %v104_v51  ;;  %v94_v55 = vadd.f32 %v117_v43, %v84_v52  ;;  %v76_v56 = vmul.f32 %v126_v53, %v44_v21 }
 0x13e   :  { %v95_v57 = vadd.f32 %v117_v43, %v85_v54 }
 0x13f   :  { %v105_v58 = vadd.f32 %v118_v46, %v94_v55  ;;  %v86_v59 = vmul.f32 %v116_v41, %v76_v56 }
 0x140   :  { %v106_v60 = vadd.f32 %v118_v46, %v95_v57 }
 0x141   :  { %109 = vst.msk [vmem:[%s201_s4 + $0x8] sm:$0xff] %vm23_vm0, %v105_v58  ;;  %v96_v61 = vadd.f32 %v117_v43, %v86_v59 }
 0x142   :  { %110 = vst.msk [vmem:[%s201_s4 + $0x10] sm:$0xff] %vm23_vm0, %v106_v60 }
 0x143   :  { %v107_v62 = vadd.f32 %v118_v46, %v96_v61 }
 0x145   :  { %111 = vst.msk [vmem:[%s201_s4 + $0x18] sm:$0xff] %vm23_vm0, %v107_v62 }

// kernel: cross_attention_forward.8
= control target key start
LH: loop header
LB: loop body
LE: loop exit
PB: predicated region body
PF: predicated region fallthrough
CT: control target
= control target key end

     0   :  { %vm27_vm0 = vcmask 261120   ;;  %s657_s0 = inlined_call_operand.vmem [shape: f32[32,32], index: 0, kind: input, shape index: {}]   ;;  %s658_s3 = inlined_call_operand.vmem [shape: bf16[32,128], index: 3, kind: input, shape index: {}]   ;;  %s659_s1 = inlined_call_operand.vmem [shape: f32[1,32], index: 1, kind: input, shape index: {}]   ;;  %s660_s2 = inlined_call_operand.vmem [shape: f32[1,32], index: 2, kind: input, shape index: {}]   ;;  %s661_s4 = inlined_call_operand.vmem [shape: bf16[128,32], index: 4, kind: input, shape index: {}]   ;;  %s662_s5 = inlined_call_operand.vmem [shape: f32[32,32], index: 5, kind: output, shape index: {}]  }
   0x1   :  { %v534_v0 = vld [vmem:[%s657_s0] sm:$0xff]  ;;  %v539_v1 = vld [vmem:[%s657_s0 + $0x10] sm:$0xff]  ;;  %v544_v2 = vld [vmem:[%s657_s0 + $0x8] sm:$0xff] }
   0x2   :  { %v28_v3 = vsel %vm27_vm0, %v534_v0, 0.0  ;;  %v34_v4 = vsel %vm27_vm0, %v539_v1, 0.0  ;;  %v553_v5 = vld [vmem:[%s657_s0 + $0x18] sm:$0xff]  ;;  %v31_v6 = vsel %vm27_vm0, %v544_v2, 0.0  ;;  %v466_v28 = vld [vmem:[%s658_s3] sm:$0xff]   ;;  %v467_v29 = vld [vmem:[%s658_s3 + $0x8] sm:$0xff]  }
   0x3   :  { %29 = vadd.xlane.f32.xlu0 %v28_v3  ;;  %35 = vadd.xlane.f32.xlu1 %v34_v4  ;;  %v37_v7 = vsel %vm27_vm0, %v553_v5, 0.0  ;;  %v409_v44 = vld [vmem:[%s659_s1] ss:$0 sm:$0xff]  ;;  %v469_v63 = vld [vmem:[%s661_s4 + $0x8] sm:$0xff]   ;;  %v470_v3 = vld [vmem:[%s661_s4 + $0x10] sm:$0xff]  }
   0x4   :  { %437 = vmatprep.subr.bf16.mxu0 %v466_v28  ;;  %v410_v50 = vld [vmem:[%s660_s2] ss:$0 sm:$0xff]  ;;  %v471_v4 = vld [vmem:[%s661_s4 + $0x18] sm:$0xff]  }
   0x5   :  { %438 = vmatpush3.bf16.msra.mxu0 %v466_v28  ;;  %v468_v62 = vld [vmem:[%s661_s4] sm:$0xff]  }
   0x6   :  { %439 = vmatprep.subr.bf16.mxu0 %v467_v29  ;;  %445 = vmatprep.subr.bf16.mxu1 %v468_v62 }
   0x7   :  { %32 = vadd.xlane.f32.xlu0 %v31_v6  ;;  %38 = vadd.xlane.f32.xlu1 %v37_v7  ;;  %v472_v6 = vld [vmem:[%s661_s4 + $0x20] sm:$0xff]   ;;  %v473_v7 = vld [vmem:[%s661_s4 + $0x28] sm:$0xff]  }
   0x8   :  { %446 = vmatpush3.bf16.msra.mxu1 %v468_v62 }
   0x9   :  { %440 = vmatpush3.bf16.msra.mxu0 %v467_v29  ;;  %447 = vmatprep.subr.bf16.mxu1 %v469_v63 }
   0xc   :  { %448 = vmatpush3.bf16.msra.mxu1 %v469_v63 }
   0xd   :  { %449 = vmatprep.subr.bf16.mxu1 %v470_v3 }
  0x10   :  { %450 = vmatpush3.bf16.msra.mxu1 %v470_v3 }
  0x11   :  { %451 = vmatprep.subr.bf16.mxu1 %v471_v4 }
  0x14   :  { %452 = vmatpush3.bf16.msra.mxu1 %v471_v4 }
  0x15   :  { %453 = vmatprep.subr.bf16.mxu1 %v472_v6 }
  0x18   :  { %454 = vmatpush3.bf16.msra.mxu1 %v472_v6 }
  0x19   :  { %455 = vmatprep.subr.bf16.mxu1 %v473_v7 }
  0x1c   :  { %456 = vmatpush3.bf16.msra.mxu1 %v473_v7 }
  0x90   :  { %v30_v8 = vpop.xlane.xlu0 %29  ;;  %v36_v9 = vpop.xlane.xlu1 %35 }
  0x91   :  { %v41_v10 = vmul.f32 0.03125, %v30_v8  ;;  %v43_v11 = vmul.f32 0.03125, %v36_v9  ;;  %v474_v8 = vld [vmem:[%s661_s4 + $0x30] sm:$0xff]   ;;  %v475_v9 = vld [vmem:[%s661_s4 + $0x38] sm:$0xff]  }
  0x92   :  { %457 = vmatprep.subr.bf16.mxu1 %v474_v8 }
  0x93   :  { %v45_v12 = vsub.f32 %v534_v0, %v41_v10  ;;  %v47_v13 = vsub.f32 %v539_v1, %v43_v11  ;;  %458 = vmatpush3.bf16.msra.mxu1 %v474_v8 }
  0x94   :  { %v33_v14 = vpop.xlane.xlu0 %32  ;;  %v39_v15 = vpop.xlane.xlu1 %38  ;;  %459 = vmatprep.subr.bf16.mxu1 %v475_v9 }
  0x95   :  { %v42_v16 = vmul.f32 0.03125, %v33_v14  ;;  %v44_v17 = vmul.f32 0.03125, %v39_v15  ;;  %v49_v18 = vmul.f32 %v45_v12, %v45_v12  ;;  %v51_v19 = vmul.f32 %v47_v13, %v47_v13 }
  0x97   :  { %v46_v20 = vsub.f32 %v544_v2, %v42_v16  ;;  %v48_v21 = vsub.f32 %v553_v5, %v44_v17  ;;  %v53_v22 = vsel %vm27_vm0, %v49_v18, 0.0  ;;  %v59_v23 = vsel %vm27_vm0, %v51_v19, 0.0  ;;  %460 = vmatpush3.bf16.msra.mxu1 %v475_v9 }
  0x98   :  { %54 = vadd.xlane.f32.xlu0 %v53_v22 }
  0x99   :  { %v50_v24 = vmul.f32 %v46_v20, %v46_v20  ;;  %v52_v25 = vmul.f32 %v48_v21, %v48_v21 }
  0x9b   :  { %v56_v26 = vsel %vm27_vm0, %v50_v24, 0.0  ;;  %v62_v27 = vsel %vm27_vm0, %v52_v25, 0.0 }
  0x9c   :  { %60 = vadd.xlane.f32.xlu0 %v59_v23  ;;  %57 = vadd.xlane.f32.xlu1 %v56_v26 }
  0xa0   :  { %63 = vadd.xlane.f32.xlu1 %v62_v27 }
 0x125   :  { %v55_v30 = vpop.xlane.xlu0 %54 }
 0x126   :  { %v65_v31 = vmul.f32 0.03125, %v55_v30 }
 0x128   :  { %v69_v32 = vadd.f32 1e-05, %v65_v31 }
 0x129   :  { %v58_v33 = vpop.xlane.xlu1 %57  ;;  %v61_v34 = vpop.xlane.xlu0 %60 }
 0x12a   :  { %476 = vrsqrt.f32 %v69_v32  ;;  %v66_v35 = vmul.f32 0.03125, %v58_v33  ;;  %v67_v36 = vmul.f32 0.03125, %v61_v34 }
 0x12c   :  { %v70_v37 = vadd.f32 1e-05, %v66_v35  ;;  %v71_v38 = vadd.f32 1e-05, %v67_v36 }
 0x12d   :  { %v64_v39 = vpop.xlane.xlu1 %63 }
 0x12e   :  { %478 = vrsqrt.f32 %v70_v37  ;;  %v68_v40 = vmul.f32 0.03125, %v64_v39 }
 0x12f   :  { %480 = vrsqrt.f32 %v71_v38 }
 0x130   :  { %v72_v41 = vadd.f32 1e-05, %v68_v40 }
 0x132   :  { %482 = vrsqrt.f32 %v72_v41 }
 0x134   :  { %v477_v42 = vpop.eup %476 }
 0x135   :  { %v77_v43 = vmul.f32 %v477_v42, %v45_v12 }
 0x137   :  { %v87_v48 = vmul.f32 %v409_v44, %v77_v43 }
 0x138   :  { %v479_v45 = vpop.eup %478 }
 0x139   :  { %v481_v46 = vpop.eup %480  ;;  %v78_v47 = vmul.f32 %v479_v45, %v46_v20  ;;  %v97_v54 = vadd.f32 %v410_v50, %v87_v48 }
 0x13a   :  { %v79_v49 = vmul.f32 %v481_v46, %v47_v13 }
 0x13b   :  { %v88_v51 = vmul.f32 %v409_v44, %v78_v47 }
 0x13c   :  { %v483_v52 = vpop.eup %482  ;;  %v89_v56 = vmul.f32 %v409_v44, %v79_v49 }
 0x13d   :  { %v80_v53 = vmul.f32 %v483_v52, %v48_v21  ;;  %v98_v55 = vadd.f32 %v410_v50, %v88_v51 }
 0x13e   :  { %v99_v59 = vadd.f32 %v410_v50, %v89_v56 }
 0x13f   :  { %v101_v57 = vpack.c.bf16 %v98_v55, %v97_v54  ;;  %v90_v58 = vmul.f32 %v409_v44, %v80_v53 }
 0x141   :  { %441 = vmatprep.mubr.msk.bf16.mxu0 %vm27_vm0, %v101_v57  ;;  %v100_v60 = vadd.f32 %v410_v50, %v90_v58 }
 0x143   :  { %v102_v61 = vpack.c.bf16 %v100_v60, %v99_v59 }
 0x145   :  { %442 = vmatmul.mubr.msk.bf16.vlgmr.msra.gmra.mrb[0].mxu0 %vm27_vm0, %v102_v61 }
 0x218   :  { %v605_v10 = vpop.f32.mrb[0].mxu0 }
 0x219   :  { %v608_v11 = vmul.f32 0.70710677, %v605_v10  ;;  %v610_v12 = vpop.f32.mrb[1].mxu0 }
 0x21a   :  { %v613_v13 = vmul.f32 0.70710677, %v610_v12  ;;  %v615_v14 = vpop.f32.mrb[2].mxu0 }
 0x21b   :  { %v192_v15 = vand.u32 2147483647, %v608_v11  ;;  %v619_v16 = vmul.f32 0.70710677, %v615_v14  ;;  %v622_v18 = vpop.f32.mrb[3].mxu0  ;;  %vm184_vm1 = vcmp.ge.f32.partialorder %v608_v11, 0.0 }
 0x21c   :  { %v190_v17 = vand.u32 2147483647, %v613_v13  ;;  %v626_v23 = vmul.f32 0.70710677, %v622_v18  ;;  %vm182_vm2 = vcmp.ge.f32.partialorder %v613_v13, 0.0 }
 0x21d   :  { %v196_v19 = vmul.f32 0.3275911, %v192_v15  ;;  %v193_v21 = vand.u32 2147483647, %v619_v16  ;;  %v248_v30 = vsub.f32 0.0, %v192_v15  ;;  %vm185_vm3 = vcmp.ge.f32.partialorder %v619_v16, 0.0 }
 0x21e   :  { %v194_v20 = vmul.f32 0.3275911, %v190_v17  ;;  %v191_v26 = vand.u32 2147483647, %v626_v23  ;;  %v246_v31 = vsub.f32 0.0, %v190_v17  ;;  %vm183_vm4 = vcmp.ge.f32.partialorder %v626_v23, 0.0 }
 0x21f   :  { %v200_v22 = vadd.f32 1.0, %v196_v19  ;;  %v197_v25 = vmul.f32 0.3275911, %v193_v21  ;;  %v252_v33 = vmul.f32 %v248_v30, %v192_v15  ;;  %v249_v34 = vsub.f32 0.0, %v193_v21 }
 0x220   :  { %v198_v24 = vadd.f32 1.0, %v194_v20  ;;  %v195_v28 = vmul.f32 0.3275911, %v191_v26  ;;  %v250_v37 = vmul.f32 %v246_v31, %v190_v17  ;;  %v247_v38 = vsub.f32 0.0, %v191_v26 }
 0x221   :  { %484 = vrcp.f32 %v200_v22  ;;  %v201_v27 = vadd.f32 1.0, %v197_v25  ;;  %v258_v42 = vmul.f32 1.442695, %v252_v33  ;;  %v253_v43 = vmul.f32 %v249_v34, %v193_v21 }
 0x222   :  { %486 = vrcp.f32 %v198_v24  ;;  %v199_v29 = vadd.f32 1.0, %v195_v28  ;;  %v254_v46 = vmul.f32 1.442695, %v250_v37  ;;  %v251_v49 = vmul.f32 %v247_v38, %v191_v26 }
 0x223   :  { %488 = vrcp.f32 %v201_v27  ;;  %v260_v54 = vmul.f32 1.442695, %v253_v43  ;;  %v500_v37 = vmov -1.0   ;;  %v175_v23 = vmul.f32 0.5, %v622_v18 }
 0x224   :  { %490 = vrcp.f32 %v199_v29  ;;  %v256_v59 = vmul.f32 1.442695, %v251_v49  ;;  %v188_v38 = vsel %vm184_vm1, 1.0, %v500_v37  ;;  %v186_v11 = vsel %vm182_vm2, 1.0, %v500_v37 }
 0x225   :  { %492 = vpow2.f32 %v258_v42  ;;  %v176_v49 = vmul.f32 0.5, %v605_v10 }
 0x226   :  { %494 = vpow2.f32 %v254_v46  ;;  %v189_v46 = vsel %vm185_vm3, 1.0, %v500_v37 }
 0x227   :  { %496 = vpow2.f32 %v260_v54 }
 0x228   :  { %498 = vpow2.f32 %v256_v59 }
 0x22b   :  { %v485_v32 = vpop.eup %484 }
 0x22c   :  { %v487_v35 = vpop.eup %486  ;;  %v212_v36 = vmul.f32 1.0614054, %v485_v32 }
 0x22d   :  { %v210_v39 = vmul.f32 1.0614054, %v487_v35  ;;  %v489_v41 = vpop.eup %488 }
 0x22e   :  { %v216_v40 = vadd.f32 -1.4531521, %v212_v36  ;;  %v213_v47 = vmul.f32 1.0614054, %v489_v41  ;;  %v491_v48 = vpop.eup %490 }
 0x22f   :  { %v214_v44 = vadd.f32 -1.4531521, %v210_v39  ;;  %v211_v53 = vmul.f32 1.0614054, %v491_v48  ;;  %v493_v24 = vpop.eup %492 }
 0x230   :  { %v220_v45 = vmul.f32 %v485_v32, %v216_v40  ;;  %v217_v52 = vadd.f32 -1.4531521, %v213_v47  ;;  %v495_v26 = vpop.eup %494 }
 0x231   :  { %v218_v50 = vmul.f32 %v487_v35, %v214_v44  ;;  %v215_v58 = vadd.f32 -1.4531521, %v211_v53  ;;  %v497_v36 = vpop.eup %496 }
 0x232   :  { %v224_v51 = vadd.f32 1.4214138, %v220_v45  ;;  %v221_v57 = vmul.f32 %v489_v41, %v217_v52  ;;  %v499_v42 = vpop.eup %498 }
 0x233   :  { %v222_v55 = vadd.f32 1.4214138, %v218_v50  ;;  %v219_v63 = vmul.f32 %v491_v48, %v215_v58  ;;  %v187_v50 = vsel %vm183_vm4, 1.0, %v500_v37 }
 0x234   :  { %v228_v56 = vmul.f32 %v485_v32, %v224_v51  ;;  %v225_v62 = vadd.f32 1.4214138, %v221_v57  ;;  %v177_v51 = vmul.f32 0.5, %v615_v14 }
 0x235   :  { %v226_v60 = vmul.f32 %v487_v35, %v222_v55  ;;  %v223_v7 = vadd.f32 1.4214138, %v219_v63 }
 0x236   :  { %v232_v61 = vadd.f32 -0.28449672, %v228_v56  ;;  %v229_v6 = vmul.f32 %v489_v41, %v225_v62 }
 0x237   :  { %v230_v3 = vadd.f32 -0.28449672, %v226_v60  ;;  %v227_v17 = vmul.f32 %v491_v48, %v223_v7 }
 0x238   :  { %v236_v4 = vmul.f32 %v485_v32, %v232_v61  ;;  %v233_v15 = vadd.f32 -0.28449672, %v229_v6 }
 0x239   :  { %v234_v8 = vmul.f32 %v487_v35, %v230_v3  ;;  %v231_v22 = vadd.f32 -0.28449672, %v227_v17 }
 0x23a   :  { %v240_v9 = vadd.f32 0.2548296, %v236_v4  ;;  %v237_v21 = vmul.f32 %v489_v41, %v233_v15 }
 0x23b   :  { %v238_v19 = vadd.f32 0.2548296, %v234_v8  ;;  %v235_v29 = vmul.f32 %v491_v48, %v231_v22 }
 0x23c   :  { %v244_v20 = vmul.f32 %v485_v32, %v240_v9  ;;  %v241_v28 = vadd.f32 0.2548296, %v237_v21 }
 0x23d   :  { %v242_v25 = vmul.f32 %v487_v35, %v238_v19  ;;  %v239_v34 = vadd.f32 0.2548296, %v235_v29 }
 0x23e   :  { %v264_v27 = vmul.f32 %v493_v24, %v244_v20  ;;  %v245_v33 = vmul.f32 %v489_v41, %v241_v28 }
 0x23f   :  { %v262_v30 = vmul.f32 %v495_v26, %v242_v25  ;;  %v243_v40 = vmul.f32 %v491_v48, %v239_v34  ;;  %v174_v48 = vmul.f32 0.5, %v610_v12 }
 0x240   :  { %v268_v31 = vsub.f32 1.0, %v264_v27  ;;  %v265_v35 = vmul.f32 %v497_v36, %v245_v33 }
 0x241   :  { %v266_v32 = vsub.f32 1.0, %v262_v30  ;;  %v263_v44 = vmul.f32 %v499_v42, %v243_v40 }
 0x242   :  { %v272_v39 = vmul.f32 %v268_v31, %v188_v38  ;;  %v269_v43 = vsub.f32 1.0, %v265_v35 }
 0x243   :  { %v270_v45 = vmul.f32 %v266_v32, %v186_v11  ;;  %v267_v47 = vsub.f32 1.0, %v263_v44 }
 0x244   :  { %v276_v13 = vadd.f32 1.0, %v272_v39  ;;  %v273_v41 = vmul.f32 %v269_v43, %v189_v46 }
 0x245   :  { %v271_v16 = vmul.f32 %v267_v47, %v187_v50  ;;  %v274_v53 = vadd.f32 1.0, %v270_v45 }
 0x246   :  { %v277_v52 = vadd.f32 1.0, %v273_v41  ;;  %v280_v54 = vmul.f32 %v276_v13, %v176_v49 }
 0x247   :  { %v275_v56 = vadd.f32 1.0, %v271_v16  ;;  %v278_v57 = vmul.f32 %v274_v53, %v174_v48 }
 0x248   :  { %v281_v55 = vmul.f32 %v277_v52, %v177_v51 }
 0x249   :  { %v279_v58 = vmul.f32 %v275_v56, %v175_v23 }
 0x24a   :  { %v283_v59 = vpack.c.bf16 %v281_v55, %v280_v54 }
 0x24b   :  { %v282_v60 = vpack.c.bf16 %v279_v58, %v278_v57 }
 0x24d   :  { %461 = vmatprep.mubr.bf16.mxu1 %v282_v60 }
 0x24e   :  { %462 = vmatmul.mubr.bf16.vlgmr.msra.gmra.mrb[0].mxu1 %v283_v59 }
 0x321   :  { %v463_v10 = vpop.f32.mrb[0].mxu1 }
 0x322   :  { %v399_v61 = vadd.f32 %v463_v10, %v539_v1  ;;  %v382_v14 = vpop.f32.mrb[1].mxu1 }
 0x323   :  { %v397_v62 = vadd.f32 %v382_v14, %v534_v0  ;;  %v464_v63 = vpop.f32.mrb[2].mxu1 }
 0x324   :  { %403 = vst.msk [vmem:[%s662_s5 + $0x10] sm:$0xff] %vm27_vm0, %v399_v61  ;;  %v400_v12 = vadd.f32 %v464_v63, %v553_v5  ;;  %v385_v18 = vpop.f32.mrb[3].mxu1 }
 0x325   :  { %401 = vst.msk [vmem:[%s662_s5] sm:$0xff] %vm27_vm0, %v397_v62  ;;  %v398_v3 = vadd.f32 %v385_v18, %v544_v2 }
 0x326   :  { %404 = vst.msk [vmem:[%s662_s5 + $0x18] sm:$0xff] %vm27_vm0, %v400_v12 }
 0x327   :  { %402 = vst.msk [vmem:[%s662_s5 + $0x8] sm:$0xff] %vm27_vm0, %v398_v3 }

// kernel: cross_attention_forward.9
= control target key start
LH: loop header
LB: loop body
LE: loop exit
PB: predicated region body
PF: predicated region fallthrough
CT: control target
= control target key end

     0   :  { %s2944_s13 = smov 0   ;;  %s2946_s14 = smov 0   ;;  %s3434_s0 = inlined_call_operand.vmem [shape: f32[2,16,32], index: 0, kind: input, shape index: {}]   ;;  %s3435_s1 = inlined_call_operand.vmem [shape: f32[2,16,32], index: 1, kind: input, shape index: {}]   ;;  %s3436_s2 = inlined_call_operand.vmem [shape: f32[1,32], index: 2, kind: input, shape index: {}]   ;;  %s3437_s3 = inlined_call_operand.vmem [shape: f32[1,32], index: 3, kind: input, shape index: {}]   ;;  %s3438_s4 = inlined_call_operand.vmem [shape: f32[1,32], index: 4, kind: input, shape index: {}]   ;;  %s3439_s5 = inlined_call_operand.vmem [shape: f32[1,32], index: 5, kind: input, shape index: {}]   ;;  %s3440_s6 = inlined_call_operand.vmem [shape: bf16[1,32,512], index: 6, kind: input, shape index: {}]   ;;  %s3441_s7 = inlined_call_operand.vmem [shape: bf16[1,32,512], index: 7, kind: input, shape index: {}]   ;;  %s3442_s8 = inlined_call_operand.vmem [shape: bf16[1,32,512], index: 8, kind: input, shape index: {}]   ;;  %s3443_s9 = inlined_call_operand.vmem [shape: bf16[1,512,32], index: 9, kind: input, shape index: {}]   ;;  %s3444_s10 = inlined_call_operand.vmem [shape: f32[2,16,32], index: 10, kind: output, shape index: {}]  }
   0x1   :  { %s2948_s15 = smov 0  }
   0x2 LB: > { %s32_s16 = sadd.s32 1, %s2879_s14  ;;  %p2431_p0 = scmp.ge.s32.totalorder %s2883_s15, 1  ;;  %s2883_s15 = sphi %s2948_s15, %s20_s15   ;;  %s2879_s14 = sphi %s2946_s14, %s3446_s14   ;;  %s2875_s13 = sphi %s2944_s13, %s3445_s13  }
   0x3   : > { %p34_p1 = scmp.ge.s32.totalorder %s32_s16, 2  ;;  %p334_p2 = scmp.lt.s32.totalorder %s2883_s15, 3 }
   0x5   : > { %s3448_s16 = smov (%p34_p1, %s32_s16), 0  ;;  %p335_p3 = pnand %p2431_p0, %p334_p2 }
   0x6   : > { %p377_p4 = scmp.lt.s32.totalorder (!%p335_p3), %s2875_s13, 1  ;;  %vm401_vm0 = vcmask (!%p335_p3), 261120   ;;  %v2737_v28 = vld [vmem:[%s3441_s7 + $0x4] ss:$16 sps:$4 sm:$0xff] (!%p335_p3)   ;;  %v2996_v29 = vld [vmem:[%s3441_s7] ss:$16 sps:$4 sm:$0xff] (!%p335_p3)  }
   0x7   : > { %338 = sbr.rel (%p335_p3) target bundleno = 1477 (0x5c5), region = 60  ;;  %784 = vmatprep.subr.bf16.mxu0 (!%p335_p3), %v2737_v28  ;;  %v2740_v30 = vld [vmem:[%s3440_s6 + $0x4] ss:$16 sps:$4 sm:$0xff] (!%p335_p3)   ;;  %v2744_v32 = vld [vmem:[%s3440_s6] ss:$16 sps:$4 sm:$0xff] (!%p335_p3)   ;;  %v2885_v35 = vmov (!%p335_p3), 0  }
   0x8   : > { %785 = vmatpush1.bf16.msra.mxu0 (!%p335_p3), %v2996_v29  ;;  %v2742_v31 = vld [vmem:[%s3441_s7 + $0x24] ss:$16 sps:$4 sm:$0xff] (!%p335_p3)   ;;  %v3011_v33 = vld [vmem:[%s3441_s7 + $0x20] ss:$16 sps:$4 sm:$0xff] (!%p335_p3)   ;;  %643 = vmatprep.subr.bf16.mxu1 (!%p335_p3), %v2740_v30  ;;  %v2751_v37 = vld [vmem:[%s3440_s6 + $0xc] ss:$16 sps:$4 sm:$0xff] (!%p335_p3)  }
   0x9   : > { %786 = vmatprep.subr.bf16.mxu0 (!%p335_p3), %v2742_v31  ;;  %v2746_v34 = vld [vmem:[%s3440_s6 + $0x24] ss:$16 sps:$4 sm:$0xff] (!%p335_p3)   ;;  %644 = vmatpush1.bf16.msra.mxu1 (!%p335_p3), %v2744_v32  ;;  %v2748_v36 = vld [vmem:[%s3440_s6 + $0x20] ss:$16 sps:$4 sm:$0xff] (!%p335_p3)   ;;  %vm2887_vm1 = vmmov (!%p335_p3), 0   ;;  %vm1270_vm2 = vcmask (!%p335_p3), 130048  }
   0xa   : > { %816 = vmatprep.mubr.bf16.mxu0 (!%p335_p3), %v2885_v35  ;;  %645 = vmatprep.subr.bf16.mxu1 (!%p335_p3), %v2746_v34  ;;  %v2438_v52 = vld [vmem:[%s3436_s2] ss:$0 sm:$0xff] (!%p335_p3) }
   0xb   : > { %675 = vmatprep.mubr.bf16.mxu1 (!%p335_p3), %v2885_v35  ;;  %v2439_v57 = vld [vmem:[%s3437_s3] ss:$0 sm:$0xff] (!%p335_p3) }
   0xc   : > { %787 = vmatpush1.bf16.msra.mxu0 (!%p335_p3), %v3011_v33  ;;  %v2440_v58 = vld [vmem:[%s3438_s4] ss:$0 sm:$0xff] (!%p335_p3) }
   0xd   : > { %874 = vmatprep.subr.bf16.mxu0 (!%p335_p3), %v2737_v28  ;;  %646 = vmatpush1.bf16.msra.mxu1 (!%p335_p3), %v2748_v36 }
   0xe   : > { %s3450_s13 = smov (!%p377_p4, %s2875_s13), 1  ;;  %686 = vmatprep.subr.bf16.mxu1 %v2751_v37 }
   0xf   : > { %s2962_s17 = sshll.u32 %s3450_s13, 4 }
  0x10   : > { %s381_s20 = scalar_lea.vmem %s3434_s0, %s2962_s17  ;;  %s386_s23 = scalar_lea.vmem %s3435_s1, %s2962_s17 }
  0x11   : > { %v397_v0 = vld [vmem:[%s381_s20] sm:$0xff]  ;;  %v398_v1 = vld [vmem:[%s381_s20 + $0x8] sm:$0xff]  ;;  %s391_s18 = scalar_lea.vmem %s3444_s10, %s2962_s17 }
  0x12   : > { %v402_v2 = vsel %vm401_vm0, %v397_v0, 0.0  ;;  %v447_v3 = vld [vmem:[%s386_s23] sm:$0xff]  ;;  %v496_v4 = vld [vmem:[%s386_s23 + $0x8] sm:$0xff]  ;;  %v405_v6 = vsel %vm401_vm0, %v398_v1, 0.0 }
  0x13   : > { %403 = vadd.xlane.f32.xlu0 %v402_v2  ;;  %v451_v5 = vsel %vm401_vm0, %v447_v3, 0.0  ;;  %497 = vst.msk [vmem:[#allocation4] sm:$0xff] %vm401_vm0, %v447_v3  ;;  %498 = vst.msk [vmem:[#allocation4 + $0x8] sm:$0xff] %vm401_vm0, %v496_v4  ;;  %v454_v7 = vsel %vm401_vm0, %v496_v4, 0.0  ;;  %v2441_v2 = vld [vmem:[%s3439_s5] ss:$0 sm:$0xff] }
  0x14   : > { %452 = vadd.xlane.f32.xlu1 %v451_v5 }
  0x17   : > { %406 = vadd.xlane.f32.xlu0 %v405_v6 }
  0x18   : > { %455 = vadd.xlane.f32.xlu1 %v454_v7 }
  0xa0   : > { %v404_v8 = vpop.xlane.xlu0 %403 }
  0xa1   : > { %v409_v9 = vmul.f32 0.03125, %v404_v8  ;;  %v453_v10 = vpop.xlane.xlu1 %452 }
  0xa2   : > { %v457_v11 = vmul.f32 0.03125, %v453_v10  ;;  %v2754_v10 = vld [vmem:[%s3440_s6 + $0x2c] ss:$16 sps:$4 sm:$0xff]  }
  0xa3   : > { %v411_v12 = vsub.f32 %v397_v0, %v409_v9  ;;  %v2749_v9 = vld [vmem:[%s3440_s6 + $0x8] ss:$16 sps:$4 sm:$0xff]  }
  0xa4   : > { %v2978_v13 = vsub.f32 %v447_v3, %v457_v11  ;;  %v407_v14 = vpop.xlane.xlu0 %406  ;;  %v2757_v11 = vld [vmem:[%s3442_s8 + $0x4] ss:$16 sps:$4 sm:$0xff]  }
  0xa5   : > { %v410_v15 = vmul.f32 0.03125, %v407_v14  ;;  %v456_v16 = vpop.xlane.xlu1 %455  ;;  %v413_v17 = vmul.f32 %v411_v12, %v411_v12  ;;  %v2755_v14 = vld [vmem:[%s3442_s8] ss:$16 sps:$4 sm:$0xff]  }
  0xa6   : > { %v458_v18 = vmul.f32 0.03125, %v456_v16  ;;  %v461_v19 = vmul.f32 %v2978_v13, %v2978_v13  ;;  %v2763_v16 = vld [vmem:[%s3442_s8 + $0x24] ss:$16 sps:$4 sm:$0xff]  }
  0xa7   : > { %v412_v20 = vsub.f32 %v398_v1, %v410_v15  ;;  %v415_v21 = vsel %vm401_vm0, %v413_v17, 0.0  ;;  %v2760_v15 = vld [vmem:[%s3441_s7 + $0xc] ss:$16 sps:$4 sm:$0xff]   ;;  %v2758_v17 = vld [vmem:[%s3441_s7 + $0x8] ss:$16 sps:$4 sm:$0xff]  }
  0xa8   : > { %v2983_v22 = vsub.f32 %v496_v4, %v458_v18  ;;  %416 = vadd.xlane.f32.xlu0 %v415_v21  ;;  %v463_v23 = vsel %vm401_vm0, %v461_v19, 0.0  ;;  %v2761_v18 = vld [vmem:[%s3442_s8 + $0x20] ss:$16 sps:$4 sm:$0xff]   ;;  %v2766_v19 = vld [vmem:[%s3441_s7 + $0x2c] ss:$16 sps:$4 sm:$0xff]  }
  0xa9   : > { %v414_v24 = vmul.f32 %v412_v20, %v412_v20  ;;  %v2769_v21 = vld [vmem:[%s3442_s8 + $0xc] ss:$16 sps:$4 sm:$0xff]  }
  0xaa   : > { %v462_v25 = vmul.f32 %v2983_v22, %v2983_v22 }
  0xab   : > { %v418_v26 = vsel %vm401_vm0, %v414_v24, 0.0  ;;  %v2770_v24 = vld [vmem:[%s3442_s8 + $0x28] ss:$16 sps:$4 sm:$0xff]  }
  0xac   : > { %464 = vadd.xlane.f32.xlu0 %v463_v23  ;;  %419 = vadd.xlane.f32.xlu1 %v418_v26  ;;  %v466_v27 = vsel %vm401_vm0, %v462_v25, 0.0  ;;  %v2772_v23 = vld [vmem:[%s3442_s8 + $0x2c] ss:$16 sps:$4 sm:$0xff]   ;;  %v2886_v25 = vmov 0.0  }
  0xb0   : > { %467 = vadd.xlane.f32.xlu1 %v466_v27 }
 0x135   : > { %v417_v38 = vpop.xlane.xlu0 %416 }
 0x136   : > { %v421_v39 = vmul.f32 0.03125, %v417_v38 }
 0x138   : > { %v423_v40 = vadd.f32 1e-05, %v421_v39 }
 0x139   : > { %v420_v41 = vpop.xlane.xlu1 %419  ;;  %v465_v42 = vpop.xlane.xlu0 %464 }
 0x13a   : > { %2805 = vrsqrt.f32 %v423_v40  ;;  %v422_v43 = vmul.f32 0.03125, %v420_v41  ;;  %v469_v44 = vmul.f32 0.03125, %v465_v42 }
 0x13c   : > { %v424_v45 = vadd.f32 1e-05, %v422_v43  ;;  %v471_v46 = vadd.f32 1e-05, %v469_v44 }
 0x13d   : > { %v468_v47 = vpop.xlane.xlu1 %467 }
 0x13e   : > { %2807 = vrsqrt.f32 %v424_v45  ;;  %v470_v48 = vmul.f32 0.03125, %v468_v47 }
 0x13f   : > { %2809 = vrsqrt.f32 %v471_v46 }
 0x140   : > { %v472_v49 = vadd.f32 1e-05, %v470_v48 }
 0x142   : > { %2811 = vrsqrt.f32 %v472_v49 }
 0x144   : > { %v2806_v50 = vpop.eup %2805 }
 0x145   : > { %v427_v51 = vmul.f32 %v2806_v50, %v411_v12 }
 0x147   : > { %v435_v55 = vmul.f32 %v2438_v52, %v427_v51 }
 0x148   : > { %v2808_v53 = vpop.eup %2807 }
 0x149   : > { %v2810_v54 = vpop.eup %2809  ;;  %v428_v56 = vmul.f32 %v2808_v53, %v412_v20  ;;  %v443_v62 = vadd.f32 %v2439_v57, %v435_v55  ;;  %v2764_v20 = vld [vmem:[%s3441_s7 + $0x28] ss:$16 sps:$4 sm:$0xff]  }
 0x14a   : > { %v475_v59 = vmul.f32 %v2810_v54, %v2978_v13  ;;  %v2752_v13 = vld [vmem:[%s3440_s6 + $0x28] ss:$16 sps:$4 sm:$0xff]  }
 0x14b   : > { %v436_v60 = vmul.f32 %v2438_v52, %v428_v56 }
 0x14c   : > { %v2812_v61 = vpop.eup %2811  ;;  %v483_v0 = vmul.f32 %v2440_v58, %v475_v59 }
 0x14d   : > { %v444_v63 = vadd.f32 %v2439_v57, %v436_v60  ;;  %v476_v1 = vmul.f32 %v2812_v61, %v2983_v22  ;;  %v2767_v22 = vld [vmem:[%s3442_s8 + $0x8] ss:$16 sps:$4 sm:$0xff]  }
 0x14e   : > { %v491_v5 = vadd.f32 %v2441_v2, %v483_v0 }
 0x14f   : > { %v445_v3 = vpack.c.bf16 %v444_v63, %v443_v62  ;;  %v484_v4 = vmul.f32 %v2440_v58, %v476_v1 }
 0x151   : > { %446 = vst.msk [vmem:[#allocation2] sm:$0xff] %vm401_vm0, %v445_v3  ;;  %v492_v6 = vadd.f32 %v2441_v2, %v484_v4 }
 0x153   : > { %v493_v7 = vpack.c.bf16 %v492_v6, %v491_v5 }
 0x155   : > { %494 = vst.msk [vmem:[#allocation3] sm:$0xff] %vm401_vm0, %v493_v7 }
 0x158   : > { %v499_v8 = vld [vmem:[#allocation2] sm:$0xff] }
 0x159   : > { %2460 = vmatmul.mubr.msk.bf16.vlgmr.msra.gmra.mrb[0].mxu0 %vm401_vm0, %v499_v8 }
 0x15a   : > { %875 = vmatpush1.bf16.msra.mxu0 %v2996_v29  ;;  %906 = vmatprep.mubr.bf16.mxu0 %v2885_v35 }
 0x15b   : > { %876 = vmatprep.subr.bf16.mxu0 %v2742_v31 }
 0x15c   : > { %v500_v12 = vld [vmem:[#allocation3] sm:$0xff] }
 0x15d   : > { %2450 = vmatmul.mubr.msk.bf16.vlgmr.msra.gmra.mrb[0].mxu1 %vm401_vm0, %v500_v12 }
 0x15e   : > { %687 = vmatpush1.bf16.msra.mxu1 %v2749_v9  ;;  %877 = vmatpush1.bf16.msra.mxu0 %v3011_v33 }
 0x15f   : > { %688 = vmatprep.subr.bf16.mxu1 %v2754_v10  ;;  %1004 = vmatprep.subr.bf16.mxu0 %v2757_v11 }
 0x160   : > { %718 = vmatprep.mubr.bf16.mxu1 %v2885_v35 }
 0x161   : > { %2462 = vmatmul.mubr.msk.bf16.vlgmr.msra.gmra.mrb[4].mxu0 %vm401_vm0, %v500_v12 }
 0x162   : > { %689 = vmatpush1.bf16.msra.mxu1 %v2752_v13  ;;  %1005 = vmatpush1.bf16.msra.mxu0 %v2755_v14 }
 0x163   : > { %827 = vmatprep.subr.bf16.mxu1 %v2760_v15  ;;  %1006 = vmatprep.subr.bf16.mxu0 %v2763_v16 }
 0x164   : > { %1036 = vmatprep.mubr.bf16.mxu0 %v2885_v35 }
 0x165   : > { %2451 = vmatmul.mubr.msk.bf16.vlgmr.msra.gmra.mrb[4].mxu1 %vm401_vm0, %v500_v12 }
 0x166   : > { %828 = vmatpush1.bf16.msra.mxu1 %v2758_v17  ;;  %1007 = vmatpush1.bf16.msra.mxu0 %v2761_v18 }
 0x167   : > { %829 = vmatprep.subr.bf16.mxu1 %v2766_v19  ;;  %1094 = vmatprep.subr.bf16.mxu0 %v2757_v11 }
 0x168   : > { %859 = vmatprep.mubr.bf16.mxu1 %v2885_v35 }
 0x169   : > { %2472 = vmatmul.mubr.msk.bf16.vlgmr.msra.gmra.mrb[8].mxu0 %vm401_vm0, %v499_v8 }
 0x16a   : > { %830 = vmatpush1.bf16.msra.mxu1 %v2764_v20  ;;  %1095 = vmatpush1.bf16.msra.mxu0 %v2755_v14 }
 0x16b   : > { %917 = vmatprep.subr.bf16.mxu1 %v2760_v15  ;;  %1096 = vmatprep.subr.bf16.mxu0 %v2763_v16 }
 0x16c   : > { %1126 = vmatprep.mubr.bf16.mxu0 %v2885_v35 }
 0x16d   : > { %2461 = vmatmul.mubr.msk.bf16.vlgmr.msra.gmra.mrb[8].mxu1 %vm401_vm0, %v499_v8 }
 0x16e   : > { %918 = vmatpush1.bf16.msra.mxu1 %v2758_v17  ;;  %1097 = vmatpush1.bf16.msra.mxu0 %v2761_v18 }
 0x16f   : > { %919 = vmatprep.subr.bf16.mxu1 %v2766_v19  ;;  %949 = vmatprep.mubr.bf16.mxu1 %v2885_v35 }
 0x170   : > { %2597 = vmatprep.subr.bf16.mxu0 %v2886_v25 }
 0x171   : > { %2474 = vmatmul.mubr.msk.bf16.vlgmr.msra.gmra.mrb[12].mxu0 %vm401_vm0, %v500_v12 }
 0x172   : > { %920 = vmatpush1.bf16.msra.mxu1 %v2764_v20  ;;  %2599 = vmatprep.mubr.msk.bf16.mxu0 %vm2887_vm1, %v2886_v25 }
 0x173   : > { %1047 = vmatprep.subr.bf16.mxu1 %v2769_v21 }
 0x175   : > { %2463 = vmatmul.mubr.msk.bf16.vlgmr.msra.gmra.mrb[12].mxu1 %vm401_vm0, %v500_v12 }
 0x176   : > { %1048 = vmatpush1.bf16.msra.mxu1 %v2767_v22  ;;  %1079 = vmatprep.mubr.bf16.mxu1 %v2885_v35 }
 0x177   : > { %1049 = vmatprep.subr.bf16.mxu1 %v2772_v23 }
 0x17a   : > { %1050 = vmatpush1.bf16.msra.mxu1 %v2770_v24 }
 0x17b   : > { %1137 = vmatprep.subr.bf16.mxu1 %v2769_v21 }
 0x17d   : > { %2473 = vmatmul.mubr.msk.bf16.vlgmr.msra.gmra.mrb[16].mxu1 %vm401_vm0, %v499_v8 }
 0x17e   : > { %1138 = vmatpush1.bf16.msra.mxu1 %v2767_v22  ;;  %1169 = vmatprep.mubr.bf16.mxu1 %v2885_v35 }
 0x17f   : > { %1139 = vmatprep.subr.bf16.mxu1 %v2772_v23 }
 0x182   : > { %1140 = vmatpush1.bf16.msra.mxu1 %v2770_v24 }
 0x183   : > { %2603 = vmatprep.subr.bf16.mxu1 %v2886_v25 }
 0x185   : > { %2475 = vmatmul.mubr.msk.bf16.vlgmr.msra.gmra.mrb[20].mxu1 %vm401_vm0, %v500_v12 }
 0x186   : > { %2605 = vmatprep.mubr.msk.bf16.mxu1 %vm2887_vm1, %v2886_v25 }
 0x22c   : > { %v818_v26 = vpop.f32.mrb[0].mxu0 }
 0x22d   : > { %v820_v27 = vpop.f32.mrb[1].mxu0 }
 0x22e   : > { %v822_v28 = vpop.f32.mrb[2].mxu0 }
 0x22f   : > { %v870_v29 = vpack.c.bf16 %v822_v28, %v818_v26  ;;  %v824_v30 = vpop.f32.mrb[3].mxu0 }
 0x230   : > { %v871_v31 = vpack.c.bf16 %v824_v30, %v820_v27  ;;  %v677_v32 = vpop.f32.mrb[0].mxu1 }
 0x231   : > { %v679_v33 = vpop.f32.mrb[1].mxu1  ;;  %2598 = vmatpush3.bf16.xpose.msra.mxu0 %v870_v29  ;;  %v729_v35 = vmul.f32 0.35355338, %v677_v32 }
 0x232   : > { %v681_v34 = vpop.f32.mrb[2].mxu1  ;;  %2609 = vmatprep.subr.bf16.mxu0 %v2886_v25  ;;  %v730_v38 = vmul.f32 0.35355338, %v679_v33 }
 0x233   : > { %v733_v36 = vmul.f32 0.35355338, %v681_v34  ;;  %v683_v37 = vpop.f32.mrb[3].mxu1 }
 0x234   : > { %v734_v39 = vmul.f32 0.35355338, %v683_v37  ;;  %v908_v40 = vpop.f32.mrb[4].mxu0 }
 0x235   : > { %v737_v41 = vpack.c.bf16 %v733_v36, %v729_v35  ;;  %v910_v42 = vpop.f32.mrb[5].mxu0 }
 0x236   : > { %v738_v43 = vpack.c.bf16 %v734_v39, %v730_v38  ;;  %v912_v44 = vpop.f32.mrb[6].mxu0  ;;  %v2888_v39 = vmov -1e+30  }
 0x237   : > { %v960_v45 = vpack.c.bf16 %v912_v44, %v908_v40  ;;  %v914_v46 = vpop.f32.mrb[7].mxu0 }
 0x238   : > { %v961_v47 = vpack.c.bf16 %v914_v46, %v910_v42  ;;  %v720_v48 = vpop.f32.mrb[4].mxu1  ;;  %2600 = vmatmul.mubr.bf16.vlgmr.msra.gmra.mrb[16].mxu0 %v737_v41 }
 0x239   : > { %v722_v49 = vpop.f32.mrb[5].mxu1  ;;  %2604 = vmatpush3.bf16.xpose.msra.mxu1 %v960_v45  ;;  %2611 = vmatprep.mubr.msk.bf16.mxu0 %vm2887_vm1, %v2886_v25  ;;  %v731_v51 = vmul.f32 0.35355338, %v720_v48 }
 0x23a   : > { %v724_v50 = vpop.f32.mrb[6].mxu1  ;;  %2621 = vmatprep.subr.bf16.mxu1 %v2886_v25  ;;  %v732_v54 = vmul.f32 0.35355338, %v722_v49 }
 0x23b   : > { %v735_v52 = vmul.f32 0.35355338, %v724_v50  ;;  %v726_v53 = vpop.f32.mrb[7].mxu1 }
 0x23c   : > { %v736_v55 = vmul.f32 0.35355338, %v726_v53  ;;  %v3116_v56 = vpop.f32.mrb[8].mxu0 }
 0x23d   : > { %v739_v57 = vpack.c.bf16 %v735_v52, %v731_v51  ;;  %v3118_v58 = vpop.f32.mrb[9].mxu0 }
 0x23e   : > { %v740_v59 = vpack.c.bf16 %v736_v55, %v732_v54  ;;  %v3120_v60 = vpop.f32.mrb[10].mxu0 }
 0x23f   : > { %v1090_v61 = vpack.c.bf16 %v3120_v60, %v3116_v56  ;;  %v3124_v62 = vpop.f32.mrb[11].mxu0 }
 0x240   : > { %v1091_v63 = vpack.c.bf16 %v3124_v62, %v3118_v58  ;;  %v861_v0 = vpop.f32.mrb[8].mxu1  ;;  %2606 = vmatmul.mubr.bf16.vlgmr.msra.gmra.mrb[24].mxu1 %v737_v41 }
 0x241   : > { %v863_v1 = vpop.f32.mrb[9].mxu1  ;;  %2622 = vmatpush3.bf16.xpose.msra.mxu1 %v871_v31  ;;  %2623 = vmatprep.mubr.msk.bf16.mxu1 %vm2887_vm1, %v2886_v25  ;;  %v1184_v31 = vlaneseq }
 0x242   : > { %v865_v2 = vpop.f32.mrb[10].mxu1  ;;  %2627 = vmatprep.subr.bf16.mxu1 %v2886_v25 }
 0x243   : > { %v872_v3 = vpack.c.bf16 %v865_v2, %v861_v0  ;;  %v867_v4 = vpop.f32.mrb[11].mxu1  ;;  %v1185_v32 = vand.u32 127, %v1184_v31 }
 0x244   : > { %v873_v5 = vpack.c.bf16 %v867_v4, %v863_v1  ;;  %v1128_v6 = vpop.f32.mrb[12].mxu0 }
 0x245   : > { %v3131_v7 = vpop.f32.mrb[13].mxu0  ;;  %vm1186_vm3 = vcmp.lt.s32.totalorder %v1185_v32, 9 }
 0x246   : > { %v1132_v8 = vpop.f32.mrb[14].mxu0  ;;  %v1187_v40 = vsel %vm1186_vm3, 0.0, %v2888_v39 }
 0x247   : > { %v1180_v9 = vpack.c.bf16 %v1132_v8, %v1128_v6  ;;  %v3133_v10 = vpop.f32.mrb[15].mxu0 }
 0x248   : > { %v1181_v11 = vpack.c.bf16 %v3133_v10, %v3131_v7  ;;  %v951_v12 = vpop.f32.mrb[12].mxu1  ;;  %2624 = vmatmul.mubr.bf16.vlgmr.msra.gmra.mrb[28].mxu1 %v738_v43 }
 0x249   : > { %v953_v13 = vpop.f32.mrb[13].mxu1  ;;  %2610 = vmatpush3.bf16.msra.mxu0 %v1180_v9  ;;  %2628 = vmatpush3.bf16.xpose.msra.mxu1 %v961_v47 }
 0x24a   : > { %v955_v14 = vpop.f32.mrb[14].mxu1  ;;  %2629 = vmatprep.mubr.msk.bf16.mxu1 %vm2887_vm1, %v2886_v25  ;;  %2645 = vmatprep.subr.bf16.mxu1 %v2886_v25 }
 0x24b   : > { %v962_v15 = vpack.c.bf16 %v955_v14, %v951_v12  ;;  %v957_v16 = vpop.f32.mrb[15].mxu1  ;;  %2615 = vmatprep.subr.bf16.mxu0 %v2886_v25 }
 0x24c   : > { %v963_v17 = vpack.c.bf16 %v957_v16, %v953_v13 }
 0x250   : > { %v3141_v18 = vpop.f32.mrb[16].mxu1  ;;  %2630 = vmatmul.mubr.bf16.vlgmr.msra.gmra.mrb[32].mxu1 %v738_v43 }
 0x251   : > { %v3143_v19 = vpop.f32.mrb[17].mxu1  ;;  %2646 = vmatpush3.bf16.xpose.msra.mxu1 %v872_v3  ;;  %2647 = vmatprep.mubr.msk.bf16.mxu1 %vm2887_vm1, %v2886_v25 }
 0x252   : > { %v3147_v20 = vpop.f32.mrb[18].mxu1  ;;  %2651 = vmatprep.subr.bf16.mxu1 %v2886_v25 }
 0x253   : > { %v1092_v21 = vpack.c.bf16 %v3147_v20, %v3141_v18  ;;  %v3152_v22 = vpop.f32.mrb[19].mxu1 }
 0x254   : > { %v1093_v23 = vpack.c.bf16 %v3152_v22, %v3143_v19  ;;  %v2775_v19 = vld [vmem:[%s3443_s9 + $0x48] sm:$0xff]   ;;  %v2777_v22 = vld [vmem:[%s3443_s9 + $0x50] sm:$0xff]  }
 0x258   : > { %v3156_v24 = vpop.f32.mrb[20].mxu1  ;;  %2648 = vmatmul.mubr.bf16.vlgmr.msra.gmra.mrb[36].mxu1 %v739_v57 }
 0x259   : > { %v3158_v26 = vpop.f32.mrb[21].mxu1  ;;  %2652 = vmatpush3.bf16.xpose.msra.mxu1 %v962_v15  ;;  %2653 = vmatprep.mubr.msk.bf16.mxu1 %vm2887_vm1, %v2886_v25 }
 0x25a   : > { %v3162_v27 = vpop.f32.mrb[22].mxu1  ;;  %2669 = vmatprep.subr.bf16.mxu1 %v2886_v25 }
 0x25b   : > { %v1182_v28 = vpack.c.bf16 %v3162_v27, %v3156_v24  ;;  %v3167_v29 = vpop.f32.mrb[23].mxu1 }
 0x25c   : > { %v1183_v30 = vpack.c.bf16 %v3167_v29, %v3158_v26  ;;  %v2773_v26 = vld [vmem:[%s3443_s9 + $0x40] sm:$0xff]  }
 0x25d   : > { %v2774_v29 = vld [vmem:[%s3443_s9] sm:$0xff]  }
 0x260   : > { %2654 = vmatmul.mubr.bf16.vlgmr.msra.gmra.mrb[40].mxu1 %v739_v57 }
 0x261   : > { %2670 = vmatpush3.bf16.xpose.msra.mxu1 %v873_v5  ;;  %2671 = vmatprep.mubr.msk.bf16.mxu1 %vm2887_vm1, %v2886_v25 }
 0x262   : > { %2675 = vmatprep.subr.bf16.mxu1 %v2886_v25 }
 0x268   : > { %2672 = vmatmul.mubr.bf16.vlgmr.msra.gmra.mrb[44].mxu1 %v740_v59 }
 0x269   : > { %2676 = vmatpush3.bf16.xpose.msra.mxu1 %v963_v17  ;;  %2677 = vmatprep.mubr.msk.bf16.mxu1 %vm2887_vm1, %v2886_v25 }
 0x26a   : > { %2553 = vmatprep.subr.bf16.mxu1 %v2773_v26 }
 0x270   : > { %2678 = vmatmul.mubr.bf16.vlgmr.msra.gmra.mrb[48].mxu1 %v740_v59 }
 0x271   : > { %2554 = vmatpush3.bf16.msra.mxu1 %v2774_v29 }
 0x272   : > { %2555 = vmatprep.subr.bf16.mxu1 %v2775_v19 }
 0x30b   : > { %v3176_v33 = vpop.f32.mrb[16].mxu0 }
 0x30c   : > { %v2601_v34 = vpop.f32.mrb[17].mxu0  ;;  %v1271_v35 = vsel %vm1270_vm2, %v3176_v33, -inf }
 0x30d   : > { %1272 = vmax.xlane.f32.xlu0 %v1271_v35  ;;  %v3180_v36 = vpop.f32.mrb[18].mxu0 }
 0x30e   : > { %v2602_v37 = vpop.f32.mrb[19].mxu0  ;;  %v1274_v38 = vsel %vm1270_vm2, %v3180_v36, -inf }
 0x30f   : > { %1275 = vmax.xlane.f32.xlu1 %v1274_v38 }
 0x313   : > { %v1263_v41 = vpop.f32.mrb[24].mxu1 }
 0x314   : > { %v3184_v42 = vadd.f32 %v1263_v41, %v1187_v40  ;;  %v2607_v43 = vpop.f32.mrb[25].mxu1 }
 0x315   : > { %v1266_v44 = vpop.f32.mrb[26].mxu1 }
 0x316   : > { %v3186_v45 = vadd.f32 %v1266_v44, %v1187_v40  ;;  %v2608_v46 = vpop.f32.mrb[27].mxu1  ;;  %v1277_v47 = vsel %vm1270_vm2, %v3184_v42, -inf }
 0x317   : > { %1278 = vmax.xlane.f32.xlu0 %v1277_v47 }
 0x318   : > { %v1280_v48 = vsel %vm1270_vm2, %v3186_v45, -inf }
 0x319   : > { %1281 = vmax.xlane.f32.xlu1 %v1280_v48 }
 0x31b   : > { %v3192_v49 = vpop.f32.mrb[28].mxu1 }
 0x31c   : > { %v2625_v50 = vpop.f32.mrb[29].mxu1  ;;  %v1488_v51 = vsel %vm1270_vm2, %v3192_v49, -inf }
 0x31d   : > { %1489 = vmax.xlane.f32.xlu0 %v1488_v51  ;;  %v3196_v52 = vpop.f32.mrb[30].mxu1 }
 0x31e   : > { %v2626_v53 = vpop.f32.mrb[31].mxu1  ;;  %v1491_v54 = vsel %vm1270_vm2, %v3196_v52, -inf }
 0x31f   : > { %1492 = vmax.xlane.f32.xlu1 %v1491_v54 }
 0x323   : > { %v1481_v55 = vpop.f32.mrb[32].mxu1 }
 0x324   : > { %v3200_v57 = vadd.f32 %v1481_v55, %v1187_v40  ;;  %v2631_v59 = vpop.f32.mrb[33].mxu1 }
 0x325   : > { %v1484_v0 = vpop.f32.mrb[34].mxu1 }
 0x326   : > { %v3202_v1 = vadd.f32 %v1484_v0, %v1187_v40  ;;  %v2632_v2 = vpop.f32.mrb[35].mxu1  ;;  %v1494_v3 = vsel %vm1270_vm2, %v3200_v57, -inf }
 0x327   : > { %1495 = vmax.xlane.f32.xlu0 %v1494_v3 }
 0x328   : > { %v1497_v4 = vsel %vm1270_vm2, %v3202_v1, -inf }
 0x329   : > { %1498 = vmax.xlane.f32.xlu1 %v1497_v4 }
 0x32b   : > { %v3208_v5 = vpop.f32.mrb[36].mxu1 }
 0x32c   : > { %v2649_v6 = vpop.f32.mrb[37].mxu1  ;;  %v1705_v8 = vsel %vm1270_vm2, %v3208_v5, -inf }
 0x32d   : > { %1706 = vmax.xlane.f32.xlu0 %v1705_v8  ;;  %v3212_v9 = vpop.f32.mrb[38].mxu1 }
 0x32e   : > { %v2650_v12 = vpop.f32.mrb[39].mxu1  ;;  %v1708_v13 = vsel %vm1270_vm2, %v3212_v9, -inf }
 0x32f   : > { %1709 = vmax.xlane.f32.xlu1 %v1708_v13 }
 0x333   : > { %v1698_v14 = vpop.f32.mrb[40].mxu1 }
 0x334   : > { %v3216_v15 = vadd.f32 %v1698_v14, %v1187_v40  ;;  %v2655_v16 = vpop.f32.mrb[41].mxu1 }
 0x335   : > { %v1701_v17 = vpop.f32.mrb[42].mxu1 }
 0x336   : > { %v3218_v31 = vadd.f32 %v1701_v17, %v1187_v40  ;;  %v2656_v32 = vpop.f32.mrb[43].mxu1  ;;  %v1711_v34 = vsel %vm1270_vm2, %v3216_v15, -inf }
 0x337   : > { %1712 = vmax.xlane.f32.xlu0 %v1711_v34 }
 0x338   : > { %v1714_v35 = vsel %vm1270_vm2, %v3218_v31, -inf }
 0x339   : > { %1715 = vmax.xlane.f32.xlu1 %v1714_v35 }
 0x33b   : > { %v3224_v37 = vpop.f32.mrb[44].mxu1 }
 0x33c   : > { %v2673_v38 = vpop.f32.mrb[45].mxu1  ;;  %v1922_v39 = vsel %vm1270_vm2, %v3224_v37, -inf }
 0x33d   : > { %1923 = vmax.xlane.f32.xlu0 %v1922_v39  ;;  %v3228_v41 = vpop.f32.mrb[46].mxu1 }
 0x33e   : > { %v2674_v43 = vpop.f32.mrb[47].mxu1  ;;  %v1925_v44 = vsel %vm1270_vm2, %v3228_v41, -inf }
 0x33f   : > { %1926 = vmax.xlane.f32.xlu1 %v1925_v44 }
 0x343   : > { %v1915_v46 = vpop.f32.mrb[48].mxu1 }
 0x344   : > { %v3232_v47 = vadd.f32 %v1915_v46, %v1187_v40  ;;  %v2679_v48 = vpop.f32.mrb[49].mxu1 }
 0x345   : > { %v1918_v50 = vpop.f32.mrb[50].mxu1 }
 0x346   : > { %v3234_v51 = vadd.f32 %v1918_v50, %v1187_v40  ;;  %v2680_v53 = vpop.f32.mrb[51].mxu1  ;;  %v1928_v54 = vsel %vm1270_vm2, %v3232_v47, -inf }
 0x347   : > { %1929 = vmax.xlane.f32.xlu0 %v1928_v54 }
 0x348   : > { %v1931_v55 = vsel %vm1270_vm2, %v3234_v51, -inf }
 0x349   : > { %1932 = vmax.xlane.f32.xlu1 %v1931_v55 }
 0x39a   : > { %v1273_v59 = vpop.xlane.xlu0 %1272 }
 0x39c   : > { %v1276_v0 = vpop.xlane.xlu1 %1275 }
 0x3a4   : > { %v1279_v2 = vpop.xlane.xlu0 %1278 }
 0x3a5   : > { %v1283_v3 = vmax.f32 %v1273_v59, %v1279_v2 }
 0x3a6   : > { %v1282_v4 = vpop.xlane.xlu1 %1281 }
 0x3a7   : > { %v1285_v6 = vsub.f32 %v3176_v33, %v1283_v3  ;;  %v1291_v8 = vsub.f32 %v3184_v42, %v1283_v3  ;;  %v1284_v40 = vmax.f32 %v1276_v0, %v1282_v4 }
 0x3a9   : > { %v1287_v12 = vmul.f32 1.442695, %v1285_v6  ;;  %v1293_v13 = vmul.f32 1.442695, %v1291_v8  ;;  %v1286_v14 = vsub.f32 %v3180_v36, %v1284_v40  ;;  %v1292_v16 = vsub.f32 %v3186_v45, %v1284_v40 }
 0x3aa   : > { %v1490_v34 = vpop.xlane.xlu0 %1489 }
 0x3ab   : > { %2813 = vpow2.f32 %v1287_v12  ;;  %v1289_v17 = vmul.f32 1.442695, %v1286_v14  ;;  %v1295_v32 = vmul.f32 1.442695, %v1292_v16 }
 0x3ac   : > { %2815 = vpow2.f32 %v1293_v13  ;;  %v1493_v35 = vpop.xlane.xlu1 %1492 }
 0x3ad   : > { %2817 = vpow2.f32 %v1289_v17 }
 0x3ae   : > { %2819 = vpow2.f32 %v1295_v32 }
 0x3b4   : > { %v1496_v38 = vpop.xlane.xlu0 %1495 }
 0x3b5   : > { %v2814_v39 = vpop.eup %2813  ;;  %v1500_v33 = vmax.f32 %v1490_v34, %v1496_v38 }
 0x3b6   : > { %v2816_v43 = vpop.eup %2815  ;;  %v1499_v42 = vpop.xlane.xlu1 %1498  ;;  %v1297_v44 = vsel %vm1270_vm2, %v2814_v39, 0.0 }
 0x3b7   : > { %v2818_v46 = vpop.eup %2817  ;;  %v1502_v36 = vsub.f32 %v3192_v49, %v1500_v33  ;;  %v1508_v45 = vsub.f32 %v3200_v57, %v1500_v33  ;;  %v1501_v48 = vmax.f32 %v1493_v35, %v1499_v42  ;;  %1298 = vadd.xlane.f32.xlu0 %v1297_v44  ;;  %v1303_v4 = vsel %vm1270_vm2, %v2816_v43, 0.0 }
 0x3b8   : > { %v2820_v50 = vpop.eup %2819  ;;  %v1300_v53 = vsel %vm1270_vm2, %v2818_v46, 0.0  ;;  %v1311_v54 = vpack.c.bf16 %v2818_v46, %v2814_v39 }
 0x3b9   : > { %v1504_v55 = vmul.f32 1.442695, %v1502_v36  ;;  %v1510_v59 = vmul.f32 1.442695, %v1508_v45  ;;  %v1503_v0 = vsub.f32 %v3196_v52, %v1501_v48  ;;  %v1509_v2 = vsub.f32 %v3202_v1, %v1501_v48  ;;  %1301 = vadd.xlane.f32.xlu1 %v1300_v53 }
 0x3ba   : > { %v1312_v3 = vpack.c.bf16 %v2820_v50, %v2816_v43  ;;  %v1306_v57 = vsel %vm1270_vm2, %v2820_v50, 0.0  ;;  %v1707_v52 = vpop.xlane.xlu0 %1706 }
 0x3bb   : > { %2821 = vpow2.f32 %v1504_v55  ;;  %v1506_v49 = vmul.f32 1.442695, %v1503_v0  ;;  %v1512_v6 = vmul.f32 1.442695, %v1509_v2  ;;  %1304 = vadd.xlane.f32.xlu0 %v1303_v4 }
 0x3bc   : > { %2823 = vpow2.f32 %v1510_v59  ;;  %2612 = vmatmul.mubr.msk.bf16.vlgmr.msra.gmra.mrb[20].mxu0 %vm1270_vm2, %v1312_v3  ;;  %v1710_v1 = vpop.xlane.xlu1 %1709 }
 0x3bd   : > { %2825 = vpow2.f32 %v1506_v49  ;;  %2616 = vmatpush3.bf16.msra.mxu0 %v1090_v61  ;;  %1307 = vadd.xlane.f32.xlu1 %v1306_v57 }
 0x3be   : > { %2617 = vmatprep.mubr.msk.bf16.mxu0 %vm2887_vm1, %v2886_v25  ;;  %2633 = vmatprep.subr.bf16.mxu0 %v2886_v25  ;;  %2827 = vpow2.f32 %v1512_v6 }
 0x3c4   : > { %v1713_v8 = vpop.xlane.xlu0 %1712 }
 0x3c5   : > { %v2822_v40 = vpop.eup %2821  ;;  %v1717_v12 = vmax.f32 %v1707_v52, %v1713_v8  ;;  %v2781_v8 = vld [vmem:[%s3443_s9 + $0x60] sm:$0xff]  }
 0x3c6   : > { %v2824_v13 = vpop.eup %2823  ;;  %v1716_v14 = vpop.xlane.xlu1 %1715  ;;  %v1514_v16 = vsel %vm1270_vm2, %v2822_v40, 0.0 }
 0x3c7   : > { %v2826_v17 = vpop.eup %2825  ;;  %v1719_v56 = vsub.f32 %v3208_v5, %v1717_v12  ;;  %v1718_v60 = vmax.f32 %v1710_v1, %v1716_v14  ;;  %1515 = vadd.xlane.f32.xlu0 %v1514_v16  ;;  %v1520_v39 = vsel %vm1270_vm2, %v2824_v13, 0.0  ;;  %v1725_v10 = vsub.f32 %v3216_v15, %v1717_v12  ;;  %v2780_v1 = vld [vmem:[%s3443_s9 + $0x18] sm:$0xff]   ;;  %v2783_v12 = vld [vmem:[%s3443_s9 + $0x68] sm:$0xff]   ;;  %v2785_v14 = vld [vmem:[%s3443_s9 + $0x70] sm:$0xff]  }
 0x3c8   : > { %2618 = vmatmul.mubr.msk.bf16.vlgmr.msra.gmra.mrb[20].mxu0 %vm1270_vm2, %v1311_v54  ;;  %v1517_v61 = vsel %vm1270_vm2, %v2826_v17, 0.0  ;;  %v1528_v32 = vpack.c.bf16 %v2826_v17, %v2822_v40  ;;  %v2828_v34 = vpop.eup %2827  ;;  %v2782_v40 = vld [vmem:[%s3443_s9 + $0x20] sm:$0xff]   ;;  %v2786_v16 = vld [vmem:[%s3443_s9 + $0x30] sm:$0xff]   ;;  %v2787_v17 = vld [vmem:[%s3443_s9 + $0x78] sm:$0xff]  }
 0x3c9   : > { %v1721_v35 = vmul.f32 1.442695, %v1719_v56  ;;  %2634 = vmatpush3.bf16.msra.mxu0 %v1181_v11  ;;  %v1720_v38 = vsub.f32 %v3212_v9, %v1718_v60  ;;  %1518 = vadd.xlane.f32.xlu1 %v1517_v61  ;;  %v1523_v33 = vsel %vm1270_vm2, %v2828_v34, 0.0  ;;  %v1726_v43 = vsub.f32 %v3218_v31, %v1718_v60  ;;  %v2788_v56 = vld [vmem:[%s3443_s9 + $0x38] sm:$0xff]   ;;  %v2789_v60 = vld [vmem:[%s3443_s9 + $0xc0] sm:$0xff]  }
 0x3ca   : > { %2635 = vmatprep.mubr.msk.bf16.mxu0 %vm2887_vm1, %v2886_v25  ;;  %2639 = vmatprep.subr.bf16.mxu0 %v2886_v25  ;;  %v1529_v7 = vpack.c.bf16 %v2828_v34, %v2824_v13  ;;  %v1924_v11 = vpop.xlane.xlu0 %1923  ;;  %v1727_v44 = vmul.f32 1.442695, %v1725_v10  ;;  %v2784_v13 = vld [vmem:[%s3443_s9 + $0x28] sm:$0xff]   ;;  %v2790_v61 = vld [vmem:[%s3443_s9 + $0x80] sm:$0xff]  }
 0x3cb   : > { %2829 = vpow2.f32 %v1721_v35  ;;  %v1723_v5 = vmul.f32 1.442695, %v1720_v38  ;;  %1521 = vadd.xlane.f32.xlu0 %v1520_v39  ;;  %v1729_v9 = vmul.f32 1.442695, %v1726_v43  ;;  %v2792_v34 = vld [vmem:[%s3443_s9 + $0x88] sm:$0xff]   ;;  %v2793_v35 = vld [vmem:[%s3443_s9 + $0xd0] sm:$0xff]  }
 0x3cc   : > { %v1927_v42 = vpop.xlane.xlu1 %1926  ;;  %v2794_v38 = vld [vmem:[%s3443_s9 + $0x90] sm:$0xff]   ;;  %v2795_v39 = vld [vmem:[%s3443_s9 + $0xd8] sm:$0xff]   ;;  %v2798_v43 = vld [vmem:[%s3443_s9 + $0xa0] sm:$0xff]  }
 0x3cd   : > { %2831 = vpow2.f32 %v1723_v5  ;;  %1524 = vadd.xlane.f32.xlu1 %v1523_v33  ;;  %v2796_v5 = vld [vmem:[%s3443_s9 + $0x98] sm:$0xff]   ;;  %v2797_v33 = vld [vmem:[%s3443_s9 + $0xe0] sm:$0xff]   ;;  %v2800_v10 = vld [vmem:[%s3443_s9 + $0xa8] sm:$0xff]  }
 0x3ce   : > { %2833 = vpow2.f32 %v1729_v9  ;;  %v2802_v9 = vld [vmem:[%s3443_s9 + $0xb0] sm:$0xff]  }
 0x3cf   : > { %2835 = vpow2.f32 %v1727_v44  ;;  %v2804_v44 = vld [vmem:[%s3443_s9 + $0xb8] sm:$0xff]  }
 0x3d0   : > { %2636 = vmatmul.mubr.msk.bf16.vlgmr.msra.gmra.mrb[24].mxu0 %vm1270_vm2, %v1529_v7  ;;  %v2799_v7 = vld [vmem:[%s3443_s9 + $0xe8] sm:$0xff]  }
 0x3d1   : > { %2640 = vmatpush3.bf16.msra.mxu0 %v1091_v63  ;;  %2641 = vmatprep.mubr.msk.bf16.mxu0 %vm2887_vm1, %v2886_v25 }
 0x3d2   : > { %2657 = vmatprep.subr.bf16.mxu0 %v2886_v25 }
 0x3d4   : > { %v1930_v31 = vpop.xlane.xlu0 %1929 }
 0x3d5   : > { %v2830_v46 = vpop.eup %2829  ;;  %v1934_v36 = vmax.f32 %v1924_v11, %v1930_v31  ;;  %v2801_v11 = vld [vmem:[%s3443_s9 + $0xf0] sm:$0xff]  }
 0x3d6   : > { %v1933_v15 = vpop.xlane.xlu1 %1932  ;;  %v1731_v45 = vsel %vm1270_vm2, %v2830_v46, 0.0 }
 0x3d7   : > { %v2832_v48 = vpop.eup %2831  ;;  %v1936_v50 = vsub.f32 %v3224_v37, %v1934_v36  ;;  %v1942_v58 = vsub.f32 %v3232_v47, %v1934_v36  ;;  %v1935_v62 = vmax.f32 %v1927_v42, %v1933_v15  ;;  %1732 = vadd.xlane.f32.xlu0 %v1731_v45  ;;  %v2803_v42 = vld [vmem:[%s3443_s9 + $0xf8] sm:$0xff]  }
 0x3d8   : > { %v1734_v63 = vsel %vm1270_vm2, %v2832_v48, 0.0  ;;  %v1745_v53 = vpack.c.bf16 %v2832_v48, %v2830_v46  ;;  %v2834_v37 = vpop.eup %2833 }
 0x3d9   : > { %v1938_v54 = vmul.f32 1.442695, %v1936_v50  ;;  %v1944_v55 = vmul.f32 1.442695, %v1942_v58  ;;  %v1937_v59 = vsub.f32 %v3228_v41, %v1935_v62  ;;  %v1943_v0 = vsub.f32 %v3234_v51, %v1935_v62  ;;  %1735 = vadd.xlane.f32.xlu1 %v1734_v63  ;;  %v2836_v41 = vpop.eup %2835 }
 0x3da   : > { %v1746_v47 = vpack.c.bf16 %v2834_v37, %v2836_v41  ;;  %v1737_v20 = vsel %vm1270_vm2, %v2836_v41, 0.0 }
 0x3db   : > { %2837 = vpow2.f32 %v1938_v54  ;;  %v1940_v2 = vmul.f32 1.442695, %v1937_v59  ;;  %v1946_v3 = vmul.f32 1.442695, %v1943_v0 }
 0x3dc   : > { %2839 = vpow2.f32 %v1944_v55  ;;  %2642 = vmatmul.mubr.msk.bf16.vlgmr.msra.gmra.mrb[24].mxu0 %vm1270_vm2, %v1528_v32  ;;  %v2791_v32 = vld [vmem:[%s3443_s9 + $0xc8] sm:$0xff]  }
 0x3dd   : > { %2841 = vpow2.f32 %v1940_v2  ;;  %2658 = vmatpush3.bf16.msra.mxu0 %v1182_v28  ;;  %2659 = vmatprep.mubr.msk.bf16.mxu0 %vm2887_vm1, %v2886_v25 }
 0x3de   : > { %2663 = vmatprep.subr.bf16.mxu0 %v2886_v25  ;;  %2843 = vpow2.f32 %v1946_v3 }
 0x3e4   : > { %2660 = vmatmul.mubr.msk.bf16.vlgmr.msra.gmra.mrb[28].mxu0 %vm1270_vm2, %v1746_v47 }
 0x3e5   : > { %v2838_v51 = vpop.eup %2837  ;;  %2664 = vmatpush3.bf16.msra.mxu0 %v1092_v21  ;;  %2665 = vmatprep.mubr.msk.bf16.mxu0 %vm2887_vm1, %v2886_v25  ;;  %v1740_v21 = vsel %vm1270_vm2, %v2834_v37, 0.0 }
 0x3e6   : > { %v2840_v24 = vpop.eup %2839  ;;  %v1948_v27 = vsel %vm1270_vm2, %v2838_v51, 0.0  ;;  %2681 = vmatprep.subr.bf16.mxu0 %v2886_v25 }
 0x3e7   : > { %v2842_v28 = vpop.eup %2841  ;;  %1949 = vadd.xlane.f32.xlu0 %v1948_v27  ;;  %v1954_v57 = vsel %vm1270_vm2, %v2840_v24, 0.0 }
 0x3e8   : > { %v1951_v4 = vsel %vm1270_vm2, %v2842_v28, 0.0  ;;  %v1962_v49 = vpack.c.bf16 %v2842_v28, %v2838_v51  ;;  %v2844_v6 = vpop.eup %2843 }
 0x3e9   : > { %1952 = vadd.xlane.f32.xlu1 %v1951_v4  ;;  %v1957_v18 = vsel %vm1270_vm2, %v2844_v6, 0.0  ;;  %v1963_v52 = vpack.c.bf16 %v2844_v6, %v2840_v24 }
 0x3eb   : > { %1955 = vadd.xlane.f32.xlu0 %v1954_v57 }
 0x3ed   : > { %1958 = vadd.xlane.f32.xlu1 %v1957_v18 }
 0x3ef   : > { %1738 = vadd.xlane.f32.xlu0 %v1737_v20 }
 0x3f0   : > { %2666 = vmatmul.mubr.msk.bf16.vlgmr.msra.gmra.mrb[28].mxu0 %vm1270_vm2, %v1745_v53 }
 0x3f1   : > { %2682 = vmatpush3.bf16.msra.mxu0 %v1183_v30  ;;  %1741 = vadd.xlane.f32.xlu1 %v1740_v21  ;;  %v2779_v30 = vld [vmem:[%s3443_s9 + $0x58] sm:$0xff]  }
 0x3f2   : > { %2683 = vmatprep.mubr.msk.bf16.mxu0 %vm2887_vm1, %v2886_v25  ;;  %2687 = vmatprep.subr.bf16.mxu0 %v2886_v25 }
 0x3f8   : > { %2684 = vmatmul.mubr.msk.bf16.vlgmr.msra.gmra.mrb[32].mxu0 %vm1270_vm2, %v1963_v52 }
 0x3f9   : > { %2688 = vmatpush3.bf16.msra.mxu0 %v1093_v23  ;;  %2689 = vmatprep.mubr.msk.bf16.mxu0 %vm2887_vm1, %v2886_v25  ;;  %v2776_v25 = vld [vmem:[%s3443_s9 + $0x8] sm:$0xff]   ;;  %v2778_v23 = vld [vmem:[%s3443_s9 + $0x10] sm:$0xff]  }
 0x3fa   : > { %2556 = vmatpush3.bf16.msra.mxu1 %v2776_v25  ;;  %2575 = vmatprep.subr.bf16.mxu0 %v2789_v60 }
 0x3fb   : > { %2557 = vmatprep.subr.bf16.mxu1 %v2777_v22 }
 0x3fe   : > { %2558 = vmatpush3.bf16.msra.mxu1 %v2778_v23 }
 0x3ff   : > { %2559 = vmatprep.subr.bf16.mxu1 %v2779_v30 }
 0x402   : > { %2560 = vmatpush3.bf16.msra.mxu1 %v2780_v1 }
 0x403   : > { %2561 = vmatprep.subr.bf16.mxu1 %v2781_v8 }
 0x404   : > { %2690 = vmatmul.mubr.msk.bf16.vlgmr.msra.gmra.mrb[32].mxu0 %vm1270_vm2, %v1962_v49 }
 0x405   : > { %2576 = vmatpush3.bf16.msra.mxu0 %v2790_v61 }
 0x406   : > { %2562 = vmatpush3.bf16.msra.mxu1 %v2782_v40  ;;  %2577 = vmatprep.subr.bf16.mxu0 %v2791_v32 }
 0x407   : > { %2563 = vmatprep.subr.bf16.mxu1 %v2783_v12 }
 0x409   : > { %2578 = vmatpush3.bf16.msra.mxu0 %v2792_v34 }
 0x40a   : > { %2564 = vmatpush3.bf16.msra.mxu1 %v2784_v13  ;;  %2579 = vmatprep.subr.bf16.mxu0 %v2793_v35 }
 0x40b   : > { %2565 = vmatprep.subr.bf16.mxu1 %v2785_v14 }
 0x40d   : > { %2580 = vmatpush3.bf16.msra.mxu0 %v2794_v38 }
 0x40e   : > { %2566 = vmatpush3.bf16.msra.mxu1 %v2786_v16  ;;  %2581 = vmatprep.subr.bf16.mxu0 %v2795_v39 }
 0x40f   : > { %2567 = vmatprep.subr.bf16.mxu1 %v2787_v17 }
 0x411   : > { %2582 = vmatpush3.bf16.msra.mxu0 %v2796_v5 }
 0x412   : > { %2568 = vmatpush3.bf16.msra.mxu1 %v2788_v56  ;;  %2583 = vmatprep.subr.bf16.mxu0 %v2797_v33 }
 0x415   : > { %2584 = vmatpush3.bf16.msra.mxu0 %v2798_v43 }
 0x416   : > { %2585 = vmatprep.subr.bf16.mxu0 %v2799_v7 }
 0x419   : > { %2586 = vmatpush3.bf16.msra.mxu0 %v2800_v10 }
 0x41a   : > { %2587 = vmatprep.subr.bf16.mxu0 %v2801_v11 }
 0x41d   : > { %2588 = vmatpush3.bf16.msra.mxu0 %v2802_v9 }
 0x41e   : > { %2589 = vmatprep.subr.bf16.mxu0 %v2803_v42 }
 0x421   : > { %2590 = vmatpush3.bf16.msra.mxu0 %v2804_v44 }
 0x444   : > { %v1299_v31 = vpop.xlane.xlu0 %1298 }
 0x446   : > { %v1302_v46 = vpop.xlane.xlu1 %1301 }
 0x448   : > { %v1305_v36 = vpop.xlane.xlu0 %1304 }
 0x449   : > { %v1309_v45 = vadd.f32 %v1305_v36, %v1299_v31 }
 0x44a   : > { %v1308_v15 = vpop.xlane.xlu1 %1307 }
 0x44b   : > { %v1310_v48 = vadd.f32 %v1308_v15, %v1302_v46  ;;  %2845 = vrcp.f32 %v1309_v45 }
 0x44d   : > { %2847 = vrcp.f32 %v1310_v48 }
 0x454   : > { %v1516_v50 = vpop.xlane.xlu0 %1515 }
 0x455   : > { %v2846_v63 = vpop.eup %2845 }
 0x456   : > { %v1519_v58 = vpop.xlane.xlu1 %1518 }
 0x457   : > { %v2848_v54 = vpop.eup %2847 }
 0x458   : > { %v1522_v3 = vpop.xlane.xlu0 %1521 }
 0x459   : > { %v1526_v47 = vadd.f32 %v1522_v3, %v1516_v50  ;;  %v2057_v50 = vld [vmem:[#allocation4] sm:$0xff] }
 0x45a   : > { %v1525_v37 = vpop.xlane.xlu1 %1524 }
 0x45b   : > { %v1527_v51 = vadd.f32 %v1525_v37, %v1519_v58  ;;  %2849 = vrcp.f32 %v1526_v47 }
 0x45d   : > { %2851 = vrcp.f32 %v1527_v51 }
 0x464   : > { %v1733_v24 = vpop.xlane.xlu0 %1732 }
 0x465   : > { %v2850_v18 = vpop.eup %2849 }
 0x466   : > { %v1736_v27 = vpop.xlane.xlu1 %1735 }
 0x467   : > { %v2852_v21 = vpop.eup %2851 }
 0x474   : > { %v1950_v28 = vpop.xlane.xlu0 %1949 }
 0x476   : > { %v1953_v4 = vpop.xlane.xlu1 %1952 }
 0x478   : > { %v1956_v49 = vpop.xlane.xlu0 %1955 }
 0x479   : > { %v1960_v61 = vadd.f32 %v1956_v49, %v1950_v28 }
 0x47a   : > { %v1959_v6 = vpop.xlane.xlu1 %1958 }
 0x47b   : > { %v1961_v32 = vadd.f32 %v1959_v6, %v1953_v4 }
 0x47c   : > { %v1739_v25 = vpop.xlane.xlu0 %1738 }
 0x47d   : > { %v1743_v30 = vadd.f32 %v1739_v25, %v1733_v24 }
 0x47e   : > { %v1742_v22 = vpop.xlane.xlu1 %1741 }
 0x47f   : > { %v1744_v1 = vadd.f32 %v1742_v22, %v1736_v27  ;;  %2853 = vrcp.f32 %v1743_v30 }
 0x481   : > { %2855 = vrcp.f32 %v1744_v1 }
 0x482   : > { %2857 = vrcp.f32 %v1960_v61 }
 0x483   : > { %2859 = vrcp.f32 %v1961_v32 }
 0x489   : > { %v2854_v40 = vpop.eup %2853 }
 0x48b   : > { %v2856_v13 = vpop.eup %2855 }
 0x48c   : > { %v2858_v35 = vpop.eup %2857 }
 0x48d   : > { %v2860_v39 = vpop.eup %2859 }
 0x49b   : > { %v1394_v62 = vpop.f32.mrb[20].mxu0 }
 0x49c   : > { %v2619_v53 = vpop.f32.mrb[21].mxu0  ;;  %v1403_v59 = vmul.f32 %v2846_v63, %v1394_v62 }
 0x49d   : > { %v1397_v55 = vpop.f32.mrb[22].mxu0  ;;  %v2058_v53 = vld [vmem:[#allocation4 + $0x8] sm:$0xff] }
 0x49e   : > { %v1404_v0 = vmul.f32 %v2848_v54, %v1397_v55  ;;  %v2620_v2 = vpop.f32.mrb[23].mxu0 }
 0x4a0   : > { %v1405_v41 = vpack.c.bf16 %v1404_v0, %v1403_v59 }
 0x4af   : > { %v1611_v57 = vpop.f32.mrb[24].mxu0 }
 0x4b0   : > { %v2643_v20 = vpop.f32.mrb[25].mxu0  ;;  %v1620_v26 = vmul.f32 %v2850_v18, %v1611_v57 }
 0x4b1   : > { %v1614_v52 = vpop.f32.mrb[26].mxu0 }
 0x4b2   : > { %v1621_v29 = vmul.f32 %v2852_v21, %v1614_v52  ;;  %v2644_v19 = vpop.f32.mrb[27].mxu0 }
 0x4b4   : > { %v1622_v23 = vpack.c.bf16 %v1621_v29, %v1620_v26 }
 0x4b6   : > { %2283 = vmatprep.mubr.bf16.mxu1 %v1622_v23 }
 0x4b7   : > { %2284 = vmatmul.mubr.bf16.vlgmr.msra.gmra.mrb[52].mxu1 %v1405_v41 }
 0x4c3   : > { %v1828_v8 = vpop.f32.mrb[28].mxu0 }
 0x4c4   : > { %v2667_v12 = vpop.f32.mrb[29].mxu0  ;;  %v1837_v16 = vmul.f32 %v2854_v40, %v1828_v8 }
 0x4c5   : > { %v1831_v14 = vpop.f32.mrb[30].mxu0 }
 0x4c6   : > { %v1838_v17 = vmul.f32 %v2856_v13, %v1831_v14  ;;  %v2668_v56 = vpop.f32.mrb[31].mxu0 }
 0x4c8   : > { %v1839_v60 = vpack.c.bf16 %v1838_v17, %v1837_v16 }
 0x4d7   : > { %v2045_v34 = vpop.f32.mrb[32].mxu0 }
 0x4d8   : > { %v2691_v38 = vpop.f32.mrb[33].mxu0  ;;  %v2054_v33 = vmul.f32 %v2858_v35, %v2045_v34 }
 0x4d9   : > { %v2048_v5 = vpop.f32.mrb[34].mxu0 }
 0x4da   : > { %v2055_v43 = vmul.f32 %v2860_v39, %v2048_v5  ;;  %v2692_v7 = vpop.f32.mrb[35].mxu0 }
 0x4dc   : > { %v2056_v10 = vpack.c.bf16 %v2055_v43, %v2054_v33 }
 0x4de   : > { %2324 = vmatprep.mubr.bf16.mxu0 %v2056_v10 }
 0x4df   : > { %2325 = vmatmul.mubr.bf16.vlgmr.msra.gmra.mrb[36].mxu0 %v1839_v60 }
 0x58a   : > { %v2569_v11 = vpop.f32.mrb[52].mxu1 }
 0x58b   : > { %v2570_v9 = vpop.f32.mrb[53].mxu1 }
 0x58c   : > { %v2571_v42 = vadd.f32 %v2570_v9, %v2569_v11  ;;  %v2572_v44 = vpop.f32.mrb[54].mxu1 }
 0x58d   : > { %v2573_v31 = vpop.f32.mrb[55].mxu1 }
 0x58e   : > { %v2574_v46 = vadd.f32 %v2573_v31, %v2572_v44 }
 0x5b2   : > { %v2591_v36 = vpop.f32.mrb[36].mxu0 }
 0x5b3   : > { %v2592_v15 = vpop.f32.mrb[37].mxu0 }
 0x5b4   : > { %v2593_v45 = vadd.f32 %v2592_v15, %v2591_v36  ;;  %v2594_v48 = vpop.f32.mrb[38].mxu0 }
 0x5b5   : > { %v2595_v58 = vpop.f32.mrb[39].mxu0 }
 0x5b6   : > { %v2327_v62 = vadd.f32 %v2593_v45, %v2571_v42  ;;  %v2596_v63 = vadd.f32 %v2595_v58, %v2594_v48 }
 0x5b8   : > { %v2333_v54 = vadd.f32 %v2327_v62, %v2057_v50  ;;  %v2330_v55 = vadd.f32 %v2596_v63, %v2574_v46 }
 0x5ba   : > { %2335 = vst.msk [vmem:[#allocation4] sm:$0xff] %vm401_vm0, %v2333_v54  ;;  %v2334_v59 = vadd.f32 %v2330_v55, %v2058_v53 }
 0x5bc   : > { %2336 = vst.msk [vmem:[#allocation4 + $0x8] sm:$0xff] %vm401_vm0, %v2334_v59 }
 0x5c1   : > { %v2340_v0 = vld [vmem:[#allocation4] sm:$0xff] }
 0x5c2   : > { %2342 = vst.msk [vmem:[%s391_s18] sm:$0xff] %vm401_vm0, %v2340_v0 }
 0x5c3   : > { %v2341_v2 = vld [vmem:[#allocation4 + $0x8] sm:$0xff] }
 0x5c4   : > { %2343 = vst.msk [vmem:[%s391_s18 + $0x8] sm:$0xff] %vm401_vm0, %v2341_v2 }
 0x5c5 PF: > { %s20_s15 = sadd.s32 1, %s2883_s15   ;;  %s3445_s13 = smov %s2879_s14 }
 0x5c6   : > { %p17_p5 = scmp.ge.s32.totalorder %s20_s15, 4   ;;  %s3446_s14 = smov %s3448_s16 }
 0x5c8   :  { %19 = sbr.rel (!%p17_p5) target bundleno = 2 (0x2), region = 105 }

// kernel: cross_attention_forward.11
= control target key start
LH: loop header
LB: loop body
LE: loop exit
PB: predicated region body
PF: predicated region fallthrough
CT: control target
= control target key end

     0   :  { %vm27_vm0 = vcmask 261120   ;;  %s301_s0 = inlined_call_operand.vmem [shape: f32[32,32], index: 0, kind: input, shape index: {}]   ;;  %s302_s3 = inlined_call_operand.vmem [shape: bf16[32,32], index: 3, kind: input, shape index: {}]   ;;  %s303_s1 = inlined_call_operand.vmem [shape: f32[1,32], index: 1, kind: input, shape index: {}]   ;;  %s304_s2 = inlined_call_operand.vmem [shape: f32[1,32], index: 2, kind: input, shape index: {}]   ;;  %s305_s4 = inlined_call_operand.vmem [shape: f32[1,32], index: 4, kind: input, shape index: {}]   ;;  %s306_s5 = inlined_call_operand.vmem [shape: f32[32,32], index: 5, kind: output, shape index: {}]  }
   0x1   :  { %v21_v0 = vld [vmem:[%s301_s0] sm:$0xff]  ;;  %v23_v1 = vld [vmem:[%s301_s0 + $0x10] sm:$0xff]  ;;  %v22_v2 = vld [vmem:[%s301_s0 + $0x8] sm:$0xff] }
   0x2   :  { %v28_v3 = vsel %vm27_vm0, %v21_v0, 0.0  ;;  %v34_v4 = vsel %vm27_vm0, %v23_v1, 0.0  ;;  %v24_v5 = vld [vmem:[%s301_s0 + $0x18] sm:$0xff]  ;;  %v31_v6 = vsel %vm27_vm0, %v22_v2, 0.0  ;;  %v208_v28 = vld [vmem:[%s302_s3] sm:$0xff]   ;;  %v209_v29 = vld [vmem:[%s302_s3 + $0x8] sm:$0xff]  }
   0x3   :  { %29 = vadd.xlane.f32.xlu0 %v28_v3  ;;  %35 = vadd.xlane.f32.xlu1 %v34_v4  ;;  %v37_v7 = vsel %vm27_vm0, %v24_v5, 0.0  ;;  %v189_v44 = vld [vmem:[%s303_s1] ss:$0 sm:$0xff] }
   0x4   :  { %200 = vmatprep.subr.bf16.mxu0 %v208_v28  ;;  %v190_v50 = vld [vmem:[%s304_s2] ss:$0 sm:$0xff] }
   0x5   :  { %201 = vmatpush3.bf16.msra.mxu0 %v208_v28  ;;  %v191_v62 = vld [vmem:[%s305_s4] ss:$0 sm:$0xff] }
   0x6   :  { %202 = vmatprep.subr.bf16.mxu0 %v209_v29 }
   0x7   :  { %32 = vadd.xlane.f32.xlu0 %v31_v6  ;;  %38 = vadd.xlane.f32.xlu1 %v37_v7 }
   0x9   :  { %203 = vmatpush3.bf16.msra.mxu0 %v209_v29 }
  0x90   :  { %v30_v8 = vpop.xlane.xlu0 %29  ;;  %v36_v9 = vpop.xlane.xlu1 %35 }
  0x91   :  { %v41_v10 = vmul.f32 0.03125, %v30_v8  ;;  %v43_v11 = vmul.f32 0.03125, %v36_v9 }
  0x93   :  { %v45_v12 = vsub.f32 %v21_v0, %v41_v10  ;;  %v47_v13 = vsub.f32 %v23_v1, %v43_v11 }
  0x94   :  { %v33_v14 = vpop.xlane.xlu0 %32  ;;  %v39_v15 = vpop.xlane.xlu1 %38 }
  0x95   :  { %v42_v16 = vmul.f32 0.03125, %v33_v14  ;;  %v44_v17 = vmul.f32 0.03125, %v39_v15  ;;  %v49_v18 = vmul.f32 %v45_v12, %v45_v12  ;;  %v51_v19 = vmul.f32 %v47_v13, %v47_v13 }
  0x97   :  { %v46_v20 = vsub.f32 %v22_v2, %v42_v16  ;;  %v48_v21 = vsub.f32 %v24_v5, %v44_v17  ;;  %v53_v22 = vsel %vm27_vm0, %v49_v18, 0.0  ;;  %v59_v23 = vsel %vm27_vm0, %v51_v19, 0.0 }
  0x98   :  { %54 = vadd.xlane.f32.xlu0 %v53_v22 }
  0x99   :  { %v50_v24 = vmul.f32 %v46_v20, %v46_v20  ;;  %v52_v25 = vmul.f32 %v48_v21, %v48_v21 }
  0x9b   :  { %v56_v26 = vsel %vm27_vm0, %v50_v24, 0.0  ;;  %v62_v27 = vsel %vm27_vm0, %v52_v25, 0.0 }
  0x9c   :  { %60 = vadd.xlane.f32.xlu0 %v59_v23  ;;  %57 = vadd.xlane.f32.xlu1 %v56_v26 }
  0xa0   :  { %63 = vadd.xlane.f32.xlu1 %v62_v27 }
 0x125   :  { %v55_v30 = vpop.xlane.xlu0 %54 }
 0x126   :  { %v65_v31 = vmul.f32 0.03125, %v55_v30 }
 0x128   :  { %v69_v32 = vadd.f32 1e-05, %v65_v31 }
 0x129   :  { %v58_v33 = vpop.xlane.xlu1 %57  ;;  %v61_v34 = vpop.xlane.xlu0 %60 }
 0x12a   :  { %210 = vrsqrt.f32 %v69_v32  ;;  %v66_v35 = vmul.f32 0.03125, %v58_v33  ;;  %v67_v36 = vmul.f32 0.03125, %v61_v34 }
 0x12c   :  { %v70_v37 = vadd.f32 1e-05, %v66_v35  ;;  %v71_v38 = vadd.f32 1e-05, %v67_v36 }
 0x12d   :  { %v64_v39 = vpop.xlane.xlu1 %63 }
 0x12e   :  { %212 = vrsqrt.f32 %v70_v37  ;;  %v68_v40 = vmul.f32 0.03125, %v64_v39 }
 0x12f   :  { %214 = vrsqrt.f32 %v71_v38 }
 0x130   :  { %v72_v41 = vadd.f32 1e-05, %v68_v40 }
 0x132   :  { %216 = vrsqrt.f32 %v72_v41 }
 0x134   :  { %v211_v42 = vpop.eup %210 }
 0x135   :  { %v77_v43 = vmul.f32 %v211_v42, %v45_v12 }
 0x137   :  { %v87_v48 = vmul.f32 %v189_v44, %v77_v43 }
 0x138   :  { %v213_v45 = vpop.eup %212 }
 0x139   :  { %v215_v46 = vpop.eup %214  ;;  %v78_v47 = vmul.f32 %v213_v45, %v46_v20  ;;  %v97_v54 = vadd.f32 %v190_v50, %v87_v48 }
 0x13a   :  { %v79_v49 = vmul.f32 %v215_v46, %v47_v13 }
 0x13b   :  { %v88_v51 = vmul.f32 %v189_v44, %v78_v47 }
 0x13c   :  { %v217_v52 = vpop.eup %216  ;;  %v89_v56 = vmul.f32 %v189_v44, %v79_v49 }
 0x13d   :  { %v80_v53 = vmul.f32 %v217_v52, %v48_v21  ;;  %v98_v55 = vadd.f32 %v190_v50, %v88_v51 }
 0x13e   :  { %v99_v59 = vadd.f32 %v190_v50, %v89_v56 }
 0x13f   :  { %v101_v57 = vpack.c.bf16 %v98_v55, %v97_v54  ;;  %v90_v58 = vmul.f32 %v189_v44, %v80_v53 }
 0x141   :  { %204 = vmatprep.mubr.msk.bf16.mxu0 %vm27_vm0, %v101_v57  ;;  %v100_v60 = vadd.f32 %v190_v50, %v90_v58 }
 0x143   :  { %v102_v61 = vpack.c.bf16 %v100_v60, %v99_v59 }
 0x145   :  { %205 = vmatmul.mubr.msk.bf16.vlgmr.msra.gmra.mrb[0].mxu0 %vm27_vm0, %v102_v61 }
 0x218   :  { %v206_v63 = vpop.f32.mrb[0].mxu0 }
 0x219   :  { %v175_v0 = vadd.f32 %v206_v63, %v191_v62  ;;  %v166_v1 = vpop.f32.mrb[1].mxu0 }
 0x21a   :  { %v167_v2 = vadd.f32 %v191_v62, %v166_v1  ;;  %v207_v3 = vpop.f32.mrb[2].mxu0 }
 0x21b   :  { %183 = vst.msk [vmem:[%s306_s5 + $0x10] sm:$0xff] %vm27_vm0, %v175_v0  ;;  %v178_v4 = vadd.f32 %v207_v3, %v191_v62  ;;  %v169_v5 = vpop.f32.mrb[3].mxu0 }
 0x21c   :  { %181 = vst.msk [vmem:[%s306_s5] sm:$0xff] %vm27_vm0, %v167_v2  ;;  %v170_v6 = vadd.f32 %v191_v62, %v169_v5 }
 0x21d   :  { %184 = vst.msk [vmem:[%s306_s5 + $0x18] sm:$0xff] %vm27_vm0, %v178_v4 }
 0x21e   :  { %182 = vst.msk [vmem:[%s306_s5 + $0x8] sm:$0xff] %vm27_vm0, %v170_v6 }

// kernel: cross_attention_forward.7
= control target key start
LH: loop header
LB: loop body
LE: loop exit
PB: predicated region body
PF: predicated region fallthrough
CT: control target
= control target key end

     0   :  { %s2909_s13 = smov 0   ;;  %s2911_s14 = smov 0   ;;  %s3410_s0 = inlined_call_operand.vmem [shape: f32[2,16,32], index: 0, kind: input, shape index: {}]   ;;  %s3411_s1 = inlined_call_operand.vmem [shape: f32[1,16,32], index: 1, kind: input, shape index: {}]   ;;  %s3412_s2 = inlined_call_operand.vmem [shape: f32[1,32], index: 2, kind: input, shape index: {}]   ;;  %s3413_s3 = inlined_call_operand.vmem [shape: f32[1,32], index: 3, kind: input, shape index: {}]   ;;  %s3414_s4 = inlined_call_operand.vmem [shape: f32[1,32], index: 4, kind: input, shape index: {}]   ;;  %s3415_s5 = inlined_call_operand.vmem [shape: f32[1,32], index: 5, kind: input, shape index: {}]   ;;  %s3416_s6 = inlined_call_operand.vmem [shape: bf16[1,32,512], index: 6, kind: input, shape index: {}]   ;;  %s3417_s7 = inlined_call_operand.vmem [shape: bf16[1,32,512], index: 7, kind: input, shape index: {}]   ;;  %s3418_s8 = inlined_call_operand.vmem [shape: bf16[1,32,512], index: 8, kind: input, shape index: {}]   ;;  %s3419_s9 = inlined_call_operand.vmem [shape: bf16[1,512,32], index: 9, kind: input, shape index: {}]   ;;  %s3420_s10 = inlined_call_operand.vmem [shape: f32[2,16,32], index: 10, kind: output, shape index: {}]  }
   0x1   :  { %s2913_s15 = smov 0  }
   0x2 LB: > { %s32_s16 = sadd.s32 1, %s2844_s14  ;;  %p2399_p0 = scmp.ge.s32.totalorder %s2848_s15, 1  ;;  %s2848_s15 = sphi %s2913_s15, %s20_s15   ;;  %s2844_s14 = sphi %s2911_s14, %s3422_s14   ;;  %s2840_s13 = sphi %s2909_s13, %s3421_s13  }
   0x3   : > { %p34_p1 = scmp.ge.s32.totalorder %s32_s16, 2  ;;  %p324_p2 = scmp.lt.s32.totalorder %s2848_s15, 3 }
   0x5   : > { %s3424_s16 = smov (%p34_p1, %s32_s16), 0  ;;  %p325_p3 = pnand %p2399_p0, %p324_p2 }
   0x6   : > { %p362_p4 = scmp.lt.s32.totalorder (!%p325_p3), %s2840_s13, 1  ;;  %vm381_vm0 = vcmask (!%p325_p3), 261120   ;;  %v427_v0 = vld [vmem:[%s3411_s1] sm:$0xff] (!%p325_p3)  ;;  %v428_v1 = vld [vmem:[%s3411_s1 + $0x8] sm:$0xff] (!%p325_p3)  ;;  %v2850_v35 = vmov (!%p325_p3), 0   ;;  %vm2852_vm1 = vmmov (!%p325_p3), 0  }
   0x7   : > { %328 = sbr.rel (%p325_p3) target bundleno = 1477 (0x5c5), region = 60  ;;  %v431_v2 = vsel (!%p325_p3), %vm381_vm0, %v427_v0, 0.0  ;;  %v434_v3 = vsel (!%p325_p3), %vm381_vm0, %v428_v1, 0.0  ;;  %v2702_v28 = vld [vmem:[%s3417_s7 + $0x4] ss:$16 sps:$4 sm:$0xff] (!%p325_p3)   ;;  %796 = vmatprep.mubr.bf16.mxu0 (!%p325_p3), %v2850_v35  ;;  %655 = vmatprep.mubr.bf16.mxu1 (!%p325_p3), %v2850_v35  ;;  %vm1250_vm2 = vcmask (!%p325_p3), 130048  }
   0x8   : > { %432 = vadd.xlane.f32.xlu1 (!%p325_p3), %v431_v2  ;;  %v2963_v29 = vld [vmem:[%s3417_s7] ss:$16 sps:$4 sm:$0xff] (!%p325_p3)   ;;  %764 = vmatprep.subr.bf16.mxu0 (!%p325_p3), %v2702_v28  ;;  %v2705_v30 = vld [vmem:[%s3416_s6 + $0x4] ss:$16 sps:$4 sm:$0xff] (!%p325_p3)   ;;  %v2716_v37 = vld [vmem:[%s3416_s6 + $0xc] ss:$16 sps:$4 sm:$0xff] (!%p325_p3)  }
   0x9   : > { %765 = vmatpush1.bf16.msra.mxu0 (!%p325_p3), %v2963_v29  ;;  %v2707_v31 = vld [vmem:[%s3417_s7 + $0x24] ss:$16 sps:$4 sm:$0xff] (!%p325_p3)   ;;  %v2709_v32 = vld [vmem:[%s3416_s6] ss:$16 sps:$4 sm:$0xff] (!%p325_p3)   ;;  %623 = vmatprep.subr.bf16.mxu1 (!%p325_p3), %v2705_v30 }
   0xa   : > { %v2978_v33 = vld [vmem:[%s3417_s7 + $0x20] ss:$16 sps:$4 sm:$0xff] (!%p325_p3)   ;;  %766 = vmatprep.subr.bf16.mxu0 (!%p325_p3), %v2707_v31  ;;  %v2711_v34 = vld [vmem:[%s3416_s6 + $0x24] ss:$16 sps:$4 sm:$0xff] (!%p325_p3)   ;;  %624 = vmatpush1.bf16.msra.mxu1 (!%p325_p3), %v2709_v32 }
   0xb   : > { %625 = vmatprep.subr.bf16.mxu1 (!%p325_p3), %v2711_v34  ;;  %v2713_v36 = vld [vmem:[%s3416_s6 + $0x20] ss:$16 sps:$4 sm:$0xff] (!%p325_p3)  }
   0xc   : > { %435 = vadd.xlane.f32.xlu1 (!%p325_p3), %v434_v3  ;;  %v2404_v52 = vld [vmem:[%s3412_s2] ss:$0 sm:$0xff] (!%p325_p3) }
   0xd   : > { %767 = vmatpush1.bf16.msra.mxu0 (!%p325_p3), %v2978_v33  ;;  %v2405_v57 = vld [vmem:[%s3413_s3] ss:$0 sm:$0xff] (!%p325_p3) }
   0xe   : > { %s3426_s13 = smov (!%p362_p4, %s2840_s13), 1  ;;  %854 = vmatprep.subr.bf16.mxu0 %v2702_v28  ;;  %626 = vmatpush1.bf16.msra.mxu1 %v2713_v36  ;;  %v2406_v58 = vld [vmem:[%s3414_s4] ss:$0 sm:$0xff] }
   0xf   : > { %s2484_s21 = sshll.u32 %s3426_s13, 4  ;;  %666 = vmatprep.subr.bf16.mxu1 %v2716_v37  ;;  %v2407_v2 = vld [vmem:[%s3415_s5] ss:$0 sm:$0xff] }
  0x10   : > { %s366_s24 = scalar_lea.vmem %s3410_s0, %s2484_s21  ;;  %s371_s11 = scalar_lea.vmem %s3420_s10, %s2484_s21 }
  0x11   : > { %v377_v4 = vld [vmem:[%s366_s24] sm:$0xff]  ;;  %v378_v5 = vld [vmem:[%s366_s24 + $0x8] sm:$0xff] }
  0x12   : > { %v382_v6 = vsel %vm381_vm0, %v377_v4, 0.0  ;;  %v385_v7 = vsel %vm381_vm0, %v378_v5, 0.0 }
  0x13   : > { %383 = vadd.xlane.f32.xlu0 %v382_v6 }
  0x17   : > { %386 = vadd.xlane.f32.xlu0 %v385_v7 }
  0x95   : > { %v433_v8 = vpop.xlane.xlu1 %432 }
  0x96   : > { %v437_v9 = vmul.f32 0.03125, %v433_v8 }
  0x98   : > { %v2945_v13 = vsub.f32 %v427_v0, %v437_v9  ;;  %v2714_v9 = vld [vmem:[%s3416_s6 + $0x8] ss:$16 sps:$4 sm:$0xff]  }
  0x99   : > { %v436_v10 = vpop.xlane.xlu1 %435 }
  0x9a   : > { %v438_v14 = vmul.f32 0.03125, %v436_v10  ;;  %v441_v20 = vmul.f32 %v2945_v13, %v2945_v13  ;;  %v2719_v10 = vld [vmem:[%s3416_s6 + $0x2c] ss:$16 sps:$4 sm:$0xff]  }
  0x9c   : > { %v2947_v18 = vsub.f32 %v428_v1, %v438_v14  ;;  %v443_v23 = vsel %vm381_vm0, %v441_v20, 0.0  ;;  %v2720_v14 = vld [vmem:[%s3418_s8] ss:$16 sps:$4 sm:$0xff]   ;;  %v2729_v20 = vld [vmem:[%s3417_s7 + $0x28] ss:$16 sps:$4 sm:$0xff]  }
  0x9e   : > { %v442_v25 = vmul.f32 %v2947_v18, %v2947_v18 }
  0xa0   : > { %v384_v11 = vpop.xlane.xlu0 %383  ;;  %v446_v27 = vsel %vm381_vm0, %v442_v25, 0.0  ;;  %v2851_v25 = vmov 0.0  }
  0xa1   : > { %v389_v12 = vmul.f32 0.03125, %v384_v11  ;;  %v2722_v11 = vld [vmem:[%s3418_s8 + $0x4] ss:$16 sps:$4 sm:$0xff]  }
  0xa3   : > { %v391_v15 = vsub.f32 %v377_v4, %v389_v12 }
  0xa4   : > { %v387_v16 = vpop.xlane.xlu0 %386 }
  0xa5   : > { %v390_v17 = vmul.f32 0.03125, %v387_v16  ;;  %v393_v19 = vmul.f32 %v391_v15, %v391_v15  ;;  %v2728_v16 = vld [vmem:[%s3418_s8 + $0x24] ss:$16 sps:$4 sm:$0xff]  }
  0xa7   : > { %v392_v21 = vsub.f32 %v378_v5, %v390_v17  ;;  %v395_v22 = vsel %vm381_vm0, %v393_v19, 0.0  ;;  %v2723_v17 = vld [vmem:[%s3417_s7 + $0x8] ss:$16 sps:$4 sm:$0xff]   ;;  %v2731_v19 = vld [vmem:[%s3417_s7 + $0x2c] ss:$16 sps:$4 sm:$0xff]  }
  0xa8   : > { %396 = vadd.xlane.f32.xlu0 %v395_v22  ;;  %v2732_v22 = vld [vmem:[%s3418_s8 + $0x8] ss:$16 sps:$4 sm:$0xff]  }
  0xa9   : > { %v394_v24 = vmul.f32 %v392_v21, %v392_v21 }
  0xab   : > { %v398_v26 = vsel %vm381_vm0, %v394_v24, 0.0  ;;  %v2735_v24 = vld [vmem:[%s3418_s8 + $0x28] ss:$16 sps:$4 sm:$0xff]  }
  0xac   : > { %444 = vadd.xlane.f32.xlu0 %v443_v23  ;;  %399 = vadd.xlane.f32.xlu1 %v398_v26  ;;  %v2737_v23 = vld [vmem:[%s3418_s8 + $0x2c] ss:$16 sps:$4 sm:$0xff]  }
  0xb0   : > { %447 = vadd.xlane.f32.xlu1 %v446_v27 }
 0x135   : > { %v397_v38 = vpop.xlane.xlu0 %396 }
 0x136   : > { %v401_v39 = vmul.f32 0.03125, %v397_v38 }
 0x138   : > { %v403_v40 = vadd.f32 1e-05, %v401_v39 }
 0x139   : > { %v400_v41 = vpop.xlane.xlu1 %399  ;;  %v445_v42 = vpop.xlane.xlu0 %444 }
 0x13a   : > { %2770 = vrsqrt.f32 %v403_v40  ;;  %v402_v43 = vmul.f32 0.03125, %v400_v41  ;;  %v449_v44 = vmul.f32 0.03125, %v445_v42 }
 0x13c   : > { %v404_v45 = vadd.f32 1e-05, %v402_v43  ;;  %v451_v46 = vadd.f32 1e-05, %v449_v44 }
 0x13d   : > { %v448_v47 = vpop.xlane.xlu1 %447 }
 0x13e   : > { %2772 = vrsqrt.f32 %v404_v45  ;;  %v450_v48 = vmul.f32 0.03125, %v448_v47 }
 0x13f   : > { %2774 = vrsqrt.f32 %v451_v46 }
 0x140   : > { %v452_v49 = vadd.f32 1e-05, %v450_v48 }
 0x142   : > { %2776 = vrsqrt.f32 %v452_v49 }
 0x144   : > { %v2771_v50 = vpop.eup %2770 }
 0x145   : > { %v407_v51 = vmul.f32 %v2771_v50, %v391_v15  ;;  %v2725_v15 = vld [vmem:[%s3417_s7 + $0xc] ss:$16 sps:$4 sm:$0xff]  }
 0x147   : > { %v415_v55 = vmul.f32 %v2404_v52, %v407_v51 }
 0x148   : > { %v2773_v53 = vpop.eup %2772 }
 0x149   : > { %v2775_v54 = vpop.eup %2774  ;;  %v408_v56 = vmul.f32 %v2773_v53, %v392_v21  ;;  %v423_v62 = vadd.f32 %v2405_v57, %v415_v55  ;;  %v2734_v21 = vld [vmem:[%s3418_s8 + $0xc] ss:$16 sps:$4 sm:$0xff]  }
 0x14a   : > { %v455_v59 = vmul.f32 %v2775_v54, %v2945_v13  ;;  %v2717_v13 = vld [vmem:[%s3416_s6 + $0x28] ss:$16 sps:$4 sm:$0xff]  }
 0x14b   : > { %v416_v60 = vmul.f32 %v2404_v52, %v408_v56 }
 0x14c   : > { %v2777_v61 = vpop.eup %2776  ;;  %v463_v0 = vmul.f32 %v2406_v58, %v455_v59 }
 0x14d   : > { %v424_v63 = vadd.f32 %v2405_v57, %v416_v60  ;;  %v456_v1 = vmul.f32 %v2777_v61, %v2947_v18  ;;  %v2726_v18 = vld [vmem:[%s3418_s8 + $0x20] ss:$16 sps:$4 sm:$0xff]  }
 0x14e   : > { %v471_v5 = vadd.f32 %v2407_v2, %v463_v0 }
 0x14f   : > { %v425_v3 = vpack.c.bf16 %v424_v63, %v423_v62  ;;  %v464_v4 = vmul.f32 %v2406_v58, %v456_v1 }
 0x151   : > { %426 = vst.msk [vmem:[#allocation2] sm:$0xff] %vm381_vm0, %v425_v3  ;;  %v472_v6 = vadd.f32 %v2407_v2, %v464_v4 }
 0x153   : > { %v473_v7 = vpack.c.bf16 %v472_v6, %v471_v5 }
 0x155   : > { %474 = vst.msk [vmem:[#allocation3] sm:$0xff] %vm381_vm0, %v473_v7 }
 0x158   : > { %v479_v8 = vld [vmem:[#allocation2] sm:$0xff] }
 0x159   : > { %2426 = vmatmul.mubr.msk.bf16.vlgmr.msra.gmra.mrb[0].mxu0 %vm381_vm0, %v479_v8 }
 0x15a   : > { %855 = vmatpush1.bf16.msra.mxu0 %v2963_v29  ;;  %886 = vmatprep.mubr.bf16.mxu0 %v2850_v35 }
 0x15b   : > { %856 = vmatprep.subr.bf16.mxu0 %v2707_v31 }
 0x15c   : > { %v480_v12 = vld [vmem:[#allocation3] sm:$0xff] }
 0x15d   : > { %2416 = vmatmul.mubr.msk.bf16.vlgmr.msra.gmra.mrb[0].mxu1 %vm381_vm0, %v480_v12 }
 0x15e   : > { %667 = vmatpush1.bf16.msra.mxu1 %v2714_v9  ;;  %857 = vmatpush1.bf16.msra.mxu0 %v2978_v33 }
 0x15f   : > { %668 = vmatprep.subr.bf16.mxu1 %v2719_v10  ;;  %984 = vmatprep.subr.bf16.mxu0 %v2722_v11 }
 0x160   : > { %698 = vmatprep.mubr.bf16.mxu1 %v2850_v35 }
 0x161   : > { %2428 = vmatmul.mubr.msk.bf16.vlgmr.msra.gmra.mrb[4].mxu0 %vm381_vm0, %v480_v12 }
 0x162   : > { %669 = vmatpush1.bf16.msra.mxu1 %v2717_v13  ;;  %985 = vmatpush1.bf16.msra.mxu0 %v2720_v14 }
 0x163   : > { %807 = vmatprep.subr.bf16.mxu1 %v2725_v15  ;;  %986 = vmatprep.subr.bf16.mxu0 %v2728_v16 }
 0x164   : > { %1016 = vmatprep.mubr.bf16.mxu0 %v2850_v35 }
 0x165   : > { %2417 = vmatmul.mubr.msk.bf16.vlgmr.msra.gmra.mrb[4].mxu1 %vm381_vm0, %v480_v12 }
 0x166   : > { %808 = vmatpush1.bf16.msra.mxu1 %v2723_v17  ;;  %987 = vmatpush1.bf16.msra.mxu0 %v2726_v18 }
 0x167   : > { %809 = vmatprep.subr.bf16.mxu1 %v2731_v19  ;;  %1074 = vmatprep.subr.bf16.mxu0 %v2722_v11 }
 0x168   : > { %839 = vmatprep.mubr.bf16.mxu1 %v2850_v35 }
 0x169   : > { %2438 = vmatmul.mubr.msk.bf16.vlgmr.msra.gmra.mrb[8].mxu0 %vm381_vm0, %v479_v8 }
 0x16a   : > { %810 = vmatpush1.bf16.msra.mxu1 %v2729_v20  ;;  %1075 = vmatpush1.bf16.msra.mxu0 %v2720_v14 }
 0x16b   : > { %897 = vmatprep.subr.bf16.mxu1 %v2725_v15  ;;  %1076 = vmatprep.subr.bf16.mxu0 %v2728_v16 }
 0x16c   : > { %1106 = vmatprep.mubr.bf16.mxu0 %v2850_v35 }
 0x16d   : > { %2427 = vmatmul.mubr.msk.bf16.vlgmr.msra.gmra.mrb[8].mxu1 %vm381_vm0, %v479_v8 }
 0x16e   : > { %898 = vmatpush1.bf16.msra.mxu1 %v2723_v17  ;;  %1077 = vmatpush1.bf16.msra.mxu0 %v2726_v18 }
 0x16f   : > { %899 = vmatprep.subr.bf16.mxu1 %v2731_v19  ;;  %929 = vmatprep.mubr.bf16.mxu1 %v2850_v35 }
 0x170   : > { %2562 = vmatprep.subr.bf16.mxu0 %v2851_v25 }
 0x171   : > { %2440 = vmatmul.mubr.msk.bf16.vlgmr.msra.gmra.mrb[12].mxu0 %vm381_vm0, %v480_v12 }
 0x172   : > { %900 = vmatpush1.bf16.msra.mxu1 %v2729_v20  ;;  %2564 = vmatprep.mubr.msk.bf16.mxu0 %vm2852_vm1, %v2851_v25 }
 0x173   : > { %1027 = vmatprep.subr.bf16.mxu1 %v2734_v21 }
 0x175   : > { %2429 = vmatmul.mubr.msk.bf16.vlgmr.msra.gmra.mrb[12].mxu1 %vm381_vm0, %v480_v12 }
 0x176   : > { %1028 = vmatpush1.bf16.msra.mxu1 %v2732_v22  ;;  %1059 = vmatprep.mubr.bf16.mxu1 %v2850_v35 }
 0x177   : > { %1029 = vmatprep.subr.bf16.mxu1 %v2737_v23 }
 0x17a   : > { %1030 = vmatpush1.bf16.msra.mxu1 %v2735_v24 }
 0x17b   : > { %1117 = vmatprep.subr.bf16.mxu1 %v2734_v21 }
 0x17d   : > { %2439 = vmatmul.mubr.msk.bf16.vlgmr.msra.gmra.mrb[16].mxu1 %vm381_vm0, %v479_v8 }
 0x17e   : > { %1118 = vmatpush1.bf16.msra.mxu1 %v2732_v22  ;;  %1149 = vmatprep.mubr.bf16.mxu1 %v2850_v35 }
 0x17f   : > { %1119 = vmatprep.subr.bf16.mxu1 %v2737_v23 }
 0x182   : > { %1120 = vmatpush1.bf16.msra.mxu1 %v2735_v24 }
 0x183   : > { %2568 = vmatprep.subr.bf16.mxu1 %v2851_v25 }
 0x185   : > { %2441 = vmatmul.mubr.msk.bf16.vlgmr.msra.gmra.mrb[20].mxu1 %vm381_vm0, %v480_v12 }
 0x186   : > { %2570 = vmatprep.mubr.msk.bf16.mxu1 %vm2852_vm1, %v2851_v25 }
 0x22c   : > { %v798_v26 = vpop.f32.mrb[0].mxu0 }
 0x22d   : > { %v800_v27 = vpop.f32.mrb[1].mxu0 }
 0x22e   : > { %v802_v28 = vpop.f32.mrb[2].mxu0 }
 0x22f   : > { %v850_v29 = vpack.c.bf16 %v802_v28, %v798_v26  ;;  %v804_v30 = vpop.f32.mrb[3].mxu0 }
 0x230   : > { %v851_v31 = vpack.c.bf16 %v804_v30, %v800_v27  ;;  %v657_v32 = vpop.f32.mrb[0].mxu1 }
 0x231   : > { %v659_v33 = vpop.f32.mrb[1].mxu1  ;;  %2563 = vmatpush3.bf16.xpose.msra.mxu0 %v850_v29  ;;  %v709_v35 = vmul.f32 0.35355338, %v657_v32 }
 0x232   : > { %v661_v34 = vpop.f32.mrb[2].mxu1  ;;  %2574 = vmatprep.subr.bf16.mxu0 %v2851_v25  ;;  %v710_v38 = vmul.f32 0.35355338, %v659_v33 }
 0x233   : > { %v713_v36 = vmul.f32 0.35355338, %v661_v34  ;;  %v663_v37 = vpop.f32.mrb[3].mxu1 }
 0x234   : > { %v714_v39 = vmul.f32 0.35355338, %v663_v37  ;;  %v888_v40 = vpop.f32.mrb[4].mxu0 }
 0x235   : > { %v717_v41 = vpack.c.bf16 %v713_v36, %v709_v35  ;;  %v890_v42 = vpop.f32.mrb[5].mxu0 }
 0x236   : > { %v718_v43 = vpack.c.bf16 %v714_v39, %v710_v38  ;;  %v892_v44 = vpop.f32.mrb[6].mxu0  ;;  %v2853_v39 = vmov -1e+30  }
 0x237   : > { %v940_v45 = vpack.c.bf16 %v892_v44, %v888_v40  ;;  %v894_v46 = vpop.f32.mrb[7].mxu0 }
 0x238   : > { %v941_v47 = vpack.c.bf16 %v894_v46, %v890_v42  ;;  %v700_v48 = vpop.f32.mrb[4].mxu1  ;;  %2565 = vmatmul.mubr.bf16.vlgmr.msra.gmra.mrb[16].mxu0 %v717_v41 }
 0x239   : > { %v702_v49 = vpop.f32.mrb[5].mxu1  ;;  %2569 = vmatpush3.bf16.xpose.msra.mxu1 %v940_v45  ;;  %2576 = vmatprep.mubr.msk.bf16.mxu0 %vm2852_vm1, %v2851_v25  ;;  %v711_v51 = vmul.f32 0.35355338, %v700_v48 }
 0x23a   : > { %v704_v50 = vpop.f32.mrb[6].mxu1  ;;  %2586 = vmatprep.subr.bf16.mxu1 %v2851_v25  ;;  %v712_v54 = vmul.f32 0.35355338, %v702_v49 }
 0x23b   : > { %v715_v52 = vmul.f32 0.35355338, %v704_v50  ;;  %v706_v53 = vpop.f32.mrb[7].mxu1 }
 0x23c   : > { %v716_v55 = vmul.f32 0.35355338, %v706_v53  ;;  %v3083_v56 = vpop.f32.mrb[8].mxu0 }
 0x23d   : > { %v719_v57 = vpack.c.bf16 %v715_v52, %v711_v51  ;;  %v3085_v58 = vpop.f32.mrb[9].mxu0 }
 0x23e   : > { %v720_v59 = vpack.c.bf16 %v716_v55, %v712_v54  ;;  %v3087_v60 = vpop.f32.mrb[10].mxu0 }
 0x23f   : > { %v1070_v61 = vpack.c.bf16 %v3087_v60, %v3083_v56  ;;  %v3091_v62 = vpop.f32.mrb[11].mxu0 }
 0x240   : > { %v1071_v63 = vpack.c.bf16 %v3091_v62, %v3085_v58  ;;  %v841_v0 = vpop.f32.mrb[8].mxu1  ;;  %2571 = vmatmul.mubr.bf16.vlgmr.msra.gmra.mrb[24].mxu1 %v717_v41 }
 0x241   : > { %v843_v1 = vpop.f32.mrb[9].mxu1  ;;  %2587 = vmatpush3.bf16.xpose.msra.mxu1 %v851_v31  ;;  %2588 = vmatprep.mubr.msk.bf16.mxu1 %vm2852_vm1, %v2851_v25  ;;  %v1164_v31 = vlaneseq }
 0x242   : > { %v845_v2 = vpop.f32.mrb[10].mxu1  ;;  %2592 = vmatprep.subr.bf16.mxu1 %v2851_v25 }
 0x243   : > { %v852_v3 = vpack.c.bf16 %v845_v2, %v841_v0  ;;  %v847_v4 = vpop.f32.mrb[11].mxu1  ;;  %v1165_v32 = vand.u32 127, %v1164_v31 }
 0x244   : > { %v853_v5 = vpack.c.bf16 %v847_v4, %v843_v1  ;;  %v1108_v6 = vpop.f32.mrb[12].mxu0 }
 0x245   : > { %v3098_v7 = vpop.f32.mrb[13].mxu0  ;;  %vm1166_vm3 = vcmp.lt.s32.totalorder %v1165_v32, 9 }
 0x246   : > { %v1112_v8 = vpop.f32.mrb[14].mxu0  ;;  %v1167_v40 = vsel %vm1166_vm3, 0.0, %v2853_v39 }
 0x247   : > { %v1160_v9 = vpack.c.bf16 %v1112_v8, %v1108_v6  ;;  %v3100_v10 = vpop.f32.mrb[15].mxu0 }
 0x248   : > { %v1161_v11 = vpack.c.bf16 %v3100_v10, %v3098_v7  ;;  %v931_v12 = vpop.f32.mrb[12].mxu1  ;;  %2589 = vmatmul.mubr.bf16.vlgmr.msra.gmra.mrb[28].mxu1 %v718_v43 }
 0x249   : > { %v933_v13 = vpop.f32.mrb[13].mxu1  ;;  %2575 = vmatpush3.bf16.msra.mxu0 %v1160_v9  ;;  %2593 = vmatpush3.bf16.xpose.msra.mxu1 %v941_v47 }
 0x24a   : > { %v935_v14 = vpop.f32.mrb[14].mxu1  ;;  %2594 = vmatprep.mubr.msk.bf16.mxu1 %vm2852_vm1, %v2851_v25  ;;  %2610 = vmatprep.subr.bf16.mxu1 %v2851_v25 }
 0x24b   : > { %v942_v15 = vpack.c.bf16 %v935_v14, %v931_v12  ;;  %v937_v16 = vpop.f32.mrb[15].mxu1  ;;  %2580 = vmatprep.subr.bf16.mxu0 %v2851_v25 }
 0x24c   : > { %v943_v17 = vpack.c.bf16 %v937_v16, %v933_v13 }
 0x250   : > { %v3108_v18 = vpop.f32.mrb[16].mxu1  ;;  %2595 = vmatmul.mubr.bf16.vlgmr.msra.gmra.mrb[32].mxu1 %v718_v43 }
 0x251   : > { %v3110_v19 = vpop.f32.mrb[17].mxu1  ;;  %2611 = vmatpush3.bf16.xpose.msra.mxu1 %v852_v3  ;;  %2612 = vmatprep.mubr.msk.bf16.mxu1 %vm2852_vm1, %v2851_v25 }
 0x252   : > { %v3114_v20 = vpop.f32.mrb[18].mxu1  ;;  %2616 = vmatprep.subr.bf16.mxu1 %v2851_v25 }
 0x253   : > { %v1072_v21 = vpack.c.bf16 %v3114_v20, %v3108_v18  ;;  %v3119_v22 = vpop.f32.mrb[19].mxu1 }
 0x254   : > { %v1073_v23 = vpack.c.bf16 %v3119_v22, %v3110_v19  ;;  %v2740_v19 = vld [vmem:[%s3419_s9 + $0x48] sm:$0xff]   ;;  %v2742_v22 = vld [vmem:[%s3419_s9 + $0x50] sm:$0xff]  }
 0x258   : > { %v3123_v24 = vpop.f32.mrb[20].mxu1  ;;  %2613 = vmatmul.mubr.bf16.vlgmr.msra.gmra.mrb[36].mxu1 %v719_v57 }
 0x259   : > { %v3125_v26 = vpop.f32.mrb[21].mxu1  ;;  %2617 = vmatpush3.bf16.xpose.msra.mxu1 %v942_v15  ;;  %2618 = vmatprep.mubr.msk.bf16.mxu1 %vm2852_vm1, %v2851_v25 }
 0x25a   : > { %v3129_v27 = vpop.f32.mrb[22].mxu1  ;;  %2634 = vmatprep.subr.bf16.mxu1 %v2851_v25 }
 0x25b   : > { %v1162_v28 = vpack.c.bf16 %v3129_v27, %v3123_v24  ;;  %v3134_v29 = vpop.f32.mrb[23].mxu1 }
 0x25c   : > { %v1163_v30 = vpack.c.bf16 %v3134_v29, %v3125_v26  ;;  %v2738_v26 = vld [vmem:[%s3419_s9 + $0x40] sm:$0xff]  }
 0x25d   : > { %v2739_v29 = vld [vmem:[%s3419_s9] sm:$0xff]  }
 0x260   : > { %2619 = vmatmul.mubr.bf16.vlgmr.msra.gmra.mrb[40].mxu1 %v719_v57 }
 0x261   : > { %2635 = vmatpush3.bf16.xpose.msra.mxu1 %v853_v5  ;;  %2636 = vmatprep.mubr.msk.bf16.mxu1 %vm2852_vm1, %v2851_v25 }
 0x262   : > { %2640 = vmatprep.subr.bf16.mxu1 %v2851_v25 }
 0x268   : > { %2637 = vmatmul.mubr.bf16.vlgmr.msra.gmra.mrb[44].mxu1 %v720_v59 }
 0x269   : > { %2641 = vmatpush3.bf16.xpose.msra.mxu1 %v943_v17  ;;  %2642 = vmatprep.mubr.msk.bf16.mxu1 %vm2852_vm1, %v2851_v25 }
 0x26a   : > { %2518 = vmatprep.subr.bf16.mxu1 %v2738_v26 }
 0x270   : > { %2643 = vmatmul.mubr.bf16.vlgmr.msra.gmra.mrb[48].mxu1 %v720_v59 }
 0x271   : > { %2519 = vmatpush3.bf16.msra.mxu1 %v2739_v29 }
 0x272   : > { %2520 = vmatprep.subr.bf16.mxu1 %v2740_v19 }
 0x30b   : > { %v3143_v33 = vpop.f32.mrb[16].mxu0 }
 0x30c   : > { %v2566_v34 = vpop.f32.mrb[17].mxu0  ;;  %v1251_v35 = vsel %vm1250_vm2, %v3143_v33, -inf }
 0x30d   : > { %1252 = vmax.xlane.f32.xlu0 %v1251_v35  ;;  %v3147_v36 = vpop.f32.mrb[18].mxu0 }
 0x30e   : > { %v2567_v37 = vpop.f32.mrb[19].mxu0  ;;  %v1254_v38 = vsel %vm1250_vm2, %v3147_v36, -inf }
 0x30f   : > { %1255 = vmax.xlane.f32.xlu1 %v1254_v38 }
 0x313   : > { %v1243_v41 = vpop.f32.mrb[24].mxu1 }
 0x314   : > { %v3151_v42 = vadd.f32 %v1243_v41, %v1167_v40  ;;  %v2572_v43 = vpop.f32.mrb[25].mxu1 }
 0x315   : > { %v1246_v44 = vpop.f32.mrb[26].mxu1 }
 0x316   : > { %v3153_v45 = vadd.f32 %v1246_v44, %v1167_v40  ;;  %v2573_v46 = vpop.f32.mrb[27].mxu1  ;;  %v1257_v47 = vsel %vm1250_vm2, %v3151_v42, -inf }
 0x317   : > { %1258 = vmax.xlane.f32.xlu0 %v1257_v47 }
 0x318   : > { %v1260_v48 = vsel %vm1250_vm2, %v3153_v45, -inf }
 0x319   : > { %1261 = vmax.xlane.f32.xlu1 %v1260_v48 }
 0x31b   : > { %v3159_v49 = vpop.f32.mrb[28].mxu1 }
 0x31c   : > { %v2590_v50 = vpop.f32.mrb[29].mxu1  ;;  %v1468_v51 = vsel %vm1250_vm2, %v3159_v49, -inf }
 0x31d   : > { %1469 = vmax.xlane.f32.xlu0 %v1468_v51  ;;  %v3163_v52 = vpop.f32.mrb[30].mxu1 }
 0x31e   : > { %v2591_v53 = vpop.f32.mrb[31].mxu1  ;;  %v1471_v54 = vsel %vm1250_vm2, %v3163_v52, -inf }
 0x31f   : > { %1472 = vmax.xlane.f32.xlu1 %v1471_v54 }
 0x323   : > { %v1461_v55 = vpop.f32.mrb[32].mxu1 }
 0x324   : > { %v3167_v57 = vadd.f32 %v1461_v55, %v1167_v40  ;;  %v2596_v59 = vpop.f32.mrb[33].mxu1 }
 0x325   : > { %v1464_v0 = vpop.f32.mrb[34].mxu1 }
 0x326   : > { %v3169_v1 = vadd.f32 %v1464_v0, %v1167_v40  ;;  %v2597_v2 = vpop.f32.mrb[35].mxu1  ;;  %v1474_v3 = vsel %vm1250_vm2, %v3167_v57, -inf }
 0x327   : > { %1475 = vmax.xlane.f32.xlu0 %v1474_v3 }
 0x328   : > { %v1477_v4 = vsel %vm1250_vm2, %v3169_v1, -inf }
 0x329   : > { %1478 = vmax.xlane.f32.xlu1 %v1477_v4 }
 0x32b   : > { %v3175_v5 = vpop.f32.mrb[36].mxu1 }
 0x32c   : > { %v2614_v6 = vpop.f32.mrb[37].mxu1  ;;  %v1685_v8 = vsel %vm1250_vm2, %v3175_v5, -inf }
 0x32d   : > { %1686 = vmax.xlane.f32.xlu0 %v1685_v8  ;;  %v3179_v9 = vpop.f32.mrb[38].mxu1 }
 0x32e   : > { %v2615_v12 = vpop.f32.mrb[39].mxu1  ;;  %v1688_v13 = vsel %vm1250_vm2, %v3179_v9, -inf }
 0x32f   : > { %1689 = vmax.xlane.f32.xlu1 %v1688_v13 }
 0x333   : > { %v1678_v14 = vpop.f32.mrb[40].mxu1 }
 0x334   : > { %v3183_v15 = vadd.f32 %v1678_v14, %v1167_v40  ;;  %v2620_v16 = vpop.f32.mrb[41].mxu1 }
 0x335   : > { %v1681_v17 = vpop.f32.mrb[42].mxu1 }
 0x336   : > { %v3185_v31 = vadd.f32 %v1681_v17, %v1167_v40  ;;  %v2621_v32 = vpop.f32.mrb[43].mxu1  ;;  %v1691_v34 = vsel %vm1250_vm2, %v3183_v15, -inf }
 0x337   : > { %1692 = vmax.xlane.f32.xlu0 %v1691_v34 }
 0x338   : > { %v1694_v35 = vsel %vm1250_vm2, %v3185_v31, -inf }
 0x339   : > { %1695 = vmax.xlane.f32.xlu1 %v1694_v35 }
 0x33b   : > { %v3191_v37 = vpop.f32.mrb[44].mxu1 }
 0x33c   : > { %v2638_v38 = vpop.f32.mrb[45].mxu1  ;;  %v1902_v39 = vsel %vm1250_vm2, %v3191_v37, -inf }
 0x33d   : > { %1903 = vmax.xlane.f32.xlu0 %v1902_v39  ;;  %v3195_v41 = vpop.f32.mrb[46].mxu1 }
 0x33e   : > { %v2639_v43 = vpop.f32.mrb[47].mxu1  ;;  %v1905_v44 = vsel %vm1250_vm2, %v3195_v41, -inf }
 0x33f   : > { %1906 = vmax.xlane.f32.xlu1 %v1905_v44 }
 0x343   : > { %v1895_v46 = vpop.f32.mrb[48].mxu1 }
 0x344   : > { %v3199_v47 = vadd.f32 %v1895_v46, %v1167_v40  ;;  %v2644_v48 = vpop.f32.mrb[49].mxu1 }
 0x345   : > { %v1898_v50 = vpop.f32.mrb[50].mxu1 }
 0x346   : > { %v3201_v51 = vadd.f32 %v1898_v50, %v1167_v40  ;;  %v2645_v53 = vpop.f32.mrb[51].mxu1  ;;  %v1908_v54 = vsel %vm1250_vm2, %v3199_v47, -inf }
 0x347   : > { %1909 = vmax.xlane.f32.xlu0 %v1908_v54 }
 0x348   : > { %v1911_v55 = vsel %vm1250_vm2, %v3201_v51, -inf }
 0x349   : > { %1912 = vmax.xlane.f32.xlu1 %v1911_v55 }
 0x39a   : > { %v1253_v59 = vpop.xlane.xlu0 %1252 }
 0x39c   : > { %v1256_v0 = vpop.xlane.xlu1 %1255 }
 0x3a4   : > { %v1259_v2 = vpop.xlane.xlu0 %1258 }
 0x3a5   : > { %v1263_v3 = vmax.f32 %v1253_v59, %v1259_v2 }
 0x3a6   : > { %v1262_v4 = vpop.xlane.xlu1 %1261 }
 0x3a7   : > { %v1265_v6 = vsub.f32 %v3143_v33, %v1263_v3  ;;  %v1271_v8 = vsub.f32 %v3151_v42, %v1263_v3  ;;  %v1264_v40 = vmax.f32 %v1256_v0, %v1262_v4 }
 0x3a9   : > { %v1267_v12 = vmul.f32 1.442695, %v1265_v6  ;;  %v1273_v13 = vmul.f32 1.442695, %v1271_v8  ;;  %v1266_v14 = vsub.f32 %v3147_v36, %v1264_v40  ;;  %v1272_v16 = vsub.f32 %v3153_v45, %v1264_v40 }
 0x3aa   : > { %v1470_v34 = vpop.xlane.xlu0 %1469 }
 0x3ab   : > { %2778 = vpow2.f32 %v1267_v12  ;;  %v1269_v17 = vmul.f32 1.442695, %v1266_v14  ;;  %v1275_v32 = vmul.f32 1.442695, %v1272_v16 }
 0x3ac   : > { %2780 = vpow2.f32 %v1273_v13  ;;  %v1473_v35 = vpop.xlane.xlu1 %1472 }
 0x3ad   : > { %2782 = vpow2.f32 %v1269_v17 }
 0x3ae   : > { %2784 = vpow2.f32 %v1275_v32 }
 0x3b4   : > { %v1476_v38 = vpop.xlane.xlu0 %1475 }
 0x3b5   : > { %v2779_v39 = vpop.eup %2778  ;;  %v1480_v33 = vmax.f32 %v1470_v34, %v1476_v38 }
 0x3b6   : > { %v2781_v43 = vpop.eup %2780  ;;  %v1479_v42 = vpop.xlane.xlu1 %1478  ;;  %v1277_v44 = vsel %vm1250_vm2, %v2779_v39, 0.0 }
 0x3b7   : > { %v2783_v46 = vpop.eup %2782  ;;  %v1482_v36 = vsub.f32 %v3159_v49, %v1480_v33  ;;  %v1488_v45 = vsub.f32 %v3167_v57, %v1480_v33  ;;  %v1481_v48 = vmax.f32 %v1473_v35, %v1479_v42  ;;  %1278 = vadd.xlane.f32.xlu0 %v1277_v44  ;;  %v1283_v4 = vsel %vm1250_vm2, %v2781_v43, 0.0 }
 0x3b8   : > { %v2785_v50 = vpop.eup %2784  ;;  %v1280_v53 = vsel %vm1250_vm2, %v2783_v46, 0.0  ;;  %v1291_v54 = vpack.c.bf16 %v2783_v46, %v2779_v39 }
 0x3b9   : > { %v1484_v55 = vmul.f32 1.442695, %v1482_v36  ;;  %v1490_v59 = vmul.f32 1.442695, %v1488_v45  ;;  %v1483_v0 = vsub.f32 %v3163_v52, %v1481_v48  ;;  %v1489_v2 = vsub.f32 %v3169_v1, %v1481_v48  ;;  %1281 = vadd.xlane.f32.xlu1 %v1280_v53 }
 0x3ba   : > { %v1292_v3 = vpack.c.bf16 %v2785_v50, %v2781_v43  ;;  %v1286_v57 = vsel %vm1250_vm2, %v2785_v50, 0.0  ;;  %v1687_v52 = vpop.xlane.xlu0 %1686 }
 0x3bb   : > { %2786 = vpow2.f32 %v1484_v55  ;;  %v1486_v49 = vmul.f32 1.442695, %v1483_v0  ;;  %v1492_v6 = vmul.f32 1.442695, %v1489_v2  ;;  %1284 = vadd.xlane.f32.xlu0 %v1283_v4 }
 0x3bc   : > { %2788 = vpow2.f32 %v1490_v59  ;;  %2577 = vmatmul.mubr.msk.bf16.vlgmr.msra.gmra.mrb[20].mxu0 %vm1250_vm2, %v1292_v3  ;;  %v1690_v1 = vpop.xlane.xlu1 %1689 }
 0x3bd   : > { %2790 = vpow2.f32 %v1486_v49  ;;  %2581 = vmatpush3.bf16.msra.mxu0 %v1070_v61  ;;  %1287 = vadd.xlane.f32.xlu1 %v1286_v57 }
 0x3be   : > { %2582 = vmatprep.mubr.msk.bf16.mxu0 %vm2852_vm1, %v2851_v25  ;;  %2598 = vmatprep.subr.bf16.mxu0 %v2851_v25  ;;  %2792 = vpow2.f32 %v1492_v6 }
 0x3c4   : > { %v1693_v8 = vpop.xlane.xlu0 %1692 }
 0x3c5   : > { %v2787_v40 = vpop.eup %2786  ;;  %v1697_v12 = vmax.f32 %v1687_v52, %v1693_v8  ;;  %v2746_v8 = vld [vmem:[%s3419_s9 + $0x60] sm:$0xff]  }
 0x3c6   : > { %v2789_v13 = vpop.eup %2788  ;;  %v1696_v14 = vpop.xlane.xlu1 %1695  ;;  %v1494_v16 = vsel %vm1250_vm2, %v2787_v40, 0.0 }
 0x3c7   : > { %v2791_v17 = vpop.eup %2790  ;;  %v1699_v56 = vsub.f32 %v3175_v5, %v1697_v12  ;;  %v1698_v60 = vmax.f32 %v1690_v1, %v1696_v14  ;;  %1495 = vadd.xlane.f32.xlu0 %v1494_v16  ;;  %v1500_v39 = vsel %vm1250_vm2, %v2789_v13, 0.0  ;;  %v1705_v10 = vsub.f32 %v3183_v15, %v1697_v12  ;;  %v2745_v1 = vld [vmem:[%s3419_s9 + $0x18] sm:$0xff]   ;;  %v2748_v12 = vld [vmem:[%s3419_s9 + $0x68] sm:$0xff]   ;;  %v2750_v14 = vld [vmem:[%s3419_s9 + $0x70] sm:$0xff]  }
 0x3c8   : > { %2583 = vmatmul.mubr.msk.bf16.vlgmr.msra.gmra.mrb[20].mxu0 %vm1250_vm2, %v1291_v54  ;;  %v1497_v61 = vsel %vm1250_vm2, %v2791_v17, 0.0  ;;  %v1508_v32 = vpack.c.bf16 %v2791_v17, %v2787_v40  ;;  %v2793_v34 = vpop.eup %2792  ;;  %v2747_v40 = vld [vmem:[%s3419_s9 + $0x20] sm:$0xff]   ;;  %v2751_v16 = vld [vmem:[%s3419_s9 + $0x30] sm:$0xff]   ;;  %v2752_v17 = vld [vmem:[%s3419_s9 + $0x78] sm:$0xff]  }
 0x3c9   : > { %v1701_v35 = vmul.f32 1.442695, %v1699_v56  ;;  %2599 = vmatpush3.bf16.msra.mxu0 %v1161_v11  ;;  %v1700_v38 = vsub.f32 %v3179_v9, %v1698_v60  ;;  %1498 = vadd.xlane.f32.xlu1 %v1497_v61  ;;  %v1503_v33 = vsel %vm1250_vm2, %v2793_v34, 0.0  ;;  %v1706_v43 = vsub.f32 %v3185_v31, %v1698_v60  ;;  %v2753_v56 = vld [vmem:[%s3419_s9 + $0x38] sm:$0xff]   ;;  %v2754_v60 = vld [vmem:[%s3419_s9 + $0xc0] sm:$0xff]  }
 0x3ca   : > { %2600 = vmatprep.mubr.msk.bf16.mxu0 %vm2852_vm1, %v2851_v25  ;;  %2604 = vmatprep.subr.bf16.mxu0 %v2851_v25  ;;  %v1509_v7 = vpack.c.bf16 %v2793_v34, %v2789_v13  ;;  %v1904_v11 = vpop.xlane.xlu0 %1903  ;;  %v1707_v44 = vmul.f32 1.442695, %v1705_v10  ;;  %v2749_v13 = vld [vmem:[%s3419_s9 + $0x28] sm:$0xff]   ;;  %v2755_v61 = vld [vmem:[%s3419_s9 + $0x80] sm:$0xff]  }
 0x3cb   : > { %2794 = vpow2.f32 %v1701_v35  ;;  %v1703_v5 = vmul.f32 1.442695, %v1700_v38  ;;  %1501 = vadd.xlane.f32.xlu0 %v1500_v39  ;;  %v1709_v9 = vmul.f32 1.442695, %v1706_v43  ;;  %v2757_v34 = vld [vmem:[%s3419_s9 + $0x88] sm:$0xff]   ;;  %v2758_v35 = vld [vmem:[%s3419_s9 + $0xd0] sm:$0xff]  }
 0x3cc   : > { %v1907_v42 = vpop.xlane.xlu1 %1906  ;;  %v2759_v38 = vld [vmem:[%s3419_s9 + $0x90] sm:$0xff]   ;;  %v2760_v39 = vld [vmem:[%s3419_s9 + $0xd8] sm:$0xff]   ;;  %v2763_v43 = vld [vmem:[%s3419_s9 + $0xa0] sm:$0xff]  }
 0x3cd   : > { %2796 = vpow2.f32 %v1703_v5  ;;  %1504 = vadd.xlane.f32.xlu1 %v1503_v33  ;;  %v2761_v5 = vld [vmem:[%s3419_s9 + $0x98] sm:$0xff]   ;;  %v2762_v33 = vld [vmem:[%s3419_s9 + $0xe0] sm:$0xff]   ;;  %v2765_v10 = vld [vmem:[%s3419_s9 + $0xa8] sm:$0xff]  }
 0x3ce   : > { %2798 = vpow2.f32 %v1709_v9  ;;  %v2767_v9 = vld [vmem:[%s3419_s9 + $0xb0] sm:$0xff]  }
 0x3cf   : > { %2800 = vpow2.f32 %v1707_v44  ;;  %v2769_v44 = vld [vmem:[%s3419_s9 + $0xb8] sm:$0xff]  }
 0x3d0   : > { %2601 = vmatmul.mubr.msk.bf16.vlgmr.msra.gmra.mrb[24].mxu0 %vm1250_vm2, %v1509_v7  ;;  %v2764_v7 = vld [vmem:[%s3419_s9 + $0xe8] sm:$0xff]  }
 0x3d1   : > { %2605 = vmatpush3.bf16.msra.mxu0 %v1071_v63  ;;  %2606 = vmatprep.mubr.msk.bf16.mxu0 %vm2852_vm1, %v2851_v25 }
 0x3d2   : > { %2622 = vmatprep.subr.bf16.mxu0 %v2851_v25 }
 0x3d4   : > { %v1910_v31 = vpop.xlane.xlu0 %1909 }
 0x3d5   : > { %v2795_v46 = vpop.eup %2794  ;;  %v1914_v36 = vmax.f32 %v1904_v11, %v1910_v31  ;;  %v2766_v11 = vld [vmem:[%s3419_s9 + $0xf0] sm:$0xff]  }
 0x3d6   : > { %v1913_v15 = vpop.xlane.xlu1 %1912  ;;  %v1711_v45 = vsel %vm1250_vm2, %v2795_v46, 0.0 }
 0x3d7   : > { %v2797_v48 = vpop.eup %2796  ;;  %v1916_v50 = vsub.f32 %v3191_v37, %v1914_v36  ;;  %v1922_v58 = vsub.f32 %v3199_v47, %v1914_v36  ;;  %v1915_v62 = vmax.f32 %v1907_v42, %v1913_v15  ;;  %1712 = vadd.xlane.f32.xlu0 %v1711_v45  ;;  %v2768_v42 = vld [vmem:[%s3419_s9 + $0xf8] sm:$0xff]  }
 0x3d8   : > { %v1714_v63 = vsel %vm1250_vm2, %v2797_v48, 0.0  ;;  %v1725_v53 = vpack.c.bf16 %v2797_v48, %v2795_v46  ;;  %v2799_v37 = vpop.eup %2798 }
 0x3d9   : > { %v1918_v54 = vmul.f32 1.442695, %v1916_v50  ;;  %v1924_v55 = vmul.f32 1.442695, %v1922_v58  ;;  %v1917_v59 = vsub.f32 %v3195_v41, %v1915_v62  ;;  %v1923_v0 = vsub.f32 %v3201_v51, %v1915_v62  ;;  %1715 = vadd.xlane.f32.xlu1 %v1714_v63  ;;  %v2801_v41 = vpop.eup %2800 }
 0x3da   : > { %v1726_v47 = vpack.c.bf16 %v2799_v37, %v2801_v41  ;;  %v1717_v20 = vsel %vm1250_vm2, %v2801_v41, 0.0 }
 0x3db   : > { %2802 = vpow2.f32 %v1918_v54  ;;  %v1920_v2 = vmul.f32 1.442695, %v1917_v59  ;;  %v1926_v3 = vmul.f32 1.442695, %v1923_v0 }
 0x3dc   : > { %2804 = vpow2.f32 %v1924_v55  ;;  %2607 = vmatmul.mubr.msk.bf16.vlgmr.msra.gmra.mrb[24].mxu0 %vm1250_vm2, %v1508_v32  ;;  %v2756_v32 = vld [vmem:[%s3419_s9 + $0xc8] sm:$0xff]  }
 0x3dd   : > { %2806 = vpow2.f32 %v1920_v2  ;;  %2623 = vmatpush3.bf16.msra.mxu0 %v1162_v28  ;;  %2624 = vmatprep.mubr.msk.bf16.mxu0 %vm2852_vm1, %v2851_v25 }
 0x3de   : > { %2628 = vmatprep.subr.bf16.mxu0 %v2851_v25  ;;  %2808 = vpow2.f32 %v1926_v3 }
 0x3e4   : > { %2625 = vmatmul.mubr.msk.bf16.vlgmr.msra.gmra.mrb[28].mxu0 %vm1250_vm2, %v1726_v47 }
 0x3e5   : > { %v2803_v51 = vpop.eup %2802  ;;  %2629 = vmatpush3.bf16.msra.mxu0 %v1072_v21  ;;  %2630 = vmatprep.mubr.msk.bf16.mxu0 %vm2852_vm1, %v2851_v25  ;;  %v1720_v21 = vsel %vm1250_vm2, %v2799_v37, 0.0 }
 0x3e6   : > { %v2805_v24 = vpop.eup %2804  ;;  %v1928_v27 = vsel %vm1250_vm2, %v2803_v51, 0.0  ;;  %2646 = vmatprep.subr.bf16.mxu0 %v2851_v25 }
 0x3e7   : > { %v2807_v28 = vpop.eup %2806  ;;  %1929 = vadd.xlane.f32.xlu0 %v1928_v27  ;;  %v1934_v57 = vsel %vm1250_vm2, %v2805_v24, 0.0 }
 0x3e8   : > { %v1931_v4 = vsel %vm1250_vm2, %v2807_v28, 0.0  ;;  %v1942_v49 = vpack.c.bf16 %v2807_v28, %v2803_v51  ;;  %v2809_v6 = vpop.eup %2808 }
 0x3e9   : > { %1932 = vadd.xlane.f32.xlu1 %v1931_v4  ;;  %v1937_v18 = vsel %vm1250_vm2, %v2809_v6, 0.0  ;;  %v1943_v52 = vpack.c.bf16 %v2809_v6, %v2805_v24 }
 0x3eb   : > { %1935 = vadd.xlane.f32.xlu0 %v1934_v57 }
 0x3ed   : > { %1938 = vadd.xlane.f32.xlu1 %v1937_v18 }
 0x3ef   : > { %1718 = vadd.xlane.f32.xlu0 %v1717_v20 }
 0x3f0   : > { %2631 = vmatmul.mubr.msk.bf16.vlgmr.msra.gmra.mrb[28].mxu0 %vm1250_vm2, %v1725_v53 }
 0x3f1   : > { %2647 = vmatpush3.bf16.msra.mxu0 %v1163_v30  ;;  %1721 = vadd.xlane.f32.xlu1 %v1720_v21  ;;  %v2744_v30 = vld [vmem:[%s3419_s9 + $0x58] sm:$0xff]  }
 0x3f2   : > { %2648 = vmatprep.mubr.msk.bf16.mxu0 %vm2852_vm1, %v2851_v25  ;;  %2652 = vmatprep.subr.bf16.mxu0 %v2851_v25 }
 0x3f8   : > { %2649 = vmatmul.mubr.msk.bf16.vlgmr.msra.gmra.mrb[32].mxu0 %vm1250_vm2, %v1943_v52 }
 0x3f9   : > { %2653 = vmatpush3.bf16.msra.mxu0 %v1073_v23  ;;  %2654 = vmatprep.mubr.msk.bf16.mxu0 %vm2852_vm1, %v2851_v25  ;;  %v2741_v25 = vld [vmem:[%s3419_s9 + $0x8] sm:$0xff]   ;;  %v2743_v23 = vld [vmem:[%s3419_s9 + $0x10] sm:$0xff]  }
 0x3fa   : > { %2521 = vmatpush3.bf16.msra.mxu1 %v2741_v25  ;;  %2540 = vmatprep.subr.bf16.mxu0 %v2754_v60 }
 0x3fb   : > { %2522 = vmatprep.subr.bf16.mxu1 %v2742_v22 }
 0x3fe   : > { %2523 = vmatpush3.bf16.msra.mxu1 %v2743_v23 }
 0x3ff   : > { %2524 = vmatprep.subr.bf16.mxu1 %v2744_v30 }
 0x402   : > { %2525 = vmatpush3.bf16.msra.mxu1 %v2745_v1 }
 0x403   : > { %2526 = vmatprep.subr.bf16.mxu1 %v2746_v8 }
 0x404   : > { %2655 = vmatmul.mubr.msk.bf16.vlgmr.msra.gmra.mrb[32].mxu0 %vm1250_vm2, %v1942_v49 }
 0x405   : > { %2541 = vmatpush3.bf16.msra.mxu0 %v2755_v61 }
 0x406   : > { %2527 = vmatpush3.bf16.msra.mxu1 %v2747_v40  ;;  %2542 = vmatprep.subr.bf16.mxu0 %v2756_v32 }
 0x407   : > { %2528 = vmatprep.subr.bf16.mxu1 %v2748_v12 }
 0x409   : > { %2543 = vmatpush3.bf16.msra.mxu0 %v2757_v34 }
 0x40a   : > { %2529 = vmatpush3.bf16.msra.mxu1 %v2749_v13  ;;  %2544 = vmatprep.subr.bf16.mxu0 %v2758_v35 }
 0x40b   : > { %2530 = vmatprep.subr.bf16.mxu1 %v2750_v14 }
 0x40d   : > { %2545 = vmatpush3.bf16.msra.mxu0 %v2759_v38 }
 0x40e   : > { %2531 = vmatpush3.bf16.msra.mxu1 %v2751_v16  ;;  %2546 = vmatprep.subr.bf16.mxu0 %v2760_v39 }
 0x40f   : > { %2532 = vmatprep.subr.bf16.mxu1 %v2752_v17 }
 0x411   : > { %2547 = vmatpush3.bf16.msra.mxu0 %v2761_v5 }
 0x412   : > { %2533 = vmatpush3.bf16.msra.mxu1 %v2753_v56  ;;  %2548 = vmatprep.subr.bf16.mxu0 %v2762_v33 }
 0x415   : > { %2549 = vmatpush3.bf16.msra.mxu0 %v2763_v43 }
 0x416   : > { %2550 = vmatprep.subr.bf16.mxu0 %v2764_v7 }
 0x419   : > { %2551 = vmatpush3.bf16.msra.mxu0 %v2765_v10 }
 0x41a   : > { %2552 = vmatprep.subr.bf16.mxu0 %v2766_v11  ;;  %v475_v11 = vld [vmem:[%s3411_s1] sm:$0xff] }
 0x41b   : > { %477 = vst.msk [vmem:[#allocation4] sm:$0xff] %vm381_vm0, %v475_v11 }
 0x41d   : > { %2553 = vmatpush3.bf16.msra.mxu0 %v2767_v9  ;;  %v476_v9 = vld [vmem:[%s3411_s1 + $0x8] sm:$0xff] }
 0x41e   : > { %2554 = vmatprep.subr.bf16.mxu0 %v2768_v42  ;;  %478 = vst.msk [vmem:[#allocation4 + $0x8] sm:$0xff] %vm381_vm0, %v476_v9 }
 0x421   : > { %2555 = vmatpush3.bf16.msra.mxu0 %v2769_v44 }
 0x444   : > { %v1279_v31 = vpop.xlane.xlu0 %1278 }
 0x446   : > { %v1282_v46 = vpop.xlane.xlu1 %1281 }
 0x448   : > { %v1285_v36 = vpop.xlane.xlu0 %1284 }
 0x449   : > { %v1289_v45 = vadd.f32 %v1285_v36, %v1279_v31 }
 0x44a   : > { %v1288_v15 = vpop.xlane.xlu1 %1287 }
 0x44b   : > { %v1290_v48 = vadd.f32 %v1288_v15, %v1282_v46  ;;  %2810 = vrcp.f32 %v1289_v45 }
 0x44d   : > { %2812 = vrcp.f32 %v1290_v48 }
 0x454   : > { %v1496_v50 = vpop.xlane.xlu0 %1495 }
 0x455   : > { %v2811_v63 = vpop.eup %2810 }
 0x456   : > { %v1499_v58 = vpop.xlane.xlu1 %1498 }
 0x457   : > { %v2813_v54 = vpop.eup %2812 }
 0x458   : > { %v1502_v3 = vpop.xlane.xlu0 %1501 }
 0x459   : > { %v1506_v47 = vadd.f32 %v1502_v3, %v1496_v50 }
 0x45a   : > { %v1505_v37 = vpop.xlane.xlu1 %1504 }
 0x45b   : > { %v1507_v51 = vadd.f32 %v1505_v37, %v1499_v58  ;;  %2814 = vrcp.f32 %v1506_v47 }
 0x45d   : > { %2816 = vrcp.f32 %v1507_v51 }
 0x464   : > { %v1713_v24 = vpop.xlane.xlu0 %1712 }
 0x465   : > { %v2815_v18 = vpop.eup %2814 }
 0x466   : > { %v1716_v27 = vpop.xlane.xlu1 %1715 }
 0x467   : > { %v2817_v21 = vpop.eup %2816 }
 0x474   : > { %v1930_v28 = vpop.xlane.xlu0 %1929 }
 0x476   : > { %v1933_v4 = vpop.xlane.xlu1 %1932 }
 0x478   : > { %v1936_v49 = vpop.xlane.xlu0 %1935 }
 0x479   : > { %v1940_v61 = vadd.f32 %v1936_v49, %v1930_v28 }
 0x47a   : > { %v1939_v6 = vpop.xlane.xlu1 %1938 }
 0x47b   : > { %v1941_v32 = vadd.f32 %v1939_v6, %v1933_v4 }
 0x47c   : > { %v1719_v25 = vpop.xlane.xlu0 %1718 }
 0x47d   : > { %v1723_v30 = vadd.f32 %v1719_v25, %v1713_v24 }
 0x47e   : > { %v1722_v22 = vpop.xlane.xlu1 %1721 }
 0x47f   : > { %v1724_v1 = vadd.f32 %v1722_v22, %v1716_v27  ;;  %2818 = vrcp.f32 %v1723_v30 }
 0x481   : > { %2820 = vrcp.f32 %v1724_v1 }
 0x482   : > { %2822 = vrcp.f32 %v1940_v61 }
 0x483   : > { %2824 = vrcp.f32 %v1941_v32 }
 0x489   : > { %v2819_v40 = vpop.eup %2818 }
 0x48b   : > { %v2821_v13 = vpop.eup %2820 }
 0x48c   : > { %v2823_v35 = vpop.eup %2822 }
 0x48d   : > { %v2825_v39 = vpop.eup %2824 }
 0x49b   : > { %v1374_v62 = vpop.f32.mrb[20].mxu0 }
 0x49c   : > { %v2584_v53 = vpop.f32.mrb[21].mxu0  ;;  %v1383_v59 = vmul.f32 %v2811_v63, %v1374_v62  ;;  %v2037_v62 = vld [vmem:[#allocation4] sm:$0xff] }
 0x49d   : > { %v1377_v55 = vpop.f32.mrb[22].mxu0 }
 0x49e   : > { %v1384_v0 = vmul.f32 %v2813_v54, %v1377_v55  ;;  %v2585_v2 = vpop.f32.mrb[23].mxu0  ;;  %v2038_v55 = vld [vmem:[#allocation4 + $0x8] sm:$0xff] }
 0x4a0   : > { %v1385_v41 = vpack.c.bf16 %v1384_v0, %v1383_v59 }
 0x4af   : > { %v1591_v57 = vpop.f32.mrb[24].mxu0 }
 0x4b0   : > { %v2608_v20 = vpop.f32.mrb[25].mxu0  ;;  %v1600_v26 = vmul.f32 %v2815_v18, %v1591_v57 }
 0x4b1   : > { %v1594_v52 = vpop.f32.mrb[26].mxu0 }
 0x4b2   : > { %v1601_v29 = vmul.f32 %v2817_v21, %v1594_v52  ;;  %v2609_v19 = vpop.f32.mrb[27].mxu0 }
 0x4b4   : > { %v1602_v23 = vpack.c.bf16 %v1601_v29, %v1600_v26 }
 0x4b6   : > { %2263 = vmatprep.mubr.bf16.mxu1 %v1602_v23 }
 0x4b7   : > { %2264 = vmatmul.mubr.bf16.vlgmr.msra.gmra.mrb[52].mxu1 %v1385_v41 }
 0x4c3   : > { %v1808_v8 = vpop.f32.mrb[28].mxu0 }
 0x4c4   : > { %v2632_v12 = vpop.f32.mrb[29].mxu0  ;;  %v1817_v16 = vmul.f32 %v2819_v40, %v1808_v8 }
 0x4c5   : > { %v1811_v14 = vpop.f32.mrb[30].mxu0 }
 0x4c6   : > { %v1818_v17 = vmul.f32 %v2821_v13, %v1811_v14  ;;  %v2633_v56 = vpop.f32.mrb[31].mxu0 }
 0x4c8   : > { %v1819_v60 = vpack.c.bf16 %v1818_v17, %v1817_v16 }
 0x4d7   : > { %v2025_v34 = vpop.f32.mrb[32].mxu0 }
 0x4d8   : > { %v2656_v38 = vpop.f32.mrb[33].mxu0  ;;  %v2034_v33 = vmul.f32 %v2823_v35, %v2025_v34 }
 0x4d9   : > { %v2028_v5 = vpop.f32.mrb[34].mxu0 }
 0x4da   : > { %v2035_v43 = vmul.f32 %v2825_v39, %v2028_v5  ;;  %v2657_v7 = vpop.f32.mrb[35].mxu0 }
 0x4dc   : > { %v2036_v10 = vpack.c.bf16 %v2035_v43, %v2034_v33 }
 0x4de   : > { %2304 = vmatprep.mubr.bf16.mxu0 %v2036_v10 }
 0x4df   : > { %2305 = vmatmul.mubr.bf16.vlgmr.msra.gmra.mrb[36].mxu0 %v1819_v60 }
 0x58a   : > { %v2534_v42 = vpop.f32.mrb[52].mxu1 }
 0x58b   : > { %v2535_v44 = vpop.f32.mrb[53].mxu1 }
 0x58c   : > { %v2536_v31 = vadd.f32 %v2535_v44, %v2534_v42  ;;  %v2537_v46 = vpop.f32.mrb[54].mxu1 }
 0x58d   : > { %v2538_v36 = vpop.f32.mrb[55].mxu1 }
 0x58e   : > { %v2539_v15 = vadd.f32 %v2538_v36, %v2537_v46 }
 0x5b2   : > { %v2556_v45 = vpop.f32.mrb[36].mxu0 }
 0x5b3   : > { %v2557_v48 = vpop.f32.mrb[37].mxu0 }
 0x5b4   : > { %v2558_v50 = vadd.f32 %v2557_v48, %v2556_v45  ;;  %v2559_v58 = vpop.f32.mrb[38].mxu0 }
 0x5b5   : > { %v2560_v63 = vpop.f32.mrb[39].mxu0 }
 0x5b6   : > { %v2307_v53 = vadd.f32 %v2558_v50, %v2536_v31  ;;  %v2561_v54 = vadd.f32 %v2560_v63, %v2559_v58 }
 0x5b8   : > { %v2313_v59 = vadd.f32 %v2307_v53, %v2037_v62  ;;  %v2310_v0 = vadd.f32 %v2561_v54, %v2539_v15 }
 0x5ba   : > { %2315 = vst.msk [vmem:[#allocation4] sm:$0xff] %vm381_vm0, %v2313_v59  ;;  %v2314_v2 = vadd.f32 %v2310_v0, %v2038_v55 }
 0x5bc   : > { %2316 = vst.msk [vmem:[#allocation4 + $0x8] sm:$0xff] %vm381_vm0, %v2314_v2 }
 0x5c1   : > { %v2320_v3 = vld [vmem:[#allocation4] sm:$0xff] }
 0x5c2   : > { %2322 = vst.msk [vmem:[%s371_s11] sm:$0xff] %vm381_vm0, %v2320_v3 }
 0x5c3   : > { %v2321_v37 = vld [vmem:[#allocation4 + $0x8] sm:$0xff] }
 0x5c4   : > { %2323 = vst.msk [vmem:[%s371_s11 + $0x8] sm:$0xff] %vm381_vm0, %v2321_v37 }
 0x5c5 PF: > { %s20_s15 = sadd.s32 1, %s2848_s15   ;;  %s3421_s13 = smov %s2844_s14 }
 0x5c6   : > { %p17_p5 = scmp.ge.s32.totalorder %s20_s15, 4   ;;  %s3422_s14 = smov %s3424_s16 }
 0x5c8   :  { %19 = sbr.rel (!%p17_p5) target bundleno = 2 (0x2), region = 102 }

</bundles_post_ra>
